<compile_context>
chip_gen: v7x
topology: tpu7x:2x2x1
jax: 0.10.0
libtpu: 0.0.40
codegen_flags: <defaults>
</compile_context>

<pallas_src>
import functools
import math

import jax
import jax.numpy as jnp
from jax import lax
from jax.experimental import pallas as pl
from jax.experimental.pallas import tpu as pltpu


# ------------------------------ config -------------------------------------
class Cfg:
    num_features = 4
    seq_len = 16
    use_norm = True
    d_model = 32
    d_state = 8
    d_ff = 64
    dropout = 0.0          # identity at inference
    activation = "relu"
    e_layers = 2
    mamba_output_dim = 16
    finbert_output_dim = 8
    # mamba_ssm defaults
    expand = 2
    d_conv = 4

    @property
    def d_inner(self):
        return self.expand * self.d_model

    @property
    def dt_rank(self):
        return max(1, math.ceil(self.d_model / 16))


CFG = Cfg()

# Explicit VMEM limit; total weights (incl. double-buffering) are ~2 MiB, so
# 32 MiB is safe on every generation including v7x's 64 MiB physical VMEM.
VMEM_LIMIT = 32 * 1024 * 1024

# head MLP widths (original torch sizes) and their lane-dense padded versions
DIM1, DIM2, DIM3 = 500, 100, 25
DIM1_PAD, DIM2_PAD, DIM3_PAD = 512, 128, 128


# --------------------------- small in-kernel helpers -------------------------
def _sigmoid(x):
    # 1/(1+exp(-x)) with the divide on the EUP approx-reciprocal path.
    return pl.reciprocal(1.0 + jnp.exp(-x), approx=True)


def _silu(x):
    return x * _sigmoid(x)


def _softplus(x):
    # stable softplus using only exp/log/abs/max (plain VPU/EUP ops)
    return jnp.maximum(x, 0.0) + jnp.log(1.0 + jnp.exp(-jnp.abs(x)))


def _layer_norm(x, g, b, eps=1e-5):
    mu = jnp.mean(x, axis=-1, keepdims=True)
    xc = x - mu
    var = jnp.mean(xc * xc, axis=-1, keepdims=True)
    return xc * lax.rsqrt(var + eps) * g + b


def _rev_rows(m):
    # reverse a small [T, C] array along tokens with static slices (T tiny)
    T = m.shape[0]
    return jnp.concatenate([m[t:t + 1] for t in range(T - 1, -1, -1)], axis=0)


def _full_spec(a):
    n = a.ndim
    return pl.BlockSpec(a.shape, lambda *args, _n=n: (0,) * _n)


# --------------------------- fused forward kernel ----------------------------
def _fused_forward_kernel(use_norm, activation, e_layers, d_inner, d_state, d_conv,
                          # per-batch data
                          x2_ref, fin_ref,
                          # embedding
                          emb_w_ref, emb_b_ref,
                          # stacked per-layer weights (leading axis = e_layers)
                          w_in_ref, conv_w_ref, conv_b_ref,
                          w_dt_ref, dt_b_ref, w_bc_ref, At_ref, D_ref, w_out_ref,
                          n1g_ref, n1b_ref, ff1w_ref, ff1b_ref,
                          ff2w_ref, ff2b_ref, n2g_ref, n2b_ref,
                          # head
                          hng_ref, hnb_ref, pw_ref, pb_ref,
                          fc1w_ref, fc1b_ref, fc2w_ref, fc2b_ref,
                          fc3w_ref, fc3b_ref, fc4w_ref, fc4b_ref,
                          # output
                          o_ref):
    f32 = jnp.float32
    di2 = 2 * d_inner                       # fused fwd|bwd lane width (=128)

    # ---------------- inverted embedding (per-variate norm + Linear) ---------
    x = x2_ref[0]                           # [N, L]
    T = x.shape[0]                          # tokens == variates
    if use_norm:
        mu = jnp.mean(x, axis=-1, keepdims=True)
        xc0 = x - mu
        var = jnp.mean(xc0 * xc0, axis=-1, keepdims=True)
        x = xc0 * lax.rsqrt(var + 1e-5)
    h = jnp.dot(x, emb_w_ref[...], preferred_element_type=f32) + emb_b_ref[...]

    # ---------------- encoder layers (static loop, weights stay in VMEM) -----
    for li in range(e_layers):
        # fused in_proj, column layout [x_f | x_b | z_f | z_b]
        xz = jnp.dot(h, w_in_ref[li], preferred_element_type=f32)   # [T, 4*d_inner]
        x_cat = xz[:, :di2]                                          # [x_f | x_b]
        z_cat = xz[:, di2:]                                          # [z_f | z_b]

        # pre-reverse the bwd half so both directions run a causal conv + fwd scan
        x_proc = jnp.concatenate(
            [x_cat[:, :d_inner], _rev_rows(x_cat[:, d_inner:])], axis=1)  # [T, 128]

        # depthwise causal conv: one padded slab + d_conv FMAs
        cw = conv_w_ref[li]                                          # [d_conv, 128]
        xpad = jnp.concatenate(
            [jnp.zeros((d_conv - 1, di2), f32), x_proc], axis=0)     # [T+3, 128]
        acc = jnp.zeros((T, di2), f32)
        for k in range(d_conv):
            acc = acc + xpad[k:k + T, :] * cw[k:k + 1, :]
        xc = _silu(acc + conv_b_ref[li])                             # [T, 128]

        # dt (block-diag, 128-wide) and B/C (block-diag, 32-wide) projections
        dt = _softplus(jnp.dot(xc, w_dt_ref[li], preferred_element_type=f32)
                       + dt_b_ref[li])                               # [T, 128]
        bc = jnp.dot(xc, w_bc_ref[li], preferred_element_type=f32)   # [T, 32]
        Bf = bc[:, 0:d_state]
        Cf = bc[:, d_state:2 * d_state]
        Bb = bc[:, 2 * d_state:3 * d_state]
        Cb = bc[:, 3 * d_state:4 * d_state]

        # vectorized-over-tokens precompute (off the serial scan path)
        At = At_ref[li]                                              # [8, 128]
        dA = jnp.exp(dt[:, None, :] * At[None, :, :])                # [T, 8, 128]
        dtu = dt * xc                                                # [T, 128]
        B_full = jnp.concatenate(
            [jnp.broadcast_to(Bf[:, :, None], (T, d_state, d_inner)),
             jnp.broadcast_to(Bb[:, :, None], (T, d_state, d_inner))], axis=2)
        C_full = jnp.concatenate(
            [jnp.broadcast_to(Cf[:, :, None], (T, d_state, d_inner)),
             jnp.broadcast_to(Cb[:, :, None], (T, d_state, d_inner))], axis=2)
        dBu = B_full * dtu[:, None, :]                               # [T, 8, 128]

        # fused fwd+bwd selective scan; state = one [8,128] f32 vreg
        hs = jnp.zeros((d_state, di2), f32)
        ys = []
        for t in range(T):
            hs = dA[t] * hs + dBu[t]
            ys.append(jnp.sum(hs * C_full[t], axis=0, keepdims=True))
        y = jnp.concatenate(ys, axis=0) + D_ref[li] * xc             # [T, 128]

        # un-reverse the bwd half, gate, fused out_proj
        y = jnp.concatenate([y[:, :d_inner], _rev_rows(y[:, d_inner:])], axis=1)
        y = y * _silu(z_cat)
        attn = jnp.dot(y, w_out_ref[li], preferred_element_type=f32)  # [T, d_model]

        # residual + LN + FFN + LN
        xn = _layer_norm(h + attn, n1g_ref[li], n1b_ref[li])
        h1 = jnp.dot(xn, ff1w_ref[li], preferred_element_type=f32) + ff1b_ref[li]
        if activation == "relu":
            h1 = jnp.maximum(h1, 0.0)
        else:
            h1 = jax.nn.gelu(h1, approximate=True)
        h2 = jnp.dot(h1, ff2w_ref[li], preferred_element_type=f32) + ff2b_ref[li]
        h = _layer_norm(xn + h2, n2g_ref[li], n2b_ref[li])

    # ---------------- head: norm, pools, projection, MLP ---------------------
    hn = _layer_norm(h, hng_ref[...], hnb_ref[...])                  # [N, d_model]
    pooled = jnp.mean(hn, axis=0, keepdims=True)                     # [1, d_model]
    x2_out = jnp.dot(pooled, pw_ref[...], preferred_element_type=f32) + pb_ref[...]

    fin = fin_ref[0]                                                 # [L, fb]
    fin_mean = jnp.mean(fin, axis=0, keepdims=True)                  # [1, fb]

    a = jnp.concatenate([fin_mean, x2_out], axis=1)                  # [1, fb+mamba]
    a = jnp.maximum(jnp.dot(a, fc1w_ref[...], preferred_element_type=f32)
                    + fc1b_ref[...], 0.0)                            # [1, 512]
    a = jnp.maximum(jnp.dot(a, fc2w_ref[...], preferred_element_type=f32)
                    + fc2b_ref[...], 0.0)                            # [1, 128]
    a = jnp.maximum(jnp.dot(a, fc3w_ref[...], preferred_element_type=f32)
                    + fc3b_ref[...], 0.0)                            # [1, 128]
    out = (jnp.dot(a, fc4w_ref[...], preferred_element_type=f32)
           + fc4b_ref[...])                                          # [1, 1]
    o_ref[0] = out


# ------------------------------ model forward --------------------------------
def mamba_llm_forward(params, x_enc, cfg):
    fb = cfg.finbert_output_dim
    split = x_enc.shape[-1] - fb
    x1 = x_enc[..., :split]                                  # [B, T, num_features]
    x_fin = x_enc[..., split:].astype(jnp.float32)           # [B, T, fb]
    x2 = jnp.transpose(x1, (0, 2, 1)).astype(jnp.float32)    # [B, N, L]
    B, N, L = x2.shape
    Tt = x_fin.shape[1]

    p = params
    weight_args = [
        p["embed_w"], p["embed_b"],
        p["L_w_in"], p["L_conv_w"], p["L_conv_b"],
        p["L_w_dt"], p["L_dt_bias"], p["L_w_bc"], p["L_At"], p["L_D"], p["L_w_out"],
        p["L_n1g"], p["L_n1b"], p["L_ff1w"], p["L_ff1b"],
        p["L_ff2w"], p["L_ff2b"], p["L_n2g"], p["L_n2b"],
        p["norm_g"], p["norm_b"], p["proj_w"], p["proj_b"],
        p["fc1_w"], p["fc1_b"], p["fc2_w"], p["fc2_b"],
        p["fc3_w"], p["fc3_b"], p["fc4_w"], p["fc4_b"],
    ]
    kern = functools.partial(
        _fused_forward_kernel, cfg.use_norm, cfg.activation, cfg.e_layers,
        cfg.d_inner, cfg.d_state, cfg.d_conv)

    in_specs = [pl.BlockSpec((1, N, L), lambda b: (b, 0, 0)),
                pl.BlockSpec((1, Tt, fb), lambda b: (b, 0, 0))]
    in_specs += [_full_spec(w) for w in weight_args]

    out = pl.pallas_call(
        kern,
        out_shape=jax.ShapeDtypeStruct((B, 1, 1), jnp.float32),
        grid=(B,),
        in_specs=in_specs,
        out_specs=pl.BlockSpec((1, 1, 1), lambda b: (b, 0, 0)),
        compiler_params=pltpu.CompilerParams(
            dimension_semantics=("parallel",),       # one batch element per TC on v7x
            vmem_limit_bytes=VMEM_LIMIT),
    )(x2, x_fin, *weight_args)
    return out.reshape(B, 1)


# ------------------------------- params --------------------------------------
def init_params(key, cfg):
    state = {"key": key}

    def nxt():
        state["key"], sub = jax.random.split(state["key"])
        return sub

    def dense(shape, scale=0.02):
        return (scale * jax.random.normal(nxt(), shape)).astype(jnp.float32)

    def mamba_params():
        return dict(
            in_proj_w=dense((cfg.d_model, 2 * cfg.d_inner)),
            conv_w=dense((cfg.d_conv, cfg.d_inner), 0.1),
            conv_b=jnp.zeros((cfg.d_inner,), jnp.float32),
            x_proj_w=dense((cfg.d_inner, cfg.dt_rank + 2 * cfg.d_state)),
            dt_proj_w=dense((cfg.dt_rank, cfg.d_inner), 0.1),
            dt_proj_b=dense((cfg.d_inner,), 0.1),
            A_log=jnp.log(jnp.broadcast_to(
                jnp.arange(1, cfg.d_state + 1, dtype=jnp.float32),
                (cfg.d_inner, cfg.d_state))),
            D=jnp.ones((cfg.d_inner,), jnp.float32),
            out_proj_w=dense((cfg.d_inner, cfg.d_model)),
        )

    layers = []
    for _ in range(cfg.e_layers):
        layers.append(dict(
            mamba_fwd=mamba_params(),
            mamba_bwd=mamba_params(),
            norm1_g=jnp.ones((cfg.d_model,), jnp.float32),
            norm1_b=jnp.zeros((cfg.d_model,), jnp.float32),
            norm2_g=jnp.ones((cfg.d_model,), jnp.float32),
            norm2_b=jnp.zeros((cfg.d_model,), jnp.float32),
            ff1_w=dense((cfg.d_model, cfg.d_ff)),
            ff1_b=jnp.zeros((cfg.d_ff,), jnp.float32),
            ff2_w=dense((cfg.d_ff, cfg.d_model)),
            ff2_b=jnp.zeros((cfg.d_model,), jnp.float32),
        ))

    smamba = dict(
        embed_w=dense((cfg.seq_len, cfg.d_model)),
        embed_b=jnp.zeros((cfg.d_model,), jnp.float32),
        layers=layers,
        norm_g=jnp.ones((cfg.d_model,), jnp.float32),
        norm_b=jnp.zeros((cfg.d_model,), jnp.float32),
        proj_w=dense((cfg.d_model, cfg.mamba_output_dim)),
        proj_b=jnp.zeros((cfg.mamba_output_dim,), jnp.float32),
    )

    in_head = cfg.mamba_output_dim + cfg.finbert_output_dim
    return dict(
        smamba=smamba,
        fc1_w=dense((in_head, DIM1)), fc1_b=jnp.zeros((DIM1,), jnp.float32),
        fc2_w=dense((DIM1, DIM2)), fc2_b=jnp.zeros((DIM2,), jnp.float32),
        fc3_w=dense((DIM2, DIM3)), fc3_b=jnp.zeros((DIM3,), jnp.float32),
        fc4_w=dense((DIM3, 1)), fc4_b=jnp.zeros((1,), jnp.float32),
    )


def prepare_params(raw, cfg):
    """One-time weight fusion / re-layout for the fused kernel (no semantic change)."""
    d_inner, dt_rank = cfg.d_inner, cfg.dt_rank

    def fold_dt(m):
        # dt_raw = (xc @ Wx)[:, :dt_rank] @ Wdt  ==  xc @ (Wx[:, :dt_rank] @ Wdt)
        return m["x_proj_w"][:, :dt_rank] @ m["dt_proj_w"]          # [d_inner, d_inner]

    def block_diag(a, b):
        ra, ca = a.shape
        rb, cb = b.shape
        top = jnp.concatenate([a, jnp.zeros((ra, cb), jnp.float32)], axis=1)
        bot = jnp.concatenate([jnp.zeros((rb, ca), jnp.float32), b], axis=1)
        return jnp.concatenate([top, bot], axis=0)

    per_layer = []
    for lp in raw["smamba"]["layers"]:
        f, b = lp["mamba_fwd"], lp["mamba_bwd"]
        per_layer.append(dict(
            # in_proj column layout [x_f | x_b | z_f | z_b]
            w_in=jnp.concatenate([f["in_proj_w"][:, :d_inner],
                                  b["in_proj_w"][:, :d_inner],
                                  f["in_proj_w"][:, d_inner:],
                                  b["in_proj_w"][:, d_inner:]], axis=1),
            conv_w=jnp.concatenate([f["conv_w"], b["conv_w"]], axis=1),
            conv_b=jnp.concatenate([f["conv_b"], b["conv_b"]])[None, :],
            w_dt=block_diag(fold_dt(f), fold_dt(b)),
            dt_bias=jnp.concatenate([f["dt_proj_b"], b["dt_proj_b"]])[None, :],
            w_bc=block_diag(f["x_proj_w"][:, dt_rank:], b["x_proj_w"][:, dt_rank:]),
            At=jnp.concatenate([(-jnp.exp(f["A_log"])).T,
                                (-jnp.exp(b["A_log"])).T], axis=1),
            D=jnp.concatenate([f["D"], b["D"]])[None, :],
            w_out=jnp.concatenate([f["out_proj_w"], b["out_proj_w"]], axis=0),
            n1g=lp["norm1_g"][None, :], n1b=lp["norm1_b"][None, :],
            ff1w=lp["ff1_w"], ff1b=lp["ff1_b"][None, :],
            ff2w=lp["ff2_w"], ff2b=lp["ff2_b"][None, :],
            n2g=lp["norm2_g"][None, :], n2b=lp["norm2_b"][None, :],
        ))

    def stack(key):
        return jnp.stack([d[key] for d in per_layer])

    def pad2(w, rows, cols):
        r, c = w.shape
        return jnp.pad(w, ((0, rows - r), (0, cols - c)))

    def pad1(v, n):
        return jnp.pad(v, (0, n - v.shape[0]))[None, :]

    rs = raw["smamba"]
    in_head = cfg.mamba_output_dim + cfg.finbert_output_dim
    return dict(
        embed_w=rs["embed_w"], embed_b=rs["embed_b"][None, :],
        L_w_in=stack("w_in"), L_conv_w=stack("conv_w"), L_conv_b=stack("conv_b"),
        L_w_dt=stack("w_dt"), L_dt_bias=stack("dt_bias"), L_w_bc=stack("w_bc"),
        L_At=stack("At"), L_D=stack("D"), L_w_out=stack("w_out"),
        L_n1g=stack("n1g"), L_n1b=stack("n1b"),
        L_ff1w=stack("ff1w"), L_ff1b=stack("ff1b"),
        L_ff2w=stack("ff2w"), L_ff2b=stack("ff2b"),
        L_n2g=stack("n2g"), L_n2b=stack("n2b"),
        norm_g=rs["norm_g"][None, :], norm_b=rs["norm_b"][None, :],
        proj_w=rs["proj_w"], proj_b=rs["proj_b"][None, :],
        # head MLP padded to lane-dense widths (padded lanes are zeros -> inert)
        fc1_w=pad2(raw["fc1_w"], in_head, DIM1_PAD), fc1_b=pad1(raw["fc1_b"], DIM1_PAD),
        fc2_w=pad2(raw["fc2_w"], DIM1_PAD, DIM2_PAD), fc2_b=pad1(raw["fc2_b"], DIM2_PAD),
        fc3_w=pad2(raw["fc3_w"], DIM2_PAD, DIM3_PAD), fc3_b=pad1(raw["fc3_b"], DIM3_PAD),
        fc4_w=pad2(raw["fc4_w"], DIM3_PAD, 1), fc4_b=raw["fc4_b"][None, :],
    )


# -------------------------------- main ---------------------------------------
if __name__ == "__main__":
    cfg = CFG
    key = jax.random.PRNGKey(0)
    pkey, xkey = jax.random.split(key)
    raw_params = init_params(pkey, cfg)
    params = prepare_params(raw_params, cfg)

    B = 2
    F_total = cfg.num_features + cfg.finbert_output_dim      # 4 + 8 = 12
    x_enc = jax.random.normal(xkey, (B, cfg.seq_len, F_total), dtype=jnp.float32)

    fwd = jax.jit(functools.partial(mamba_llm_forward, cfg=cfg))
    out = jax.block_until_ready(fwd(params, x_enc))
    assert out.shape == (B, 1), out.shape
    assert bool(jnp.all(jnp.isfinite(out)))
    print("KERNEL_OK")
</pallas_src>

<mosaic_0001>
module attributes {stable_mosaic.version = 11 : i64} {
  func.func @_fused_forward_kernel(%arg0: i32, %arg1: memref<1x4x16xf32, #tpu.memory_space<vmem>>, %arg2: memref<1x16x8xf32, #tpu.memory_space<vmem>>, %arg3: memref<16x32xf32, #tpu.memory_space<vmem>>, %arg4: memref<1x32xf32, #tpu.memory_space<vmem>>, %arg5: memref<2x32x256xf32, #tpu.memory_space<vmem>>, %arg6: memref<2x4x128xf32, #tpu.memory_space<vmem>>, %arg7: memref<2x1x128xf32, #tpu.memory_space<vmem>>, %arg8: memref<2x128x128xf32, #tpu.memory_space<vmem>>, %arg9: memref<2x1x128xf32, #tpu.memory_space<vmem>>, %arg10: memref<2x128x32xf32, #tpu.memory_space<vmem>>, %arg11: memref<2x8x128xf32, #tpu.memory_space<vmem>>, %arg12: memref<2x1x128xf32, #tpu.memory_space<vmem>>, %arg13: memref<2x128x32xf32, #tpu.memory_space<vmem>>, %arg14: memref<2x1x32xf32, #tpu.memory_space<vmem>>, %arg15: memref<2x1x32xf32, #tpu.memory_space<vmem>>, %arg16: memref<2x32x64xf32, #tpu.memory_space<vmem>>, %arg17: memref<2x1x64xf32, #tpu.memory_space<vmem>>, %arg18: memref<2x64x32xf32, #tpu.memory_space<vmem>>, %arg19: memref<2x1x32xf32, #tpu.memory_space<vmem>>, %arg20: memref<2x1x32xf32, #tpu.memory_space<vmem>>, %arg21: memref<2x1x32xf32, #tpu.memory_space<vmem>>, %arg22: memref<1x32xf32, #tpu.memory_space<vmem>>, %arg23: memref<1x32xf32, #tpu.memory_space<vmem>>, %arg24: memref<32x16xf32, #tpu.memory_space<vmem>>, %arg25: memref<1x16xf32, #tpu.memory_space<vmem>>, %arg26: memref<24x512xf32, #tpu.memory_space<vmem>>, %arg27: memref<1x512xf32, #tpu.memory_space<vmem>>, %arg28: memref<512x128xf32, #tpu.memory_space<vmem>>, %arg29: memref<1x128xf32, #tpu.memory_space<vmem>>, %arg30: memref<128x128xf32, #tpu.memory_space<vmem>>, %arg31: memref<1x128xf32, #tpu.memory_space<vmem>>, %arg32: memref<128x1xf32, #tpu.memory_space<vmem>>, %arg33: memref<1x1xf32, #tpu.memory_space<vmem>>, %arg34: memref<1x1x1xf32, #tpu.memory_space<vmem>>) attributes {dimension_semantics = [#tpu.dimension_semantics<parallel>], iteration_bounds = array<i64: 2>, scalar_prefetch = 0 : i64, scratch_operands = 0 : i64, tpu.core_type = #tpu.core_type<tc>, window_params = [{transform_indices = @transform_0, window_bounds = array<i64: 1, 4, 16>}, {transform_indices = @transform_1, window_bounds = array<i64: 1, 16, 8>}, {pipeline_mode = #tpu.pipeline_mode<synchronous>, transform_indices = @transform_2, window_bounds = array<i64: 16, 32>}, {pipeline_mode = #tpu.pipeline_mode<synchronous>, transform_indices = @transform_3, window_bounds = array<i64: 1, 32>}, {pipeline_mode = #tpu.pipeline_mode<synchronous>, transform_indices = @transform_4, window_bounds = array<i64: 2, 32, 256>}, {pipeline_mode = #tpu.pipeline_mode<synchronous>, transform_indices = @transform_5, window_bounds = array<i64: 2, 4, 128>}, {pipeline_mode = #tpu.pipeline_mode<synchronous>, transform_indices = @transform_6, window_bounds = array<i64: 2, 1, 128>}, {pipeline_mode = #tpu.pipeline_mode<synchronous>, transform_indices = @transform_7, window_bounds = array<i64: 2, 128, 128>}, {pipeline_mode = #tpu.pipeline_mode<synchronous>, transform_indices = @transform_8, window_bounds = array<i64: 2, 1, 128>}, {pipeline_mode = #tpu.pipeline_mode<synchronous>, transform_indices = @transform_9, window_bounds = array<i64: 2, 128, 32>}, {pipeline_mode = #tpu.pipeline_mode<synchronous>, transform_indices = @transform_10, window_bounds = array<i64: 2, 8, 128>}, {pipeline_mode = #tpu.pipeline_mode<synchronous>, transform_indices = @transform_11, window_bounds = array<i64: 2, 1, 128>}, {pipeline_mode = #tpu.pipeline_mode<synchronous>, transform_indices = @transform_12, window_bounds = array<i64: 2, 128, 32>}, {pipeline_mode = #tpu.pipeline_mode<synchronous>, transform_indices = @transform_13, window_bounds = array<i64: 2, 1, 32>}, {pipeline_mode = #tpu.pipeline_mode<synchronous>, transform_indices = @transform_14, window_bounds = array<i64: 2, 1, 32>}, {pipeline_mode = #tpu.pipeline_mode<synchronous>, transform_indices = @transform_15, window_bounds = array<i64: 2, 32, 64>}, {pipeline_mode = #tpu.pipeline_mode<synchronous>, transform_indices = @transform_16, window_bounds = array<i64: 2, 1, 64>}, {pipeline_mode = #tpu.pipeline_mode<synchronous>, transform_indices = @transform_17, window_bounds = array<i64: 2, 64, 32>}, {pipeline_mode = #tpu.pipeline_mode<synchronous>, transform_indices = @transform_18, window_bounds = array<i64: 2, 1, 32>}, {pipeline_mode = #tpu.pipeline_mode<synchronous>, transform_indices = @transform_19, window_bounds = array<i64: 2, 1, 32>}, {pipeline_mode = #tpu.pipeline_mode<synchronous>, transform_indices = @transform_20, window_bounds = array<i64: 2, 1, 32>}, {pipeline_mode = #tpu.pipeline_mode<synchronous>, transform_indices = @transform_21, window_bounds = array<i64: 1, 32>}, {pipeline_mode = #tpu.pipeline_mode<synchronous>, transform_indices = @transform_22, window_bounds = array<i64: 1, 32>}, {pipeline_mode = #tpu.pipeline_mode<synchronous>, transform_indices = @transform_23, window_bounds = array<i64: 32, 16>}, {pipeline_mode = #tpu.pipeline_mode<synchronous>, transform_indices = @transform_24, window_bounds = array<i64: 1, 16>}, {pipeline_mode = #tpu.pipeline_mode<synchronous>, transform_indices = @transform_25, window_bounds = array<i64: 24, 512>}, {pipeline_mode = #tpu.pipeline_mode<synchronous>, transform_indices = @transform_26, window_bounds = array<i64: 1, 512>}, {pipeline_mode = #tpu.pipeline_mode<synchronous>, transform_indices = @transform_27, window_bounds = array<i64: 512, 128>}, {pipeline_mode = #tpu.pipeline_mode<synchronous>, transform_indices = @transform_28, window_bounds = array<i64: 1, 128>}, {pipeline_mode = #tpu.pipeline_mode<synchronous>, transform_indices = @transform_29, window_bounds = array<i64: 128, 128>}, {pipeline_mode = #tpu.pipeline_mode<synchronous>, transform_indices = @transform_30, window_bounds = array<i64: 1, 128>}, {pipeline_mode = #tpu.pipeline_mode<synchronous>, transform_indices = @transform_31, window_bounds = array<i64: 128, 1>}, {pipeline_mode = #tpu.pipeline_mode<synchronous>, transform_indices = @transform_32, window_bounds = array<i64: 1, 1>}, {transform_indices = @transform_33, window_bounds = array<i64: 1, 1, 1>}]} {
    %c0 = arith.constant 0 : index
    %c0_0 = arith.constant 0 : index
    %c0_1 = arith.constant 0 : index
    %0 = vector.load %arg1[%c0, %c0_0, %c0_1] : memref<1x4x16xf32, #tpu.memory_space<vmem>>, vector<1x4x16xf32>
    %1 = vector.shape_cast %0 : vector<1x4x16xf32> to vector<4x16xf32>
    %cst = arith.constant dense<0.000000e+00> : vector<4xf32>
    %2 = vector.multi_reduction <add>, %1, %cst [1] : vector<4x16xf32> to vector<4xf32>
    %3 = vector.shape_cast %2 : vector<4xf32> to vector<4x1xf32>
    %cst_2 = arith.constant 1.600000e+01 : f32
    %4 = vector.broadcast %cst_2 : f32 to vector<4x1xf32>
    %5 = arith.divf %3, %4 : vector<4x1xf32>
    %6 = vector.broadcast %5 : vector<4x1xf32> to vector<4x16xf32>
    %7 = arith.subf %1, %6 : vector<4x16xf32>
    %8 = arith.mulf %7, %7 : vector<4x16xf32>
    %cst_3 = arith.constant dense<0.000000e+00> : vector<4xf32>
    %9 = vector.multi_reduction <add>, %8, %cst_3 [1] : vector<4x16xf32> to vector<4xf32>
    %10 = vector.shape_cast %9 : vector<4xf32> to vector<4x1xf32>
    %cst_4 = arith.constant 1.600000e+01 : f32
    %11 = vector.broadcast %cst_4 : f32 to vector<4x1xf32>
    %12 = arith.divf %10, %11 : vector<4x1xf32>
    %cst_5 = arith.constant 9.99999974E-6 : f32
    %13 = vector.broadcast %cst_5 : f32 to vector<4x1xf32>
    %14 = arith.addf %12, %13 : vector<4x1xf32>
    %15 = math.rsqrt %14 : vector<4x1xf32>
    %16 = vector.broadcast %15 : vector<4x1xf32> to vector<4x16xf32>
    %17 = arith.mulf %7, %16 : vector<4x16xf32>
    %c0_6 = arith.constant 0 : index
    %c0_7 = arith.constant 0 : index
    %18 = vector.load %arg3[%c0_6, %c0_7] : memref<16x32xf32, #tpu.memory_space<vmem>>, vector<16x32xf32>
    %cst_8 = arith.constant dense<0.000000e+00> : vector<4x32xf32>
    %19 = tpu.matmul %17, %18, %cst_8 {dimension_numbers = #tpu.dot_dimension_numbers<[1], [0], [0], [1], [0, 0, 1, 1], [], []>} : vector<4x16xf32>, vector<16x32xf32>, vector<4x32xf32> -> vector<4x32xf32>
    %c0_9 = arith.constant 0 : index
    %c0_10 = arith.constant 0 : index
    %20 = vector.load %arg4[%c0_9, %c0_10] : memref<1x32xf32, #tpu.memory_space<vmem>>, vector<1x32xf32>
    %21 = vector.broadcast %20 : vector<1x32xf32> to vector<4x32xf32>
    %22 = arith.addf %19, %21 : vector<4x32xf32>
    %c0_11 = arith.constant 0 : index
    %c0_12 = arith.constant 0 : index
    %c0_13 = arith.constant 0 : index
    %23 = vector.load %arg5[%c0_11, %c0_12, %c0_13] : memref<2x32x256xf32, #tpu.memory_space<vmem>>, vector<1x32x256xf32>
    %24 = vector.shape_cast %23 : vector<1x32x256xf32> to vector<32x256xf32>
    %cst_14 = arith.constant dense<0.000000e+00> : vector<4x256xf32>
    %25 = tpu.matmul %22, %24, %cst_14 {dimension_numbers = #tpu.dot_dimension_numbers<[1], [0], [0], [1], [0, 0, 1, 1], [], []>} : vector<4x32xf32>, vector<32x256xf32>, vector<4x256xf32> -> vector<4x256xf32>
    %26 = vector.extract_strided_slice %25 {offsets = [0, 0], sizes = [4, 128], strides = [1, 1]} : vector<4x256xf32> to vector<4x128xf32>
    %27 = vector.extract_strided_slice %25 {offsets = [0, 128], sizes = [4, 128], strides = [1, 1]} : vector<4x256xf32> to vector<4x128xf32>
    %28 = vector.extract_strided_slice %26 {offsets = [0, 0], sizes = [4, 64], strides = [1, 1]} : vector<4x128xf32> to vector<4x64xf32>
    %29 = vector.extract_strided_slice %26 {offsets = [0, 64], sizes = [4, 64], strides = [1, 1]} : vector<4x128xf32> to vector<4x64xf32>
    %30 = vector.extract_strided_slice %29 {offsets = [3, 0], sizes = [1, 64], strides = [1, 1]} : vector<4x64xf32> to vector<1x64xf32>
    %31 = vector.extract_strided_slice %29 {offsets = [2, 0], sizes = [1, 64], strides = [1, 1]} : vector<4x64xf32> to vector<1x64xf32>
    %32 = vector.extract_strided_slice %29 {offsets = [1, 0], sizes = [1, 64], strides = [1, 1]} : vector<4x64xf32> to vector<1x64xf32>
    %33 = vector.extract_strided_slice %29 {offsets = [0, 0], sizes = [1, 64], strides = [1, 1]} : vector<4x64xf32> to vector<1x64xf32>
    %34 = tpu.concatenate %30, %31, %32, %33 in 0 : vector<1x64xf32>, vector<1x64xf32>, vector<1x64xf32>, vector<1x64xf32> -> vector<4x64xf32>
    %35 = tpu.concatenate %28, %34 in 1 : vector<4x64xf32>, vector<4x64xf32> -> vector<4x128xf32>
    %c0_15 = arith.constant 0 : index
    %c0_16 = arith.constant 0 : index
    %c0_17 = arith.constant 0 : index
    %36 = vector.load %arg6[%c0_15, %c0_16, %c0_17] : memref<2x4x128xf32, #tpu.memory_space<vmem>>, vector<1x4x128xf32>
    %37 = vector.shape_cast %36 : vector<1x4x128xf32> to vector<4x128xf32>
    %cst_18 = arith.constant 0.000000e+00 : f32
    %38 = vector.broadcast %cst_18 : f32 to vector<3x128xf32>
    %39 = tpu.concatenate %38, %35 in 0 : vector<3x128xf32>, vector<4x128xf32> -> vector<7x128xf32>
    %cst_19 = arith.constant 0.000000e+00 : f32
    %40 = vector.broadcast %cst_19 : f32 to vector<4x128xf32>
    %41 = vector.extract_strided_slice %39 {offsets = [0, 0], sizes = [4, 128], strides = [1, 1]} : vector<7x128xf32> to vector<4x128xf32>
    %42 = vector.extract_strided_slice %37 {offsets = [0, 0], sizes = [1, 128], strides = [1, 1]} : vector<4x128xf32> to vector<1x128xf32>
    %43 = vector.broadcast %42 : vector<1x128xf32> to vector<4x128xf32>
    %44 = arith.mulf %41, %43 : vector<4x128xf32>
    %45 = arith.addf %40, %44 : vector<4x128xf32>
    %46 = vector.extract_strided_slice %39 {offsets = [1, 0], sizes = [4, 128], strides = [1, 1]} : vector<7x128xf32> to vector<4x128xf32>
    %47 = vector.extract_strided_slice %37 {offsets = [1, 0], sizes = [1, 128], strides = [1, 1]} : vector<4x128xf32> to vector<1x128xf32>
    %48 = vector.broadcast %47 : vector<1x128xf32> to vector<4x128xf32>
    %49 = arith.mulf %46, %48 : vector<4x128xf32>
    %50 = arith.addf %45, %49 : vector<4x128xf32>
    %51 = vector.extract_strided_slice %39 {offsets = [2, 0], sizes = [4, 128], strides = [1, 1]} : vector<7x128xf32> to vector<4x128xf32>
    %52 = vector.extract_strided_slice %37 {offsets = [2, 0], sizes = [1, 128], strides = [1, 1]} : vector<4x128xf32> to vector<1x128xf32>
    %53 = vector.broadcast %52 : vector<1x128xf32> to vector<4x128xf32>
    %54 = arith.mulf %51, %53 : vector<4x128xf32>
    %55 = arith.addf %50, %54 : vector<4x128xf32>
    %56 = vector.extract_strided_slice %39 {offsets = [3, 0], sizes = [4, 128], strides = [1, 1]} : vector<7x128xf32> to vector<4x128xf32>
    %57 = vector.extract_strided_slice %37 {offsets = [3, 0], sizes = [1, 128], strides = [1, 1]} : vector<4x128xf32> to vector<1x128xf32>
    %58 = vector.broadcast %57 : vector<1x128xf32> to vector<4x128xf32>
    %59 = arith.mulf %56, %58 : vector<4x128xf32>
    %60 = arith.addf %55, %59 : vector<4x128xf32>
    %c0_20 = arith.constant 0 : index
    %c0_21 = arith.constant 0 : index
    %c0_22 = arith.constant 0 : index
    %61 = vector.load %arg7[%c0_20, %c0_21, %c0_22] : memref<2x1x128xf32, #tpu.memory_space<vmem>>, vector<1x1x128xf32>
    %62 = vector.shape_cast %61 : vector<1x1x128xf32> to vector<1x128xf32>
    %63 = vector.broadcast %62 : vector<1x128xf32> to vector<4x128xf32>
    %64 = arith.addf %60, %63 : vector<4x128xf32>
    %cst_23 = arith.constant 0.000000e+00 : f32
    %65 = vector.broadcast %cst_23 : f32 to vector<4x128xf32>
    %66 = arith.subf %65, %64 : vector<4x128xf32>
    %67 = math.exp %66 : vector<4x128xf32>
    %cst_24 = arith.constant 1.000000e+00 : f32
    %68 = vector.broadcast %cst_24 : f32 to vector<4x128xf32>
    %69 = arith.addf %68, %67 : vector<4x128xf32>
    %70 = tpu.reciprocal %69 {approx = true} : vector<4x128xf32> -> vector<4x128xf32>
    %71 = arith.mulf %64, %70 : vector<4x128xf32>
    %c0_25 = arith.constant 0 : index
    %c0_26 = arith.constant 0 : index
    %c0_27 = arith.constant 0 : index
    %72 = vector.load %arg8[%c0_25, %c0_26, %c0_27] : memref<2x128x128xf32, #tpu.memory_space<vmem>>, vector<1x128x128xf32>
    %73 = vector.shape_cast %72 : vector<1x128x128xf32> to vector<128x128xf32>
    %cst_28 = arith.constant dense<0.000000e+00> : vector<4x128xf32>
    %74 = tpu.matmul %71, %73, %cst_28 {dimension_numbers = #tpu.dot_dimension_numbers<[1], [0], [0], [1], [0, 0, 1, 1], [], []>} : vector<4x128xf32>, vector<128x128xf32>, vector<4x128xf32> -> vector<4x128xf32>
    %c0_29 = arith.constant 0 : index
    %c0_30 = arith.constant 0 : index
    %c0_31 = arith.constant 0 : index
    %75 = vector.load %arg9[%c0_29, %c0_30, %c0_31] : memref<2x1x128xf32, #tpu.memory_space<vmem>>, vector<1x1x128xf32>
    %76 = vector.shape_cast %75 : vector<1x1x128xf32> to vector<1x128xf32>
    %77 = vector.broadcast %76 : vector<1x128xf32> to vector<4x128xf32>
    %78 = arith.addf %74, %77 : vector<4x128xf32>
    %cst_32 = arith.constant 0.000000e+00 : f32
    %79 = vector.broadcast %cst_32 : f32 to vector<4x128xf32>
    %80 = arith.maximumf %78, %79 : vector<4x128xf32>
    %81 = math.absf %78 : vector<4x128xf32>
    %cst_33 = arith.constant 0.000000e+00 : f32
    %82 = vector.broadcast %cst_33 : f32 to vector<4x128xf32>
    %83 = arith.subf %82, %81 : vector<4x128xf32>
    %84 = math.exp %83 : vector<4x128xf32>
    %cst_34 = arith.constant 1.000000e+00 : f32
    %85 = vector.broadcast %cst_34 : f32 to vector<4x128xf32>
    %86 = arith.addf %85, %84 : vector<4x128xf32>
    %87 = math.log %86 : vector<4x128xf32>
    %88 = arith.addf %80, %87 : vector<4x128xf32>
    %c0_35 = arith.constant 0 : index
    %c0_36 = arith.constant 0 : index
    %c0_37 = arith.constant 0 : index
    %89 = vector.load %arg10[%c0_35, %c0_36, %c0_37] : memref<2x128x32xf32, #tpu.memory_space<vmem>>, vector<1x128x32xf32>
    %90 = vector.shape_cast %89 : vector<1x128x32xf32> to vector<128x32xf32>
    %cst_38 = arith.constant dense<0.000000e+00> : vector<4x32xf32>
    %91 = tpu.matmul %71, %90, %cst_38 {dimension_numbers = #tpu.dot_dimension_numbers<[1], [0], [0], [1], [0, 0, 1, 1], [], []>} : vector<4x128xf32>, vector<128x32xf32>, vector<4x32xf32> -> vector<4x32xf32>
    %92 = vector.extract_strided_slice %91 {offsets = [0, 0], sizes = [4, 8], strides = [1, 1]} : vector<4x32xf32> to vector<4x8xf32>
    %93 = vector.extract_strided_slice %91 {offsets = [0, 8], sizes = [4, 8], strides = [1, 1]} : vector<4x32xf32> to vector<4x8xf32>
    %94 = vector.extract_strided_slice %91 {offsets = [0, 16], sizes = [4, 8], strides = [1, 1]} : vector<4x32xf32> to vector<4x8xf32>
    %95 = vector.extract_strided_slice %91 {offsets = [0, 24], sizes = [4, 8], strides = [1, 1]} : vector<4x32xf32> to vector<4x8xf32>
    %c0_39 = arith.constant 0 : index
    %c0_40 = arith.constant 0 : index
    %c0_41 = arith.constant 0 : index
    %96 = vector.load %arg11[%c0_39, %c0_40, %c0_41] : memref<2x8x128xf32, #tpu.memory_space<vmem>>, vector<1x8x128xf32>
    %97 = vector.shape_cast %96 : vector<1x8x128xf32> to vector<8x128xf32>
    %98 = vector.shape_cast %88 : vector<4x128xf32> to vector<4x1x128xf32>
    %99 = vector.shape_cast %97 : vector<8x128xf32> to vector<1x8x128xf32>
    %100 = vector.broadcast %98 : vector<4x1x128xf32> to vector<4x8x128xf32>
    %101 = vector.broadcast %99 : vector<1x8x128xf32> to vector<4x8x128xf32>
    %102 = arith.mulf %100, %101 : vector<4x8x128xf32>
    %103 = math.exp %102 : vector<4x8x128xf32>
    %104 = arith.mulf %88, %71 : vector<4x128xf32>
    %105 = vector.shape_cast %92 : vector<4x8xf32> to vector<4x8x1xf32>
    %106 = vector.shape_cast %105 : vector<4x8x1xf32> to vector<4x8x1xf32>
    %107 = vector.broadcast %106 : vector<4x8x1xf32> to vector<4x8x64xf32>
    %108 = vector.shape_cast %94 : vector<4x8xf32> to vector<4x8x1xf32>
    %109 = vector.shape_cast %108 : vector<4x8x1xf32> to vector<4x8x1xf32>
    %110 = vector.broadcast %109 : vector<4x8x1xf32> to vector<4x8x64xf32>
    %111 = tpu.concatenate %107, %110 in 2 : vector<4x8x64xf32>, vector<4x8x64xf32> -> vector<4x8x128xf32>
    %112 = vector.shape_cast %93 : vector<4x8xf32> to vector<4x8x1xf32>
    %113 = vector.shape_cast %112 : vector<4x8x1xf32> to vector<4x8x1xf32>
    %114 = vector.broadcast %113 : vector<4x8x1xf32> to vector<4x8x64xf32>
    %115 = vector.shape_cast %95 : vector<4x8xf32> to vector<4x8x1xf32>
    %116 = vector.shape_cast %115 : vector<4x8x1xf32> to vector<4x8x1xf32>
    %117 = vector.broadcast %116 : vector<4x8x1xf32> to vector<4x8x64xf32>
    %118 = tpu.concatenate %114, %117 in 2 : vector<4x8x64xf32>, vector<4x8x64xf32> -> vector<4x8x128xf32>
    %119 = vector.shape_cast %104 : vector<4x128xf32> to vector<4x1x128xf32>
    %120 = vector.broadcast %119 : vector<4x1x128xf32> to vector<4x8x128xf32>
    %121 = arith.mulf %111, %120 : vector<4x8x128xf32>
    %cst_42 = arith.constant 0.000000e+00 : f32
    %122 = vector.broadcast %cst_42 : f32 to vector<8x128xf32>
    %123 = vector.extract_strided_slice %103 {offsets = [0, 0, 0], sizes = [1, 8, 128], strides = [1, 1, 1]} : vector<4x8x128xf32> to vector<1x8x128xf32>
    %124 = vector.shape_cast %123 : vector<1x8x128xf32> to vector<8x128xf32>
    %125 = arith.mulf %124, %122 : vector<8x128xf32>
    %126 = vector.extract_strided_slice %121 {offsets = [0, 0, 0], sizes = [1, 8, 128], strides = [1, 1, 1]} : vector<4x8x128xf32> to vector<1x8x128xf32>
    %127 = vector.shape_cast %126 : vector<1x8x128xf32> to vector<8x128xf32>
    %128 = arith.addf %125, %127 : vector<8x128xf32>
    %129 = vector.extract_strided_slice %118 {offsets = [0, 0, 0], sizes = [1, 8, 128], strides = [1, 1, 1]} : vector<4x8x128xf32> to vector<1x8x128xf32>
    %130 = vector.shape_cast %129 : vector<1x8x128xf32> to vector<8x128xf32>
    %131 = arith.mulf %128, %130 : vector<8x128xf32>
    %cst_43 = arith.constant dense<0.000000e+00> : vector<128xf32>
    %132 = vector.multi_reduction <add>, %131, %cst_43 [0] : vector<8x128xf32> to vector<128xf32>
    %133 = vector.shape_cast %132 : vector<128xf32> to vector<1x128xf32>
    %134 = vector.extract_strided_slice %103 {offsets = [1, 0, 0], sizes = [1, 8, 128], strides = [1, 1, 1]} : vector<4x8x128xf32> to vector<1x8x128xf32>
    %135 = vector.shape_cast %134 : vector<1x8x128xf32> to vector<8x128xf32>
    %136 = arith.mulf %135, %128 : vector<8x128xf32>
    %137 = vector.extract_strided_slice %121 {offsets = [1, 0, 0], sizes = [1, 8, 128], strides = [1, 1, 1]} : vector<4x8x128xf32> to vector<1x8x128xf32>
    %138 = vector.shape_cast %137 : vector<1x8x128xf32> to vector<8x128xf32>
    %139 = arith.addf %136, %138 : vector<8x128xf32>
    %140 = vector.extract_strided_slice %118 {offsets = [1, 0, 0], sizes = [1, 8, 128], strides = [1, 1, 1]} : vector<4x8x128xf32> to vector<1x8x128xf32>
    %141 = vector.shape_cast %140 : vector<1x8x128xf32> to vector<8x128xf32>
    %142 = arith.mulf %139, %141 : vector<8x128xf32>
    %cst_44 = arith.constant dense<0.000000e+00> : vector<128xf32>
    %143 = vector.multi_reduction <add>, %142, %cst_44 [0] : vector<8x128xf32> to vector<128xf32>
    %144 = vector.shape_cast %143 : vector<128xf32> to vector<1x128xf32>
    %145 = vector.extract_strided_slice %103 {offsets = [2, 0, 0], sizes = [1, 8, 128], strides = [1, 1, 1]} : vector<4x8x128xf32> to vector<1x8x128xf32>
    %146 = vector.shape_cast %145 : vector<1x8x128xf32> to vector<8x128xf32>
    %147 = arith.mulf %146, %139 : vector<8x128xf32>
    %148 = vector.extract_strided_slice %121 {offsets = [2, 0, 0], sizes = [1, 8, 128], strides = [1, 1, 1]} : vector<4x8x128xf32> to vector<1x8x128xf32>
    %149 = vector.shape_cast %148 : vector<1x8x128xf32> to vector<8x128xf32>
    %150 = arith.addf %147, %149 : vector<8x128xf32>
    %151 = vector.extract_strided_slice %118 {offsets = [2, 0, 0], sizes = [1, 8, 128], strides = [1, 1, 1]} : vector<4x8x128xf32> to vector<1x8x128xf32>
    %152 = vector.shape_cast %151 : vector<1x8x128xf32> to vector<8x128xf32>
    %153 = arith.mulf %150, %152 : vector<8x128xf32>
    %cst_45 = arith.constant dense<0.000000e+00> : vector<128xf32>
    %154 = vector.multi_reduction <add>, %153, %cst_45 [0] : vector<8x128xf32> to vector<128xf32>
    %155 = vector.shape_cast %154 : vector<128xf32> to vector<1x128xf32>
    %156 = vector.extract_strided_slice %103 {offsets = [3, 0, 0], sizes = [1, 8, 128], strides = [1, 1, 1]} : vector<4x8x128xf32> to vector<1x8x128xf32>
    %157 = vector.shape_cast %156 : vector<1x8x128xf32> to vector<8x128xf32>
    %158 = arith.mulf %157, %150 : vector<8x128xf32>
    %159 = vector.extract_strided_slice %121 {offsets = [3, 0, 0], sizes = [1, 8, 128], strides = [1, 1, 1]} : vector<4x8x128xf32> to vector<1x8x128xf32>
    %160 = vector.shape_cast %159 : vector<1x8x128xf32> to vector<8x128xf32>
    %161 = arith.addf %158, %160 : vector<8x128xf32>
    %162 = vector.extract_strided_slice %118 {offsets = [3, 0, 0], sizes = [1, 8, 128], strides = [1, 1, 1]} : vector<4x8x128xf32> to vector<1x8x128xf32>
    %163 = vector.shape_cast %162 : vector<1x8x128xf32> to vector<8x128xf32>
    %164 = arith.mulf %161, %163 : vector<8x128xf32>
    %cst_46 = arith.constant dense<0.000000e+00> : vector<128xf32>
    %165 = vector.multi_reduction <add>, %164, %cst_46 [0] : vector<8x128xf32> to vector<128xf32>
    %166 = vector.shape_cast %165 : vector<128xf32> to vector<1x128xf32>
    %167 = tpu.concatenate %133, %144, %155, %166 in 0 : vector<1x128xf32>, vector<1x128xf32>, vector<1x128xf32>, vector<1x128xf32> -> vector<4x128xf32>
    %c0_47 = arith.constant 0 : index
    %c0_48 = arith.constant 0 : index
    %c0_49 = arith.constant 0 : index
    %168 = vector.load %arg12[%c0_47, %c0_48, %c0_49] : memref<2x1x128xf32, #tpu.memory_space<vmem>>, vector<1x1x128xf32>
    %169 = vector.shape_cast %168 : vector<1x1x128xf32> to vector<1x128xf32>
    %170 = vector.broadcast %169 : vector<1x128xf32> to vector<4x128xf32>
    %171 = arith.mulf %170, %71 : vector<4x128xf32>
    %172 = arith.addf %167, %171 : vector<4x128xf32>
    %173 = vector.extract_strided_slice %172 {offsets = [0, 0], sizes = [4, 64], strides = [1, 1]} : vector<4x128xf32> to vector<4x64xf32>
    %174 = vector.extract_strided_slice %172 {offsets = [0, 64], sizes = [4, 64], strides = [1, 1]} : vector<4x128xf32> to vector<4x64xf32>
    %175 = vector.extract_strided_slice %174 {offsets = [3, 0], sizes = [1, 64], strides = [1, 1]} : vector<4x64xf32> to vector<1x64xf32>
    %176 = vector.extract_strided_slice %174 {offsets = [2, 0], sizes = [1, 64], strides = [1, 1]} : vector<4x64xf32> to vector<1x64xf32>
    %177 = vector.extract_strided_slice %174 {offsets = [1, 0], sizes = [1, 64], strides = [1, 1]} : vector<4x64xf32> to vector<1x64xf32>
    %178 = vector.extract_strided_slice %174 {offsets = [0, 0], sizes = [1, 64], strides = [1, 1]} : vector<4x64xf32> to vector<1x64xf32>
    %179 = tpu.concatenate %175, %176, %177, %178 in 0 : vector<1x64xf32>, vector<1x64xf32>, vector<1x64xf32>, vector<1x64xf32> -> vector<4x64xf32>
    %180 = tpu.concatenate %173, %179 in 1 : vector<4x64xf32>, vector<4x64xf32> -> vector<4x128xf32>
    %cst_50 = arith.constant 0.000000e+00 : f32
    %181 = vector.broadcast %cst_50 : f32 to vector<4x128xf32>
    %182 = arith.subf %181, %27 : vector<4x128xf32>
    %183 = math.exp %182 : vector<4x128xf32>
    %cst_51 = arith.constant 1.000000e+00 : f32
    %184 = vector.broadcast %cst_51 : f32 to vector<4x128xf32>
    %185 = arith.addf %184, %183 : vector<4x128xf32>
    %186 = tpu.reciprocal %185 {approx = true} : vector<4x128xf32> -> vector<4x128xf32>
    %187 = arith.mulf %27, %186 : vector<4x128xf32>
    %188 = arith.mulf %180, %187 : vector<4x128xf32>
    %c0_52 = arith.constant 0 : index
    %c0_53 = arith.constant 0 : index
    %c0_54 = arith.constant 0 : index
    %189 = vector.load %arg13[%c0_52, %c0_53, %c0_54] : memref<2x128x32xf32, #tpu.memory_space<vmem>>, vector<1x128x32xf32>
    %190 = vector.shape_cast %189 : vector<1x128x32xf32> to vector<128x32xf32>
    %cst_55 = arith.constant dense<0.000000e+00> : vector<4x32xf32>
    %191 = tpu.matmul %188, %190, %cst_55 {dimension_numbers = #tpu.dot_dimension_numbers<[1], [0], [0], [1], [0, 0, 1, 1], [], []>} : vector<4x128xf32>, vector<128x32xf32>, vector<4x32xf32> -> vector<4x32xf32>
    %192 = arith.addf %22, %191 : vector<4x32xf32>
    %c0_56 = arith.constant 0 : index
    %c0_57 = arith.constant 0 : index
    %c0_58 = arith.constant 0 : index
    %193 = vector.load %arg14[%c0_56, %c0_57, %c0_58] : memref<2x1x32xf32, #tpu.memory_space<vmem>>, vector<1x1x32xf32>
    %194 = vector.shape_cast %193 : vector<1x1x32xf32> to vector<1x32xf32>
    %c0_59 = arith.constant 0 : index
    %c0_60 = arith.constant 0 : index
    %c0_61 = arith.constant 0 : index
    %195 = vector.load %arg15[%c0_59, %c0_60, %c0_61] : memref<2x1x32xf32, #tpu.memory_space<vmem>>, vector<1x1x32xf32>
    %196 = vector.shape_cast %195 : vector<1x1x32xf32> to vector<1x32xf32>
    %cst_62 = arith.constant dense<0.000000e+00> : vector<4xf32>
    %197 = vector.multi_reduction <add>, %192, %cst_62 [1] : vector<4x32xf32> to vector<4xf32>
    %198 = vector.shape_cast %197 : vector<4xf32> to vector<4x1xf32>
    %cst_63 = arith.constant 3.200000e+01 : f32
    %199 = vector.broadcast %cst_63 : f32 to vector<4x1xf32>
    %200 = arith.divf %198, %199 : vector<4x1xf32>
    %201 = vector.broadcast %200 : vector<4x1xf32> to vector<4x32xf32>
    %202 = arith.subf %192, %201 : vector<4x32xf32>
    %203 = arith.mulf %202, %202 : vector<4x32xf32>
    %cst_64 = arith.constant dense<0.000000e+00> : vector<4xf32>
    %204 = vector.multi_reduction <add>, %203, %cst_64 [1] : vector<4x32xf32> to vector<4xf32>
    %205 = vector.shape_cast %204 : vector<4xf32> to vector<4x1xf32>
    %cst_65 = arith.constant 3.200000e+01 : f32
    %206 = vector.broadcast %cst_65 : f32 to vector<4x1xf32>
    %207 = arith.divf %205, %206 : vector<4x1xf32>
    %cst_66 = arith.constant 9.99999974E-6 : f32
    %208 = vector.broadcast %cst_66 : f32 to vector<4x1xf32>
    %209 = arith.addf %207, %208 : vector<4x1xf32>
    %210 = math.rsqrt %209 : vector<4x1xf32>
    %211 = vector.broadcast %210 : vector<4x1xf32> to vector<4x32xf32>
    %212 = arith.mulf %202, %211 : vector<4x32xf32>
    %213 = vector.broadcast %194 : vector<1x32xf32> to vector<4x32xf32>
    %214 = arith.mulf %212, %213 : vector<4x32xf32>
    %215 = vector.broadcast %196 : vector<1x32xf32> to vector<4x32xf32>
    %216 = arith.addf %214, %215 : vector<4x32xf32>
    %c0_67 = arith.constant 0 : index
    %c0_68 = arith.constant 0 : index
    %c0_69 = arith.constant 0 : index
    %217 = vector.load %arg16[%c0_67, %c0_68, %c0_69] : memref<2x32x64xf32, #tpu.memory_space<vmem>>, vector<1x32x64xf32>
    %218 = vector.shape_cast %217 : vector<1x32x64xf32> to vector<32x64xf32>
    %cst_70 = arith.constant dense<0.000000e+00> : vector<4x64xf32>
    %219 = tpu.matmul %216, %218, %cst_70 {dimension_numbers = #tpu.dot_dimension_numbers<[1], [0], [0], [1], [0, 0, 1, 1], [], []>} : vector<4x32xf32>, vector<32x64xf32>, vector<4x64xf32> -> vector<4x64xf32>
    %c0_71 = arith.constant 0 : index
    %c0_72 = arith.constant 0 : index
    %c0_73 = arith.constant 0 : index
    %220 = vector.load %arg17[%c0_71, %c0_72, %c0_73] : memref<2x1x64xf32, #tpu.memory_space<vmem>>, vector<1x1x64xf32>
    %221 = vector.shape_cast %220 : vector<1x1x64xf32> to vector<1x64xf32>
    %222 = vector.broadcast %221 : vector<1x64xf32> to vector<4x64xf32>
    %223 = arith.addf %219, %222 : vector<4x64xf32>
    %cst_74 = arith.constant 0.000000e+00 : f32
    %224 = vector.broadcast %cst_74 : f32 to vector<4x64xf32>
    %225 = arith.maximumf %223, %224 : vector<4x64xf32>
    %c0_75 = arith.constant 0 : index
    %c0_76 = arith.constant 0 : index
    %c0_77 = arith.constant 0 : index
    %226 = vector.load %arg18[%c0_75, %c0_76, %c0_77] : memref<2x64x32xf32, #tpu.memory_space<vmem>>, vector<1x64x32xf32>
    %227 = vector.shape_cast %226 : vector<1x64x32xf32> to vector<64x32xf32>
    %cst_78 = arith.constant dense<0.000000e+00> : vector<4x32xf32>
    %228 = tpu.matmul %225, %227, %cst_78 {dimension_numbers = #tpu.dot_dimension_numbers<[1], [0], [0], [1], [0, 0, 1, 1], [], []>} : vector<4x64xf32>, vector<64x32xf32>, vector<4x32xf32> -> vector<4x32xf32>
    %c0_79 = arith.constant 0 : index
    %c0_80 = arith.constant 0 : index
    %c0_81 = arith.constant 0 : index
    %229 = vector.load %arg19[%c0_79, %c0_80, %c0_81] : memref<2x1x32xf32, #tpu.memory_space<vmem>>, vector<1x1x32xf32>
    %230 = vector.shape_cast %229 : vector<1x1x32xf32> to vector<1x32xf32>
    %231 = vector.broadcast %230 : vector<1x32xf32> to vector<4x32xf32>
    %232 = arith.addf %228, %231 : vector<4x32xf32>
    %233 = arith.addf %216, %232 : vector<4x32xf32>
    %c0_82 = arith.constant 0 : index
    %c0_83 = arith.constant 0 : index
    %c0_84 = arith.constant 0 : index
    %234 = vector.load %arg20[%c0_82, %c0_83, %c0_84] : memref<2x1x32xf32, #tpu.memory_space<vmem>>, vector<1x1x32xf32>
    %235 = vector.shape_cast %234 : vector<1x1x32xf32> to vector<1x32xf32>
    %c0_85 = arith.constant 0 : index
    %c0_86 = arith.constant 0 : index
    %c0_87 = arith.constant 0 : index
    %236 = vector.load %arg21[%c0_85, %c0_86, %c0_87] : memref<2x1x32xf32, #tpu.memory_space<vmem>>, vector<1x1x32xf32>
    %237 = vector.shape_cast %236 : vector<1x1x32xf32> to vector<1x32xf32>
    %cst_88 = arith.constant dense<0.000000e+00> : vector<4xf32>
    %238 = vector.multi_reduction <add>, %233, %cst_88 [1] : vector<4x32xf32> to vector<4xf32>
    %239 = vector.shape_cast %238 : vector<4xf32> to vector<4x1xf32>
    %cst_89 = arith.constant 3.200000e+01 : f32
    %240 = vector.broadcast %cst_89 : f32 to vector<4x1xf32>
    %241 = arith.divf %239, %240 : vector<4x1xf32>
    %242 = vector.broadcast %241 : vector<4x1xf32> to vector<4x32xf32>
    %243 = arith.subf %233, %242 : vector<4x32xf32>
    %244 = arith.mulf %243, %243 : vector<4x32xf32>
    %cst_90 = arith.constant dense<0.000000e+00> : vector<4xf32>
    %245 = vector.multi_reduction <add>, %244, %cst_90 [1] : vector<4x32xf32> to vector<4xf32>
    %246 = vector.shape_cast %245 : vector<4xf32> to vector<4x1xf32>
    %cst_91 = arith.constant 3.200000e+01 : f32
    %247 = vector.broadcast %cst_91 : f32 to vector<4x1xf32>
    %248 = arith.divf %246, %247 : vector<4x1xf32>
    %cst_92 = arith.constant 9.99999974E-6 : f32
    %249 = vector.broadcast %cst_92 : f32 to vector<4x1xf32>
    %250 = arith.addf %248, %249 : vector<4x1xf32>
    %251 = math.rsqrt %250 : vector<4x1xf32>
    %252 = vector.broadcast %251 : vector<4x1xf32> to vector<4x32xf32>
    %253 = arith.mulf %243, %252 : vector<4x32xf32>
    %254 = vector.broadcast %235 : vector<1x32xf32> to vector<4x32xf32>
    %255 = arith.mulf %253, %254 : vector<4x32xf32>
    %256 = vector.broadcast %237 : vector<1x32xf32> to vector<4x32xf32>
    %257 = arith.addf %255, %256 : vector<4x32xf32>
    %c1 = arith.constant 1 : index
    %c0_93 = arith.constant 0 : index
    %c0_94 = arith.constant 0 : index
    %258 = vector.load %arg5[%c1, %c0_93, %c0_94] : memref<2x32x256xf32, #tpu.memory_space<vmem>>, vector<1x32x256xf32>
    %259 = vector.shape_cast %258 : vector<1x32x256xf32> to vector<32x256xf32>
    %cst_95 = arith.constant dense<0.000000e+00> : vector<4x256xf32>
    %260 = tpu.matmul %257, %259, %cst_95 {dimension_numbers = #tpu.dot_dimension_numbers<[1], [0], [0], [1], [0, 0, 1, 1], [], []>} : vector<4x32xf32>, vector<32x256xf32>, vector<4x256xf32> -> vector<4x256xf32>
    %261 = vector.extract_strided_slice %260 {offsets = [0, 0], sizes = [4, 128], strides = [1, 1]} : vector<4x256xf32> to vector<4x128xf32>
    %262 = vector.extract_strided_slice %260 {offsets = [0, 128], sizes = [4, 128], strides = [1, 1]} : vector<4x256xf32> to vector<4x128xf32>
    %263 = vector.extract_strided_slice %261 {offsets = [0, 0], sizes = [4, 64], strides = [1, 1]} : vector<4x128xf32> to vector<4x64xf32>
    %264 = vector.extract_strided_slice %261 {offsets = [0, 64], sizes = [4, 64], strides = [1, 1]} : vector<4x128xf32> to vector<4x64xf32>
    %265 = vector.extract_strided_slice %264 {offsets = [3, 0], sizes = [1, 64], strides = [1, 1]} : vector<4x64xf32> to vector<1x64xf32>
    %266 = vector.extract_strided_slice %264 {offsets = [2, 0], sizes = [1, 64], strides = [1, 1]} : vector<4x64xf32> to vector<1x64xf32>
    %267 = vector.extract_strided_slice %264 {offsets = [1, 0], sizes = [1, 64], strides = [1, 1]} : vector<4x64xf32> to vector<1x64xf32>
    %268 = vector.extract_strided_slice %264 {offsets = [0, 0], sizes = [1, 64], strides = [1, 1]} : vector<4x64xf32> to vector<1x64xf32>
    %269 = tpu.concatenate %265, %266, %267, %268 in 0 : vector<1x64xf32>, vector<1x64xf32>, vector<1x64xf32>, vector<1x64xf32> -> vector<4x64xf32>
    %270 = tpu.concatenate %263, %269 in 1 : vector<4x64xf32>, vector<4x64xf32> -> vector<4x128xf32>
    %c1_96 = arith.constant 1 : index
    %c0_97 = arith.constant 0 : index
    %c0_98 = arith.constant 0 : index
    %271 = vector.load %arg6[%c1_96, %c0_97, %c0_98] : memref<2x4x128xf32, #tpu.memory_space<vmem>>, vector<1x4x128xf32>
    %272 = vector.shape_cast %271 : vector<1x4x128xf32> to vector<4x128xf32>
    %cst_99 = arith.constant 0.000000e+00 : f32
    %273 = vector.broadcast %cst_99 : f32 to vector<3x128xf32>
    %274 = tpu.concatenate %273, %270 in 0 : vector<3x128xf32>, vector<4x128xf32> -> vector<7x128xf32>
    %cst_100 = arith.constant 0.000000e+00 : f32
    %275 = vector.broadcast %cst_100 : f32 to vector<4x128xf32>
    %276 = vector.extract_strided_slice %274 {offsets = [0, 0], sizes = [4, 128], strides = [1, 1]} : vector<7x128xf32> to vector<4x128xf32>
    %277 = vector.extract_strided_slice %272 {offsets = [0, 0], sizes = [1, 128], strides = [1, 1]} : vector<4x128xf32> to vector<1x128xf32>
    %278 = vector.broadcast %277 : vector<1x128xf32> to vector<4x128xf32>
    %279 = arith.mulf %276, %278 : vector<4x128xf32>
    %280 = arith.addf %275, %279 : vector<4x128xf32>
    %281 = vector.extract_strided_slice %274 {offsets = [1, 0], sizes = [4, 128], strides = [1, 1]} : vector<7x128xf32> to vector<4x128xf32>
    %282 = vector.extract_strided_slice %272 {offsets = [1, 0], sizes = [1, 128], strides = [1, 1]} : vector<4x128xf32> to vector<1x128xf32>
    %283 = vector.broadcast %282 : vector<1x128xf32> to vector<4x128xf32>
    %284 = arith.mulf %281, %283 : vector<4x128xf32>
    %285 = arith.addf %280, %284 : vector<4x128xf32>
    %286 = vector.extract_strided_slice %274 {offsets = [2, 0], sizes = [4, 128], strides = [1, 1]} : vector<7x128xf32> to vector<4x128xf32>
    %287 = vector.extract_strided_slice %272 {offsets = [2, 0], sizes = [1, 128], strides = [1, 1]} : vector<4x128xf32> to vector<1x128xf32>
    %288 = vector.broadcast %287 : vector<1x128xf32> to vector<4x128xf32>
    %289 = arith.mulf %286, %288 : vector<4x128xf32>
    %290 = arith.addf %285, %289 : vector<4x128xf32>
    %291 = vector.extract_strided_slice %274 {offsets = [3, 0], sizes = [4, 128], strides = [1, 1]} : vector<7x128xf32> to vector<4x128xf32>
    %292 = vector.extract_strided_slice %272 {offsets = [3, 0], sizes = [1, 128], strides = [1, 1]} : vector<4x128xf32> to vector<1x128xf32>
    %293 = vector.broadcast %292 : vector<1x128xf32> to vector<4x128xf32>
    %294 = arith.mulf %291, %293 : vector<4x128xf32>
    %295 = arith.addf %290, %294 : vector<4x128xf32>
    %c1_101 = arith.constant 1 : index
    %c0_102 = arith.constant 0 : index
    %c0_103 = arith.constant 0 : index
    %296 = vector.load %arg7[%c1_101, %c0_102, %c0_103] : memref<2x1x128xf32, #tpu.memory_space<vmem>>, vector<1x1x128xf32>
    %297 = vector.shape_cast %296 : vector<1x1x128xf32> to vector<1x128xf32>
    %298 = vector.broadcast %297 : vector<1x128xf32> to vector<4x128xf32>
    %299 = arith.addf %295, %298 : vector<4x128xf32>
    %cst_104 = arith.constant 0.000000e+00 : f32
    %300 = vector.broadcast %cst_104 : f32 to vector<4x128xf32>
    %301 = arith.subf %300, %299 : vector<4x128xf32>
    %302 = math.exp %301 : vector<4x128xf32>
    %cst_105 = arith.constant 1.000000e+00 : f32
    %303 = vector.broadcast %cst_105 : f32 to vector<4x128xf32>
    %304 = arith.addf %303, %302 : vector<4x128xf32>
    %305 = tpu.reciprocal %304 {approx = true} : vector<4x128xf32> -> vector<4x128xf32>
    %306 = arith.mulf %299, %305 : vector<4x128xf32>
    %c1_106 = arith.constant 1 : index
    %c0_107 = arith.constant 0 : index
    %c0_108 = arith.constant 0 : index
    %307 = vector.load %arg8[%c1_106, %c0_107, %c0_108] : memref<2x128x128xf32, #tpu.memory_space<vmem>>, vector<1x128x128xf32>
    %308 = vector.shape_cast %307 : vector<1x128x128xf32> to vector<128x128xf32>
    %cst_109 = arith.constant dense<0.000000e+00> : vector<4x128xf32>
    %309 = tpu.matmul %306, %308, %cst_109 {dimension_numbers = #tpu.dot_dimension_numbers<[1], [0], [0], [1], [0, 0, 1, 1], [], []>} : vector<4x128xf32>, vector<128x128xf32>, vector<4x128xf32> -> vector<4x128xf32>
    %c1_110 = arith.constant 1 : index
    %c0_111 = arith.constant 0 : index
    %c0_112 = arith.constant 0 : index
    %310 = vector.load %arg9[%c1_110, %c0_111, %c0_112] : memref<2x1x128xf32, #tpu.memory_space<vmem>>, vector<1x1x128xf32>
    %311 = vector.shape_cast %310 : vector<1x1x128xf32> to vector<1x128xf32>
    %312 = vector.broadcast %311 : vector<1x128xf32> to vector<4x128xf32>
    %313 = arith.addf %309, %312 : vector<4x128xf32>
    %cst_113 = arith.constant 0.000000e+00 : f32
    %314 = vector.broadcast %cst_113 : f32 to vector<4x128xf32>
    %315 = arith.maximumf %313, %314 : vector<4x128xf32>
    %316 = math.absf %313 : vector<4x128xf32>
    %cst_114 = arith.constant 0.000000e+00 : f32
    %317 = vector.broadcast %cst_114 : f32 to vector<4x128xf32>
    %318 = arith.subf %317, %316 : vector<4x128xf32>
    %319 = math.exp %318 : vector<4x128xf32>
    %cst_115 = arith.constant 1.000000e+00 : f32
    %320 = vector.broadcast %cst_115 : f32 to vector<4x128xf32>
    %321 = arith.addf %320, %319 : vector<4x128xf32>
    %322 = math.log %321 : vector<4x128xf32>
    %323 = arith.addf %315, %322 : vector<4x128xf32>
    %c1_116 = arith.constant 1 : index
    %c0_117 = arith.constant 0 : index
    %c0_118 = arith.constant 0 : index
    %324 = vector.load %arg10[%c1_116, %c0_117, %c0_118] : memref<2x128x32xf32, #tpu.memory_space<vmem>>, vector<1x128x32xf32>
    %325 = vector.shape_cast %324 : vector<1x128x32xf32> to vector<128x32xf32>
    %cst_119 = arith.constant dense<0.000000e+00> : vector<4x32xf32>
    %326 = tpu.matmul %306, %325, %cst_119 {dimension_numbers = #tpu.dot_dimension_numbers<[1], [0], [0], [1], [0, 0, 1, 1], [], []>} : vector<4x128xf32>, vector<128x32xf32>, vector<4x32xf32> -> vector<4x32xf32>
    %327 = vector.extract_strided_slice %326 {offsets = [0, 0], sizes = [4, 8], strides = [1, 1]} : vector<4x32xf32> to vector<4x8xf32>
    %328 = vector.extract_strided_slice %326 {offsets = [0, 8], sizes = [4, 8], strides = [1, 1]} : vector<4x32xf32> to vector<4x8xf32>
    %329 = vector.extract_strided_slice %326 {offsets = [0, 16], sizes = [4, 8], strides = [1, 1]} : vector<4x32xf32> to vector<4x8xf32>
    %330 = vector.extract_strided_slice %326 {offsets = [0, 24], sizes = [4, 8], strides = [1, 1]} : vector<4x32xf32> to vector<4x8xf32>
    %c1_120 = arith.constant 1 : index
    %c0_121 = arith.constant 0 : index
    %c0_122 = arith.constant 0 : index
    %331 = vector.load %arg11[%c1_120, %c0_121, %c0_122] : memref<2x8x128xf32, #tpu.memory_space<vmem>>, vector<1x8x128xf32>
    %332 = vector.shape_cast %331 : vector<1x8x128xf32> to vector<8x128xf32>
    %333 = vector.shape_cast %323 : vector<4x128xf32> to vector<4x1x128xf32>
    %334 = vector.shape_cast %332 : vector<8x128xf32> to vector<1x8x128xf32>
    %335 = vector.broadcast %333 : vector<4x1x128xf32> to vector<4x8x128xf32>
    %336 = vector.broadcast %334 : vector<1x8x128xf32> to vector<4x8x128xf32>
    %337 = arith.mulf %335, %336 : vector<4x8x128xf32>
    %338 = math.exp %337 : vector<4x8x128xf32>
    %339 = arith.mulf %323, %306 : vector<4x128xf32>
    %340 = vector.shape_cast %327 : vector<4x8xf32> to vector<4x8x1xf32>
    %341 = vector.shape_cast %340 : vector<4x8x1xf32> to vector<4x8x1xf32>
    %342 = vector.broadcast %341 : vector<4x8x1xf32> to vector<4x8x64xf32>
    %343 = vector.shape_cast %329 : vector<4x8xf32> to vector<4x8x1xf32>
    %344 = vector.shape_cast %343 : vector<4x8x1xf32> to vector<4x8x1xf32>
    %345 = vector.broadcast %344 : vector<4x8x1xf32> to vector<4x8x64xf32>
    %346 = tpu.concatenate %342, %345 in 2 : vector<4x8x64xf32>, vector<4x8x64xf32> -> vector<4x8x128xf32>
    %347 = vector.shape_cast %328 : vector<4x8xf32> to vector<4x8x1xf32>
    %348 = vector.shape_cast %347 : vector<4x8x1xf32> to vector<4x8x1xf32>
    %349 = vector.broadcast %348 : vector<4x8x1xf32> to vector<4x8x64xf32>
    %350 = vector.shape_cast %330 : vector<4x8xf32> to vector<4x8x1xf32>
    %351 = vector.shape_cast %350 : vector<4x8x1xf32> to vector<4x8x1xf32>
    %352 = vector.broadcast %351 : vector<4x8x1xf32> to vector<4x8x64xf32>
    %353 = tpu.concatenate %349, %352 in 2 : vector<4x8x64xf32>, vector<4x8x64xf32> -> vector<4x8x128xf32>
    %354 = vector.shape_cast %339 : vector<4x128xf32> to vector<4x1x128xf32>
    %355 = vector.broadcast %354 : vector<4x1x128xf32> to vector<4x8x128xf32>
    %356 = arith.mulf %346, %355 : vector<4x8x128xf32>
    %cst_123 = arith.constant 0.000000e+00 : f32
    %357 = vector.broadcast %cst_123 : f32 to vector<8x128xf32>
    %358 = vector.extract_strided_slice %338 {offsets = [0, 0, 0], sizes = [1, 8, 128], strides = [1, 1, 1]} : vector<4x8x128xf32> to vector<1x8x128xf32>
    %359 = vector.shape_cast %358 : vector<1x8x128xf32> to vector<8x128xf32>
    %360 = arith.mulf %359, %357 : vector<8x128xf32>
    %361 = vector.extract_strided_slice %356 {offsets = [0, 0, 0], sizes = [1, 8, 128], strides = [1, 1, 1]} : vector<4x8x128xf32> to vector<1x8x128xf32>
    %362 = vector.shape_cast %361 : vector<1x8x128xf32> to vector<8x128xf32>
    %363 = arith.addf %360, %362 : vector<8x128xf32>
    %364 = vector.extract_strided_slice %353 {offsets = [0, 0, 0], sizes = [1, 8, 128], strides = [1, 1, 1]} : vector<4x8x128xf32> to vector<1x8x128xf32>
    %365 = vector.shape_cast %364 : vector<1x8x128xf32> to vector<8x128xf32>
    %366 = arith.mulf %363, %365 : vector<8x128xf32>
    %cst_124 = arith.constant dense<0.000000e+00> : vector<128xf32>
    %367 = vector.multi_reduction <add>, %366, %cst_124 [0] : vector<8x128xf32> to vector<128xf32>
    %368 = vector.shape_cast %367 : vector<128xf32> to vector<1x128xf32>
    %369 = vector.extract_strided_slice %338 {offsets = [1, 0, 0], sizes = [1, 8, 128], strides = [1, 1, 1]} : vector<4x8x128xf32> to vector<1x8x128xf32>
    %370 = vector.shape_cast %369 : vector<1x8x128xf32> to vector<8x128xf32>
    %371 = arith.mulf %370, %363 : vector<8x128xf32>
    %372 = vector.extract_strided_slice %356 {offsets = [1, 0, 0], sizes = [1, 8, 128], strides = [1, 1, 1]} : vector<4x8x128xf32> to vector<1x8x128xf32>
    %373 = vector.shape_cast %372 : vector<1x8x128xf32> to vector<8x128xf32>
    %374 = arith.addf %371, %373 : vector<8x128xf32>
    %375 = vector.extract_strided_slice %353 {offsets = [1, 0, 0], sizes = [1, 8, 128], strides = [1, 1, 1]} : vector<4x8x128xf32> to vector<1x8x128xf32>
    %376 = vector.shape_cast %375 : vector<1x8x128xf32> to vector<8x128xf32>
    %377 = arith.mulf %374, %376 : vector<8x128xf32>
    %cst_125 = arith.constant dense<0.000000e+00> : vector<128xf32>
    %378 = vector.multi_reduction <add>, %377, %cst_125 [0] : vector<8x128xf32> to vector<128xf32>
    %379 = vector.shape_cast %378 : vector<128xf32> to vector<1x128xf32>
    %380 = vector.extract_strided_slice %338 {offsets = [2, 0, 0], sizes = [1, 8, 128], strides = [1, 1, 1]} : vector<4x8x128xf32> to vector<1x8x128xf32>
    %381 = vector.shape_cast %380 : vector<1x8x128xf32> to vector<8x128xf32>
    %382 = arith.mulf %381, %374 : vector<8x128xf32>
    %383 = vector.extract_strided_slice %356 {offsets = [2, 0, 0], sizes = [1, 8, 128], strides = [1, 1, 1]} : vector<4x8x128xf32> to vector<1x8x128xf32>
    %384 = vector.shape_cast %383 : vector<1x8x128xf32> to vector<8x128xf32>
    %385 = arith.addf %382, %384 : vector<8x128xf32>
    %386 = vector.extract_strided_slice %353 {offsets = [2, 0, 0], sizes = [1, 8, 128], strides = [1, 1, 1]} : vector<4x8x128xf32> to vector<1x8x128xf32>
    %387 = vector.shape_cast %386 : vector<1x8x128xf32> to vector<8x128xf32>
    %388 = arith.mulf %385, %387 : vector<8x128xf32>
    %cst_126 = arith.constant dense<0.000000e+00> : vector<128xf32>
    %389 = vector.multi_reduction <add>, %388, %cst_126 [0] : vector<8x128xf32> to vector<128xf32>
    %390 = vector.shape_cast %389 : vector<128xf32> to vector<1x128xf32>
    %391 = vector.extract_strided_slice %338 {offsets = [3, 0, 0], sizes = [1, 8, 128], strides = [1, 1, 1]} : vector<4x8x128xf32> to vector<1x8x128xf32>
    %392 = vector.shape_cast %391 : vector<1x8x128xf32> to vector<8x128xf32>
    %393 = arith.mulf %392, %385 : vector<8x128xf32>
    %394 = vector.extract_strided_slice %356 {offsets = [3, 0, 0], sizes = [1, 8, 128], strides = [1, 1, 1]} : vector<4x8x128xf32> to vector<1x8x128xf32>
    %395 = vector.shape_cast %394 : vector<1x8x128xf32> to vector<8x128xf32>
    %396 = arith.addf %393, %395 : vector<8x128xf32>
    %397 = vector.extract_strided_slice %353 {offsets = [3, 0, 0], sizes = [1, 8, 128], strides = [1, 1, 1]} : vector<4x8x128xf32> to vector<1x8x128xf32>
    %398 = vector.shape_cast %397 : vector<1x8x128xf32> to vector<8x128xf32>
    %399 = arith.mulf %396, %398 : vector<8x128xf32>
    %cst_127 = arith.constant dense<0.000000e+00> : vector<128xf32>
    %400 = vector.multi_reduction <add>, %399, %cst_127 [0] : vector<8x128xf32> to vector<128xf32>
    %401 = vector.shape_cast %400 : vector<128xf32> to vector<1x128xf32>
    %402 = tpu.concatenate %368, %379, %390, %401 in 0 : vector<1x128xf32>, vector<1x128xf32>, vector<1x128xf32>, vector<1x128xf32> -> vector<4x128xf32>
    %c1_128 = arith.constant 1 : index
    %c0_129 = arith.constant 0 : index
    %c0_130 = arith.constant 0 : index
    %403 = vector.load %arg12[%c1_128, %c0_129, %c0_130] : memref<2x1x128xf32, #tpu.memory_space<vmem>>, vector<1x1x128xf32>
    %404 = vector.shape_cast %403 : vector<1x1x128xf32> to vector<1x128xf32>
    %405 = vector.broadcast %404 : vector<1x128xf32> to vector<4x128xf32>
    %406 = arith.mulf %405, %306 : vector<4x128xf32>
    %407 = arith.addf %402, %406 : vector<4x128xf32>
    %408 = vector.extract_strided_slice %407 {offsets = [0, 0], sizes = [4, 64], strides = [1, 1]} : vector<4x128xf32> to vector<4x64xf32>
    %409 = vector.extract_strided_slice %407 {offsets = [0, 64], sizes = [4, 64], strides = [1, 1]} : vector<4x128xf32> to vector<4x64xf32>
    %410 = vector.extract_strided_slice %409 {offsets = [3, 0], sizes = [1, 64], strides = [1, 1]} : vector<4x64xf32> to vector<1x64xf32>
    %411 = vector.extract_strided_slice %409 {offsets = [2, 0], sizes = [1, 64], strides = [1, 1]} : vector<4x64xf32> to vector<1x64xf32>
    %412 = vector.extract_strided_slice %409 {offsets = [1, 0], sizes = [1, 64], strides = [1, 1]} : vector<4x64xf32> to vector<1x64xf32>
    %413 = vector.extract_strided_slice %409 {offsets = [0, 0], sizes = [1, 64], strides = [1, 1]} : vector<4x64xf32> to vector<1x64xf32>
    %414 = tpu.concatenate %410, %411, %412, %413 in 0 : vector<1x64xf32>, vector<1x64xf32>, vector<1x64xf32>, vector<1x64xf32> -> vector<4x64xf32>
    %415 = tpu.concatenate %408, %414 in 1 : vector<4x64xf32>, vector<4x64xf32> -> vector<4x128xf32>
    %cst_131 = arith.constant 0.000000e+00 : f32
    %416 = vector.broadcast %cst_131 : f32 to vector<4x128xf32>
    %417 = arith.subf %416, %262 : vector<4x128xf32>
    %418 = math.exp %417 : vector<4x128xf32>
    %cst_132 = arith.constant 1.000000e+00 : f32
    %419 = vector.broadcast %cst_132 : f32 to vector<4x128xf32>
    %420 = arith.addf %419, %418 : vector<4x128xf32>
    %421 = tpu.reciprocal %420 {approx = true} : vector<4x128xf32> -> vector<4x128xf32>
    %422 = arith.mulf %262, %421 : vector<4x128xf32>
    %423 = arith.mulf %415, %422 : vector<4x128xf32>
    %c1_133 = arith.constant 1 : index
    %c0_134 = arith.constant 0 : index
    %c0_135 = arith.constant 0 : index
    %424 = vector.load %arg13[%c1_133, %c0_134, %c0_135] : memref<2x128x32xf32, #tpu.memory_space<vmem>>, vector<1x128x32xf32>
    %425 = vector.shape_cast %424 : vector<1x128x32xf32> to vector<128x32xf32>
    %cst_136 = arith.constant dense<0.000000e+00> : vector<4x32xf32>
    %426 = tpu.matmul %423, %425, %cst_136 {dimension_numbers = #tpu.dot_dimension_numbers<[1], [0], [0], [1], [0, 0, 1, 1], [], []>} : vector<4x128xf32>, vector<128x32xf32>, vector<4x32xf32> -> vector<4x32xf32>
    %427 = arith.addf %257, %426 : vector<4x32xf32>
    %c1_137 = arith.constant 1 : index
    %c0_138 = arith.constant 0 : index
    %c0_139 = arith.constant 0 : index
    %428 = vector.load %arg14[%c1_137, %c0_138, %c0_139] : memref<2x1x32xf32, #tpu.memory_space<vmem>>, vector<1x1x32xf32>
    %429 = vector.shape_cast %428 : vector<1x1x32xf32> to vector<1x32xf32>
    %c1_140 = arith.constant 1 : index
    %c0_141 = arith.constant 0 : index
    %c0_142 = arith.constant 0 : index
    %430 = vector.load %arg15[%c1_140, %c0_141, %c0_142] : memref<2x1x32xf32, #tpu.memory_space<vmem>>, vector<1x1x32xf32>
    %431 = vector.shape_cast %430 : vector<1x1x32xf32> to vector<1x32xf32>
    %cst_143 = arith.constant dense<0.000000e+00> : vector<4xf32>
    %432 = vector.multi_reduction <add>, %427, %cst_143 [1] : vector<4x32xf32> to vector<4xf32>
    %433 = vector.shape_cast %432 : vector<4xf32> to vector<4x1xf32>
    %cst_144 = arith.constant 3.200000e+01 : f32
    %434 = vector.broadcast %cst_144 : f32 to vector<4x1xf32>
    %435 = arith.divf %433, %434 : vector<4x1xf32>
    %436 = vector.broadcast %435 : vector<4x1xf32> to vector<4x32xf32>
    %437 = arith.subf %427, %436 : vector<4x32xf32>
    %438 = arith.mulf %437, %437 : vector<4x32xf32>
    %cst_145 = arith.constant dense<0.000000e+00> : vector<4xf32>
    %439 = vector.multi_reduction <add>, %438, %cst_145 [1] : vector<4x32xf32> to vector<4xf32>
    %440 = vector.shape_cast %439 : vector<4xf32> to vector<4x1xf32>
    %cst_146 = arith.constant 3.200000e+01 : f32
    %441 = vector.broadcast %cst_146 : f32 to vector<4x1xf32>
    %442 = arith.divf %440, %441 : vector<4x1xf32>
    %cst_147 = arith.constant 9.99999974E-6 : f32
    %443 = vector.broadcast %cst_147 : f32 to vector<4x1xf32>
    %444 = arith.addf %442, %443 : vector<4x1xf32>
    %445 = math.rsqrt %444 : vector<4x1xf32>
    %446 = vector.broadcast %445 : vector<4x1xf32> to vector<4x32xf32>
    %447 = arith.mulf %437, %446 : vector<4x32xf32>
    %448 = vector.broadcast %429 : vector<1x32xf32> to vector<4x32xf32>
    %449 = arith.mulf %447, %448 : vector<4x32xf32>
    %450 = vector.broadcast %431 : vector<1x32xf32> to vector<4x32xf32>
    %451 = arith.addf %449, %450 : vector<4x32xf32>
    %c1_148 = arith.constant 1 : index
    %c0_149 = arith.constant 0 : index
    %c0_150 = arith.constant 0 : index
    %452 = vector.load %arg16[%c1_148, %c0_149, %c0_150] : memref<2x32x64xf32, #tpu.memory_space<vmem>>, vector<1x32x64xf32>
    %453 = vector.shape_cast %452 : vector<1x32x64xf32> to vector<32x64xf32>
    %cst_151 = arith.constant dense<0.000000e+00> : vector<4x64xf32>
    %454 = tpu.matmul %451, %453, %cst_151 {dimension_numbers = #tpu.dot_dimension_numbers<[1], [0], [0], [1], [0, 0, 1, 1], [], []>} : vector<4x32xf32>, vector<32x64xf32>, vector<4x64xf32> -> vector<4x64xf32>
    %c1_152 = arith.constant 1 : index
    %c0_153 = arith.constant 0 : index
    %c0_154 = arith.constant 0 : index
    %455 = vector.load %arg17[%c1_152, %c0_153, %c0_154] : memref<2x1x64xf32, #tpu.memory_space<vmem>>, vector<1x1x64xf32>
    %456 = vector.shape_cast %455 : vector<1x1x64xf32> to vector<1x64xf32>
    %457 = vector.broadcast %456 : vector<1x64xf32> to vector<4x64xf32>
    %458 = arith.addf %454, %457 : vector<4x64xf32>
    %cst_155 = arith.constant 0.000000e+00 : f32
    %459 = vector.broadcast %cst_155 : f32 to vector<4x64xf32>
    %460 = arith.maximumf %458, %459 : vector<4x64xf32>
    %c1_156 = arith.constant 1 : index
    %c0_157 = arith.constant 0 : index
    %c0_158 = arith.constant 0 : index
    %461 = vector.load %arg18[%c1_156, %c0_157, %c0_158] : memref<2x64x32xf32, #tpu.memory_space<vmem>>, vector<1x64x32xf32>
    %462 = vector.shape_cast %461 : vector<1x64x32xf32> to vector<64x32xf32>
    %cst_159 = arith.constant dense<0.000000e+00> : vector<4x32xf32>
    %463 = tpu.matmul %460, %462, %cst_159 {dimension_numbers = #tpu.dot_dimension_numbers<[1], [0], [0], [1], [0, 0, 1, 1], [], []>} : vector<4x64xf32>, vector<64x32xf32>, vector<4x32xf32> -> vector<4x32xf32>
    %c1_160 = arith.constant 1 : index
    %c0_161 = arith.constant 0 : index
    %c0_162 = arith.constant 0 : index
    %464 = vector.load %arg19[%c1_160, %c0_161, %c0_162] : memref<2x1x32xf32, #tpu.memory_space<vmem>>, vector<1x1x32xf32>
    %465 = vector.shape_cast %464 : vector<1x1x32xf32> to vector<1x32xf32>
    %466 = vector.broadcast %465 : vector<1x32xf32> to vector<4x32xf32>
    %467 = arith.addf %463, %466 : vector<4x32xf32>
    %468 = arith.addf %451, %467 : vector<4x32xf32>
    %c1_163 = arith.constant 1 : index
    %c0_164 = arith.constant 0 : index
    %c0_165 = arith.constant 0 : index
    %469 = vector.load %arg20[%c1_163, %c0_164, %c0_165] : memref<2x1x32xf32, #tpu.memory_space<vmem>>, vector<1x1x32xf32>
    %470 = vector.shape_cast %469 : vector<1x1x32xf32> to vector<1x32xf32>
    %c1_166 = arith.constant 1 : index
    %c0_167 = arith.constant 0 : index
    %c0_168 = arith.constant 0 : index
    %471 = vector.load %arg21[%c1_166, %c0_167, %c0_168] : memref<2x1x32xf32, #tpu.memory_space<vmem>>, vector<1x1x32xf32>
    %472 = vector.shape_cast %471 : vector<1x1x32xf32> to vector<1x32xf32>
    %cst_169 = arith.constant dense<0.000000e+00> : vector<4xf32>
    %473 = vector.multi_reduction <add>, %468, %cst_169 [1] : vector<4x32xf32> to vector<4xf32>
    %474 = vector.shape_cast %473 : vector<4xf32> to vector<4x1xf32>
    %cst_170 = arith.constant 3.200000e+01 : f32
    %475 = vector.broadcast %cst_170 : f32 to vector<4x1xf32>
    %476 = arith.divf %474, %475 : vector<4x1xf32>
    %477 = vector.broadcast %476 : vector<4x1xf32> to vector<4x32xf32>
    %478 = arith.subf %468, %477 : vector<4x32xf32>
    %479 = arith.mulf %478, %478 : vector<4x32xf32>
    %cst_171 = arith.constant dense<0.000000e+00> : vector<4xf32>
    %480 = vector.multi_reduction <add>, %479, %cst_171 [1] : vector<4x32xf32> to vector<4xf32>
    %481 = vector.shape_cast %480 : vector<4xf32> to vector<4x1xf32>
    %cst_172 = arith.constant 3.200000e+01 : f32
    %482 = vector.broadcast %cst_172 : f32 to vector<4x1xf32>
    %483 = arith.divf %481, %482 : vector<4x1xf32>
    %cst_173 = arith.constant 9.99999974E-6 : f32
    %484 = vector.broadcast %cst_173 : f32 to vector<4x1xf32>
    %485 = arith.addf %483, %484 : vector<4x1xf32>
    %486 = math.rsqrt %485 : vector<4x1xf32>
    %487 = vector.broadcast %486 : vector<4x1xf32> to vector<4x32xf32>
    %488 = arith.mulf %478, %487 : vector<4x32xf32>
    %489 = vector.broadcast %470 : vector<1x32xf32> to vector<4x32xf32>
    %490 = arith.mulf %488, %489 : vector<4x32xf32>
    %491 = vector.broadcast %472 : vector<1x32xf32> to vector<4x32xf32>
    %492 = arith.addf %490, %491 : vector<4x32xf32>
    %c0_174 = arith.constant 0 : index
    %c0_175 = arith.constant 0 : index
    %493 = vector.load %arg22[%c0_174, %c0_175] : memref<1x32xf32, #tpu.memory_space<vmem>>, vector<1x32xf32>
    %c0_176 = arith.constant 0 : index
    %c0_177 = arith.constant 0 : index
    %494 = vector.load %arg23[%c0_176, %c0_177] : memref<1x32xf32, #tpu.memory_space<vmem>>, vector<1x32xf32>
    %cst_178 = arith.constant dense<0.000000e+00> : vector<4xf32>
    %495 = vector.multi_reduction <add>, %492, %cst_178 [1] : vector<4x32xf32> to vector<4xf32>
    %496 = vector.shape_cast %495 : vector<4xf32> to vector<4x1xf32>
    %cst_179 = arith.constant 3.200000e+01 : f32
    %497 = vector.broadcast %cst_179 : f32 to vector<4x1xf32>
    %498 = arith.divf %496, %497 : vector<4x1xf32>
    %499 = vector.broadcast %498 : vector<4x1xf32> to vector<4x32xf32>
    %500 = arith.subf %492, %499 : vector<4x32xf32>
    %501 = arith.mulf %500, %500 : vector<4x32xf32>
    %cst_180 = arith.constant dense<0.000000e+00> : vector<4xf32>
    %502 = vector.multi_reduction <add>, %501, %cst_180 [1] : vector<4x32xf32> to vector<4xf32>
    %503 = vector.shape_cast %502 : vector<4xf32> to vector<4x1xf32>
    %cst_181 = arith.constant 3.200000e+01 : f32
    %504 = vector.broadcast %cst_181 : f32 to vector<4x1xf32>
    %505 = arith.divf %503, %504 : vector<4x1xf32>
    %cst_182 = arith.constant 9.99999974E-6 : f32
    %506 = vector.broadcast %cst_182 : f32 to vector<4x1xf32>
    %507 = arith.addf %505, %506 : vector<4x1xf32>
    %508 = math.rsqrt %507 : vector<4x1xf32>
    %509 = vector.broadcast %508 : vector<4x1xf32> to vector<4x32xf32>
    %510 = arith.mulf %500, %509 : vector<4x32xf32>
    %511 = vector.broadcast %493 : vector<1x32xf32> to vector<4x32xf32>
    %512 = arith.mulf %510, %511 : vector<4x32xf32>
    %513 = vector.broadcast %494 : vector<1x32xf32> to vector<4x32xf32>
    %514 = arith.addf %512, %513 : vector<4x32xf32>
    %cst_183 = arith.constant dense<0.000000e+00> : vector<32xf32>
    %515 = vector.multi_reduction <add>, %514, %cst_183 [0] : vector<4x32xf32> to vector<32xf32>
    %516 = vector.shape_cast %515 : vector<32xf32> to vector<1x32xf32>
    %cst_184 = arith.constant 4.000000e+00 : f32
    %517 = vector.broadcast %cst_184 : f32 to vector<1x32xf32>
    %518 = arith.divf %516, %517 : vector<1x32xf32>
    %c0_185 = arith.constant 0 : index
    %c0_186 = arith.constant 0 : index
    %519 = vector.load %arg24[%c0_185, %c0_186] : memref<32x16xf32, #tpu.memory_space<vmem>>, vector<32x16xf32>
    %cst_187 = arith.constant dense<0.000000e+00> : vector<1x16xf32>
    %520 = tpu.matmul %518, %519, %cst_187 {dimension_numbers = #tpu.dot_dimension_numbers<[1], [0], [0], [1], [0, 0, 1, 1], [], []>} : vector<1x32xf32>, vector<32x16xf32>, vector<1x16xf32> -> vector<1x16xf32>
    %c0_188 = arith.constant 0 : index
    %c0_189 = arith.constant 0 : index
    %521 = vector.load %arg25[%c0_188, %c0_189] : memref<1x16xf32, #tpu.memory_space<vmem>>, vector<1x16xf32>
    %522 = arith.addf %520, %521 : vector<1x16xf32>
    %c0_190 = arith.constant 0 : index
    %c0_191 = arith.constant 0 : index
    %c0_192 = arith.constant 0 : index
    %523 = vector.load %arg2[%c0_190, %c0_191, %c0_192] : memref<1x16x8xf32, #tpu.memory_space<vmem>>, vector<1x16x8xf32>
    %524 = vector.shape_cast %523 : vector<1x16x8xf32> to vector<16x8xf32>
    %cst_193 = arith.constant dense<0.000000e+00> : vector<8xf32>
    %525 = vector.multi_reduction <add>, %524, %cst_193 [0] : vector<16x8xf32> to vector<8xf32>
    %526 = vector.shape_cast %525 : vector<8xf32> to vector<1x8xf32>
    %cst_194 = arith.constant 1.600000e+01 : f32
    %527 = vector.broadcast %cst_194 : f32 to vector<1x8xf32>
    %528 = arith.divf %526, %527 : vector<1x8xf32>
    %529 = tpu.concatenate %528, %522 in 1 : vector<1x8xf32>, vector<1x16xf32> -> vector<1x24xf32>
    %c0_195 = arith.constant 0 : index
    %c0_196 = arith.constant 0 : index
    %530 = vector.load %arg26[%c0_195, %c0_196] : memref<24x512xf32, #tpu.memory_space<vmem>>, vector<24x512xf32>
    %cst_197 = arith.constant dense<0.000000e+00> : vector<1x512xf32>
    %531 = tpu.matmul %529, %530, %cst_197 {dimension_numbers = #tpu.dot_dimension_numbers<[1], [0], [0], [1], [0, 0, 1, 1], [], []>} : vector<1x24xf32>, vector<24x512xf32>, vector<1x512xf32> -> vector<1x512xf32>
    %c0_198 = arith.constant 0 : index
    %c0_199 = arith.constant 0 : index
    %532 = vector.load %arg27[%c0_198, %c0_199] : memref<1x512xf32, #tpu.memory_space<vmem>>, vector<1x512xf32>
    %533 = arith.addf %531, %532 : vector<1x512xf32>
    %cst_200 = arith.constant 0.000000e+00 : f32
    %534 = vector.broadcast %cst_200 : f32 to vector<1x512xf32>
    %535 = arith.maximumf %533, %534 : vector<1x512xf32>
    %c0_201 = arith.constant 0 : index
    %c0_202 = arith.constant 0 : index
    %536 = vector.load %arg28[%c0_201, %c0_202] : memref<512x128xf32, #tpu.memory_space<vmem>>, vector<512x128xf32>
    %cst_203 = arith.constant dense<0.000000e+00> : vector<1x128xf32>
    %537 = tpu.matmul %535, %536, %cst_203 {dimension_numbers = #tpu.dot_dimension_numbers<[1], [0], [0], [1], [0, 0, 1, 1], [], []>} : vector<1x512xf32>, vector<512x128xf32>, vector<1x128xf32> -> vector<1x128xf32>
    %c0_204 = arith.constant 0 : index
    %c0_205 = arith.constant 0 : index
    %538 = vector.load %arg29[%c0_204, %c0_205] : memref<1x128xf32, #tpu.memory_space<vmem>>, vector<1x128xf32>
    %539 = arith.addf %537, %538 : vector<1x128xf32>
    %cst_206 = arith.constant 0.000000e+00 : f32
    %540 = vector.broadcast %cst_206 : f32 to vector<1x128xf32>
    %541 = arith.maximumf %539, %540 : vector<1x128xf32>
    %c0_207 = arith.constant 0 : index
    %c0_208 = arith.constant 0 : index
    %542 = vector.load %arg30[%c0_207, %c0_208] : memref<128x128xf32, #tpu.memory_space<vmem>>, vector<128x128xf32>
    %cst_209 = arith.constant dense<0.000000e+00> : vector<1x128xf32>
    %543 = tpu.matmul %541, %542, %cst_209 {dimension_numbers = #tpu.dot_dimension_numbers<[1], [0], [0], [1], [0, 0, 1, 1], [], []>} : vector<1x128xf32>, vector<128x128xf32>, vector<1x128xf32> -> vector<1x128xf32>
    %c0_210 = arith.constant 0 : index
    %c0_211 = arith.constant 0 : index
    %544 = vector.load %arg31[%c0_210, %c0_211] : memref<1x128xf32, #tpu.memory_space<vmem>>, vector<1x128xf32>
    %545 = arith.addf %543, %544 : vector<1x128xf32>
    %cst_212 = arith.constant 0.000000e+00 : f32
    %546 = vector.broadcast %cst_212 : f32 to vector<1x128xf32>
    %547 = arith.maximumf %545, %546 : vector<1x128xf32>
    %c0_213 = arith.constant 0 : index
    %c0_214 = arith.constant 0 : index
    %548 = vector.load %arg32[%c0_213, %c0_214] : memref<128x1xf32, #tpu.memory_space<vmem>>, vector<128x1xf32>
    %cst_215 = arith.constant dense<0.000000e+00> : vector<1x1xf32>
    %549 = tpu.matmul %547, %548, %cst_215 {dimension_numbers = #tpu.dot_dimension_numbers<[1], [0], [0], [1], [0, 0, 1, 1], [], []>} : vector<1x128xf32>, vector<128x1xf32>, vector<1x1xf32> -> vector<1x1xf32>
    %c0_216 = arith.constant 0 : index
    %c0_217 = arith.constant 0 : index
    %550 = vector.load %arg33[%c0_216, %c0_217] : memref<1x1xf32, #tpu.memory_space<vmem>>, vector<1x1xf32>
    %551 = arith.addf %549, %550 : vector<1x1xf32>
    %c0_218 = arith.constant 0 : index
    %c0_219 = arith.constant 0 : index
    %c0_220 = arith.constant 0 : index
    %552 = vector.load %arg34[%c0_218, %c0_219, %c0_220] : memref<1x1x1xf32, #tpu.memory_space<vmem>>, vector<1x1x1xf32>
    %553 = vector.shape_cast %552 : vector<1x1x1xf32> to vector<1x1xf32>
    %554 = vector.shape_cast %551 : vector<1x1xf32> to vector<1x1x1xf32>
    tpu.vector_store %arg34[%c0_218, %c0_219, %c0_220], %554 {strides = array<i32>} : memref<1x1x1xf32, #tpu.memory_space<vmem>>, vector<1x1x1xf32>,
    return
  }
  func.func @transform_0(%arg0: i32) -> (i32, i32, i32) {
    %c0_i32 = arith.constant 0 : i32
    %c0_i32_0 = arith.constant 0 : i32
    %c0_i32_1 = arith.constant 0 : i32
    return %arg0, %c0_i32, %c0_i32_0 : i32, i32, i32
  }
  func.func @transform_1(%arg0: i32) -> (i32, i32, i32) {
    %c0_i32 = arith.constant 0 : i32
    %c0_i32_0 = arith.constant 0 : i32
    %c0_i32_1 = arith.constant 0 : i32
    return %arg0, %c0_i32, %c0_i32_0 : i32, i32, i32
  }
  func.func @transform_2(%arg0: i32) -> (i32, i32) {
    %c0_i32 = arith.constant 0 : i32
    %c0_i32_0 = arith.constant 0 : i32
    %c0_i32_1 = arith.constant 0 : i32
    return %c0_i32, %c0_i32_0 : i32, i32
  }
  func.func @transform_3(%arg0: i32) -> (i32, i32) {
    %c0_i32 = arith.constant 0 : i32
    %c0_i32_0 = arith.constant 0 : i32
    %c0_i32_1 = arith.constant 0 : i32
    return %c0_i32, %c0_i32_0 : i32, i32
  }
  func.func @transform_4(%arg0: i32) -> (i32, i32, i32) {
    %c0_i32 = arith.constant 0 : i32
    %c0_i32_0 = arith.constant 0 : i32
    %c0_i32_1 = arith.constant 0 : i32
    %c0_i32_2 = arith.constant 0 : i32
    return %c0_i32, %c0_i32_0, %c0_i32_1 : i32, i32, i32
  }
  func.func @transform_5(%arg0: i32) -> (i32, i32, i32) {
    %c0_i32 = arith.constant 0 : i32
    %c0_i32_0 = arith.constant 0 : i32
    %c0_i32_1 = arith.constant 0 : i32
    %c0_i32_2 = arith.constant 0 : i32
    return %c0_i32, %c0_i32_0, %c0_i32_1 : i32, i32, i32
  }
  func.func @transform_6(%arg0: i32) -> (i32, i32, i32) {
    %c0_i32 = arith.constant 0 : i32
    %c0_i32_0 = arith.constant 0 : i32
    %c0_i32_1 = arith.constant 0 : i32
    %c0_i32_2 = arith.constant 0 : i32
    return %c0_i32, %c0_i32_0, %c0_i32_1 : i32, i32, i32
  }
  func.func @transform_7(%arg0: i32) -> (i32, i32, i32) {
    %c0_i32 = arith.constant 0 : i32
    %c0_i32_0 = arith.constant 0 : i32
    %c0_i32_1 = arith.constant 0 : i32
    %c0_i32_2 = arith.constant 0 : i32
    return %c0_i32, %c0_i32_0, %c0_i32_1 : i32, i32, i32
  }
  func.func @transform_8(%arg0: i32) -> (i32, i32, i32) {
    %c0_i32 = arith.constant 0 : i32
    %c0_i32_0 = arith.constant 0 : i32
    %c0_i32_1 = arith.constant 0 : i32
    %c0_i32_2 = arith.constant 0 : i32
    return %c0_i32, %c0_i32_0, %c0_i32_1 : i32, i32, i32
  }
  func.func @transform_9(%arg0: i32) -> (i32, i32, i32) {
    %c0_i32 = arith.constant 0 : i32
    %c0_i32_0 = arith.constant 0 : i32
    %c0_i32_1 = arith.constant 0 : i32
    %c0_i32_2 = arith.constant 0 : i32
    return %c0_i32, %c0_i32_0, %c0_i32_1 : i32, i32, i32
  }
  func.func @transform_10(%arg0: i32) -> (i32, i32, i32) {
    %c0_i32 = arith.constant 0 : i32
    %c0_i32_0 = arith.constant 0 : i32
    %c0_i32_1 = arith.constant 0 : i32
    %c0_i32_2 = arith.constant 0 : i32
    return %c0_i32, %c0_i32_0, %c0_i32_1 : i32, i32, i32
  }
  func.func @transform_11(%arg0: i32) -> (i32, i32, i32) {
    %c0_i32 = arith.constant 0 : i32
    %c0_i32_0 = arith.constant 0 : i32
    %c0_i32_1 = arith.constant 0 : i32
    %c0_i32_2 = arith.constant 0 : i32
    return %c0_i32, %c0_i32_0, %c0_i32_1 : i32, i32, i32
  }
  func.func @transform_12(%arg0: i32) -> (i32, i32, i32) {
    %c0_i32 = arith.constant 0 : i32
    %c0_i32_0 = arith.constant 0 : i32
    %c0_i32_1 = arith.constant 0 : i32
    %c0_i32_2 = arith.constant 0 : i32
    return %c0_i32, %c0_i32_0, %c0_i32_1 : i32, i32, i32
  }
  func.func @transform_13(%arg0: i32) -> (i32, i32, i32) {
    %c0_i32 = arith.constant 0 : i32
    %c0_i32_0 = arith.constant 0 : i32
    %c0_i32_1 = arith.constant 0 : i32
    %c0_i32_2 = arith.constant 0 : i32
    return %c0_i32, %c0_i32_0, %c0_i32_1 : i32, i32, i32
  }
  func.func @transform_14(%arg0: i32) -> (i32, i32, i32) {
    %c0_i32 = arith.constant 0 : i32
    %c0_i32_0 = arith.constant 0 : i32
    %c0_i32_1 = arith.constant 0 : i32
    %c0_i32_2 = arith.constant 0 : i32
    return %c0_i32, %c0_i32_0, %c0_i32_1 : i32, i32, i32
  }
  func.func @transform_15(%arg0: i32) -> (i32, i32, i32) {
    %c0_i32 = arith.constant 0 : i32
    %c0_i32_0 = arith.constant 0 : i32
    %c0_i32_1 = arith.constant 0 : i32
    %c0_i32_2 = arith.constant 0 : i32
    return %c0_i32, %c0_i32_0, %c0_i32_1 : i32, i32, i32
  }
  func.func @transform_16(%arg0: i32) -> (i32, i32, i32) {
    %c0_i32 = arith.constant 0 : i32
    %c0_i32_0 = arith.constant 0 : i32
    %c0_i32_1 = arith.constant 0 : i32
    %c0_i32_2 = arith.constant 0 : i32
    return %c0_i32, %c0_i32_0, %c0_i32_1 : i32, i32, i32
  }
  func.func @transform_17(%arg0: i32) -> (i32, i32, i32) {
    %c0_i32 = arith.constant 0 : i32
    %c0_i32_0 = arith.constant 0 : i32
    %c0_i32_1 = arith.constant 0 : i32
    %c0_i32_2 = arith.constant 0 : i32
    return %c0_i32, %c0_i32_0, %c0_i32_1 : i32, i32, i32
  }
  func.func @transform_18(%arg0: i32) -> (i32, i32, i32) {
    %c0_i32 = arith.constant 0 : i32
    %c0_i32_0 = arith.constant 0 : i32
    %c0_i32_1 = arith.constant 0 : i32
    %c0_i32_2 = arith.constant 0 : i32
    return %c0_i32, %c0_i32_0, %c0_i32_1 : i32, i32, i32
  }
  func.func @transform_19(%arg0: i32) -> (i32, i32, i32) {
    %c0_i32 = arith.constant 0 : i32
    %c0_i32_0 = arith.constant 0 : i32
    %c0_i32_1 = arith.constant 0 : i32
    %c0_i32_2 = arith.constant 0 : i32
    return %c0_i32, %c0_i32_0, %c0_i32_1 : i32, i32, i32
  }
  func.func @transform_20(%arg0: i32) -> (i32, i32, i32) {
    %c0_i32 = arith.constant 0 : i32
    %c0_i32_0 = arith.constant 0 : i32
    %c0_i32_1 = arith.constant 0 : i32
    %c0_i32_2 = arith.constant 0 : i32
    return %c0_i32, %c0_i32_0, %c0_i32_1 : i32, i32, i32
  }
  func.func @transform_21(%arg0: i32) -> (i32, i32) {
    %c0_i32 = arith.constant 0 : i32
    %c0_i32_0 = arith.constant 0 : i32
    %c0_i32_1 = arith.constant 0 : i32
    return %c0_i32, %c0_i32_0 : i32, i32
  }
  func.func @transform_22(%arg0: i32) -> (i32, i32) {
    %c0_i32 = arith.constant 0 : i32
    %c0_i32_0 = arith.constant 0 : i32
    %c0_i32_1 = arith.constant 0 : i32
    return %c0_i32, %c0_i32_0 : i32, i32
  }
  func.func @transform_23(%arg0: i32) -> (i32, i32) {
    %c0_i32 = arith.constant 0 : i32
    %c0_i32_0 = arith.constant 0 : i32
    %c0_i32_1 = arith.constant 0 : i32
    return %c0_i32, %c0_i32_0 : i32, i32
  }
  func.func @transform_24(%arg0: i32) -> (i32, i32) {
    %c0_i32 = arith.constant 0 : i32
    %c0_i32_0 = arith.constant 0 : i32
    %c0_i32_1 = arith.constant 0 : i32
    return %c0_i32, %c0_i32_0 : i32, i32
  }
  func.func @transform_25(%arg0: i32) -> (i32, i32) {
    %c0_i32 = arith.constant 0 : i32
    %c0_i32_0 = arith.constant 0 : i32
    %c0_i32_1 = arith.constant 0 : i32
    return %c0_i32, %c0_i32_0 : i32, i32
  }
  func.func @transform_26(%arg0: i32) -> (i32, i32) {
    %c0_i32 = arith.constant 0 : i32
    %c0_i32_0 = arith.constant 0 : i32
    %c0_i32_1 = arith.constant 0 : i32
    return %c0_i32, %c0_i32_0 : i32, i32
  }
  func.func @transform_27(%arg0: i32) -> (i32, i32) {
    %c0_i32 = arith.constant 0 : i32
    %c0_i32_0 = arith.constant 0 : i32
    %c0_i32_1 = arith.constant 0 : i32
    return %c0_i32, %c0_i32_0 : i32, i32
  }
  func.func @transform_28(%arg0: i32) -> (i32, i32) {
    %c0_i32 = arith.constant 0 : i32
    %c0_i32_0 = arith.constant 0 : i32
    %c0_i32_1 = arith.constant 0 : i32
    return %c0_i32, %c0_i32_0 : i32, i32
  }
  func.func @transform_29(%arg0: i32) -> (i32, i32) {
    %c0_i32 = arith.constant 0 : i32
    %c0_i32_0 = arith.constant 0 : i32
    %c0_i32_1 = arith.constant 0 : i32
    return %c0_i32, %c0_i32_0 : i32, i32
  }
  func.func @transform_30(%arg0: i32) -> (i32, i32) {
    %c0_i32 = arith.constant 0 : i32
    %c0_i32_0 = arith.constant 0 : i32
    %c0_i32_1 = arith.constant 0 : i32
    return %c0_i32, %c0_i32_0 : i32, i32
  }
  func.func @transform_31(%arg0: i32) -> (i32, i32) {
    %c0_i32 = arith.constant 0 : i32
    %c0_i32_0 = arith.constant 0 : i32
    %c0_i32_1 = arith.constant 0 : i32
    return %c0_i32, %c0_i32_0 : i32, i32
  }
  func.func @transform_32(%arg0: i32) -> (i32, i32) {
    %c0_i32 = arith.constant 0 : i32
    %c0_i32_0 = arith.constant 0 : i32
    %c0_i32_1 = arith.constant 0 : i32
    return %c0_i32, %c0_i32_0 : i32, i32
  }
  func.func @transform_33(%arg0: i32) -> (i32, i32, i32) {
    %c0_i32 = arith.constant 0 : i32
    %c0_i32_0 = arith.constant 0 : i32
    %c0_i32_1 = arith.constant 0 : i32
    return %arg0, %c0_i32, %c0_i32_0 : i32, i32, i32
  }
}

</mosaic_0001>

<bundles_post_ra>
// kernel: mamba_llm_forward.1
= control target key start
LH: loop header
LB: loop body
LE: loop exit
PB: predicated region body
PF: predicated region fallthrough
CT: control target
= control target key end

     0   :  { %s5779_s6 = smov 1   ;;  %s5780_s10 = smov 2   ;;  %s6816_s0 = inlined_call_operand.smem [shape: u32[34], index: -1, kind: input, shape index: {}] }
   0x1   :  { %s5844_s5 = sld [smem:[%s6816_s0]]   ;;  %s5781_s14 = smov 3  }
   0x2   :  { %s5849_s9 = sld [smem:[%s6816_s0 + %s5779_s6]]   ;;  %s5782_s18 = smov 4  }
   0x3   :  { %s5854_s13 = sld [smem:[%s6816_s0 + %s5780_s10]]   ;;  %s5783_s22 = smov 5  }
   0x4   :  { %s5859_s17 = sld [smem:[%s6816_s0 + %s5781_s14]]   ;;  %s5784_s26 = smov 6  }
   0x5   :  { %s5864_s21 = sld [smem:[%s6816_s0 + %s5782_s18]]   ;;  %s5785_s30 = smov 7  }
   0x6   :  { %s5869_s25 = sld [smem:[%s6816_s0 + %s5783_s22]]   ;;  %s5786_s4 = smov 8  }
   0x7   :  { %s5874_s29 = sld [smem:[%s6816_s0 + %s5784_s26]]   ;;  %s5787_s10 = smov 9  }
   0x8   :  { %6835 = sst [smem:[#allocation30_spill]] %s5849_s9  ;;  %s5788_s15 = smov 10  }
   0x9   :  { %6836 = sst [smem:[#allocation31_spill]] %s5854_s13  ;;  %s5789_s20 = smov 11  }
   0xa   :  { %s5879_s3 = sld [smem:[%s6816_s0 + %s5785_s30]]   ;;  %s5790_s26 = smov 12  }
   0xb   :  { %6837 = sst [smem:[#allocation32_spill]] %s5864_s21  ;;  %s5791_s1 = smov 13  }
   0xc   :  { %s5884_s8 = sld [smem:[%s6816_s0 + %s5786_s4]]   ;;  %s5792_s7 = smov 14  }
   0xd   :  { %s5889_s14 = sld [smem:[%s6816_s0 + %s5787_s10]]   ;;  %s5794_s22 = smov 16  }
   0xe   :  { %s5894_s19 = sld [smem:[%s6816_s0 + %s5788_s15]]   ;;  %s5793_s15 = smov 15  }
   0xf   :  { %s5899_s24 = sld [smem:[%s6816_s0 + %s5789_s20]]   ;;  %s5795_s28 = smov 17  }
  0x10   :  { %6838 = sst [smem:[#allocation33_spill]] %s5879_s3 }
  0x11   :  { %s5904_s30 = sld [smem:[%s6816_s0 + %s5790_s26]]  }
  0x12   :  { %6839 = sst [smem:[#allocation34_spill]] %s5884_s8 }
  0x13   :  { %6840 = sst [smem:[#allocation35_spill]] %s5889_s14 }
  0x14   :  { %s5909_s6 = sld [smem:[%s6816_s0 + %s5791_s1]]   ;;  %s5811_s1 = smov 33  }
  0x15   :  { %s5914_s12 = sld [smem:[%s6816_s0 + %s5792_s7]]   ;;  %s5796_s7 = smov 18  }
  0x16   :  { %s5919_s20 = sld [smem:[%s6816_s0 + %s5793_s15]]   ;;  %s5797_s15 = smov 19  }
  0x17   :  { %6841 = sst [smem:[#allocation36_spill]] %s5904_s30 }
  0x18   :  { %s5924_s27 = sld [smem:[%s6816_s0 + %s5794_s22]]   ;;  %s5798_s22 = smov 20  }
  0x19   :  { %s5929_s4 = sld [smem:[%s6816_s0 + %s5795_s28]]   ;;  %s5799_s28 = smov 21  }
  0x1a   :  { %6842 = sst [smem:[#allocation37_spill]] %s5909_s6 }
  0x1b   :  { %s5934_s9 = sld [smem:[%s6816_s0 + %s5796_s7]]   ;;  %s5800_s7 = smov 22  }
  0x1c   :  { %s5939_s30 = sld [smem:[%s6816_s0 + %s5797_s15]]   ;;  %s5801_s15 = smov 23  }
  0x1d   :  { %s5944_s14 = sld [smem:[%s6816_s0 + %s5798_s22]]   ;;  %s5802_s22 = smov 24  }
  0x1e   :  { %s5954_s3 = sld [smem:[%s6816_s0 + %s5800_s7]]   ;;  %s5804_s7 = smov 26  }
  0x1f   :  { %6843 = sst [smem:[#allocation38_spill]] %s5929_s4 }
  0x20   :  { %s5949_s4 = sld [smem:[%s6816_s0 + %s5799_s28]]   ;;  %s5803_s28 = smov 25  }
  0x21   :  { %s5959_s21 = sld [smem:[%s6816_s0 + %s5801_s15]]   ;;  %s5805_s15 = smov 27  }
  0x22   :  { %s5964_s13 = sld [smem:[%s6816_s0 + %s5802_s22]]   ;;  %s5806_s22 = smov 28  }
  0x24   :  { %6845 = sst [smem:[#allocation40_spill]] %s5954_s3 }
  0x25   :  { %s5974_s3 = sld [smem:[%s6816_s0 + %s5804_s7]]   ;;  %s5808_s7 = smov 30  }
  0x26   :  { %6844 = sst [smem:[#allocation39_spill]] %s5949_s4 }
  0x27   :  { %6846 = sst [smem:[#allocation41_spill]] %s5959_s21 }
  0x28   :  { %6847 = sst [smem:[#allocation42_spill]] %s5964_s13 }
  0x29   :  { %s5969_s4 = sld [smem:[%s6816_s0 + %s5803_s28]]   ;;  %s5807_s28 = smov 29  }
  0x2a   :  { %s5979_s21 = sld [smem:[%s6816_s0 + %s5805_s15]]   ;;  %s5809_s15 = smov 31  }
  0x2b   :  { %6849 = sst [smem:[#allocation44_spill]] %s5974_s3 }
  0x2c   :  { %s5984_s13 = sld [smem:[%s6816_s0 + %s5806_s22]]   ;;  %s5810_s22 = smov 32  }
  0x2d   :  { %s5994_s3 = sld [smem:[%s6816_s0 + %s5808_s7]]  }
  0x2f   :  { %6848 = sst [smem:[#allocation43_spill]] %s5969_s4 }
  0x30   :  { %6850 = sst [smem:[#allocation45_spill]] %s5979_s21 }
  0x31   :  { %s5989_s4 = sld [smem:[%s6816_s0 + %s5807_s28]]  }
  0x32   :  { %6851 = sst [smem:[#allocation46_spill]] %s5984_s13 }
  0x33   :  { %s5999_s21 = sld [smem:[%s6816_s0 + %s5809_s15]]  }
  0x34   :  { %s4085_s13 = sld [smem:[%s6816_s0 + %s5810_s22]]  }
  0x37   :  { %6852 = sst [smem:[#allocation47_spill]] %s5989_s4 }
  0x38   :  { %s6007_s4 = sld [smem:[%s6816_s0 + %s5811_s1]]  }
  0x3a   :  { %v72_v0 = vstv %s4085_s13 }
  0x3b   :  { %73 = vst [vmem:[#allocation2] sm:$0x1] %v72_v0 }
  0x3c   :  { %74 = vsyncpa [#allocation4], 0 }
  0x3d   :  { %75 = vsyncpa [#allocation6], 0 }
  0x3e   :  { %76 = vsyncpa [#allocation9], 0 }
  0x3f   :  { %77 = vsyncpa [#allocation12], 0 }
  0x40   :  { %78 = vsyncpa [#allocation15], 0 }
  0x41   :  { %79 = vsyncpa [#allocation18], 0 }
  0x42   :  { %80 = vsyncpa [#allocation21], 0  ;;  %s6009_s7 = smov 0  }
  0x43 LB: > { %s6853_s8 = sld [smem:[#allocation34_spill]]  ;;  %s6854_s6 = sld [smem:[#allocation37_spill]]  ;;  %s5777_s7 = sphi %s6009_s7, %s86_s7  }
  0x44   : > { %s5812_s0 = smov [#allocation5]   ;;  %s6015_s10 = sadd.s32 4294967295, %s5777_s7  }
  0x45   : > { %s849_s13 = sshll.u32 %s5812_s0, 4  ;;  %p4089_p0 = scmp.ge.s32.totalorder %s5777_s7, 1  ;;  %s6020_s13 = int_to_ptr.vmem [resolvable:$true] %s849_s13 }
  0x46   : > { %p820_p1 = scmp.lt.s32.totalorder %s5777_s7, 3  ;;  %p6827_p2 = scmp.eq.s32.totalorder %s6015_s10, 0 }
  0x47   : > { %s5813_s16 = smov [#allocation8]   ;;  %s5814_s22 = smov [#allocation11]  }
  0x48   : > { %p6022_p3 = pnand %p4089_p0, %p820_p1  ;;  %s878_s18 = sshll.u32 %s5813_s16, 4  ;;  %s6034_s18 = int_to_ptr.vmem [resolvable:$true] %s878_s18 }
  0x49   : > { %s907_s23 = sshll.u32 %s5814_s22, 4  ;;  %s5379_s26 = scalar_lea.hbm %s5869_s25, 128  ;;  %s6036_s23 = int_to_ptr.vmem [resolvable:$true] %s907_s23 }
  0x4a   : > { %s6855_s11 = scalar_select %p6022_p3, 1, 0 }
  0x4b   : > { %p5196_p4 = pneg %p6022_p3  ;;  %p5380_p6 = scmp.ne.s32.totalorder %s5869_s25, %s5379_s26 }
  0x4c   : > { %p5386_p10 = scmp.lt.u32.totalorder %s5379_s26, %s5869_s25 }
  0x4d   : > { %p6030_p5 = pnand %p6827_p2, %p5196_p4 }
  0x4f   : > { %p6042_p7 = pneg %p6030_p5 }
  0x51   : > { %p5382_p8 = pnand %p6042_p7, %p5380_p6 }
  0x53   : > { %p5383_p9 = pneg %p5382_p8 }
  0x55   : > { %p5388_p11 = pnand %p5386_p10, %p5383_p9 }
  0x57   : > { %5391 = shalt.err (!%p5388_p11)
}
  0x58   : > { %s5392_s28 = scalar_lea.vmem %s6020_s13, 128  ;;  %p5400_p1 = scmp.lt.s32.totalorder %s6020_s13, %s6020_s13 }
  0x59   : > { %p5393_p12 = scmp.ne.s32.totalorder %s6020_s13, %s5392_s28  ;;  %p5401_p4 = scmp.lt.s32.totalorder %s5392_s28, %s5392_s28 }
  0x5b   : > { %p5395_p13 = pnand %p5393_p12, %p6042_p7  ;;  %p5402_p2 = por %p5401_p4, %p5400_p1 }
  0x5d   : > { %p5396_p0 = pneg %p5395_p13 }
  0x5f   : > { %p5403_p3 = pnand %p5402_p2, %p5396_p0 }
  0x61   : > { %5406 = shalt.err (!%p5403_p3)
}
  0x62   : > { %s5815_s2 = smov 64   ;;  %s5816_s0 = smov 4  }
  0x63   : > { %5202 = dma.hbm_to_vmem [thread:$0]  (!%p6030_p5), %s5869_s25, 128, %s6020_s13, [#allocation6], %s5815_s2, %s5815_s2, %s5816_s0  }
  0x64   : > { %s5407_s16 = scalar_lea.hbm %s6853_s8, 32 }
  0x65   : > { %p5408_p6 = scmp.ne.s32.totalorder %s6853_s8, %s5407_s16  ;;  %p5414_p10 = scmp.lt.u32.totalorder %s5407_s16, %s6853_s8 }
  0x67   : > { %p5410_p8 = pnand %p5408_p6, %p6042_p7 }
  0x69   : > { %p5411_p9 = pneg %p5410_p8 }
  0x6b   : > { %p5416_p11 = pnand %p5414_p10, %p5411_p9 }
  0x6d   : > { %5419 = shalt.err (!%p5416_p11)
}
  0x6e   : > { %s5420_s22 = scalar_lea.vmem %s6034_s18, 32  ;;  %p5428_p13 = scmp.lt.s32.totalorder %s6034_s18, %s6034_s18 }
  0x6f   : > { %p5421_p2 = scmp.ne.s32.totalorder %s6034_s18, %s5420_s22  ;;  %p5429_p0 = scmp.lt.s32.totalorder %s5420_s22, %s5420_s22 }
  0x71   : > { %p5423_p3 = pnand %p5421_p2, %p6042_p7  ;;  %p5430_p1 = por %p5429_p0, %p5428_p13 }
  0x73   : > { %p5424_p12 = pneg %p5423_p3 }
  0x75   : > { %p5431_p4 = pnand %p5430_p1, %p5424_p12 }
  0x77   : > { %5434 = shalt.err (!%p5431_p4)
}
  0x78   : > { %s6829_s13 = smov 16   ;;  %s6831_s26 = smov 1  }
  0x79   : > { %5208 = dma.hbm_to_vmem [thread:$0]  (!%p6030_p5), %s6853_s8, 32, %s6034_s18, [#allocation9], %s6829_s13, %s6829_s13, %s6831_s26  }
  0x7a   : > { %s5435_s28 = scalar_lea.hbm %s5899_s24, 32 }
  0x7b   : > { %p5436_p6 = scmp.ne.s32.totalorder %s5899_s24, %s5435_s28  ;;  %p5442_p10 = scmp.lt.u32.totalorder %s5435_s28, %s5899_s24 }
  0x7d   : > { %p5438_p8 = pnand %p5436_p6, %p6042_p7 }
  0x7f   : > { %p5439_p9 = pneg %p5438_p8 }
  0x81   : > { %p5444_p11 = pnand %p5442_p10, %p5439_p9 }
  0x83   : > { %5447 = shalt.err (!%p5444_p11)
}
  0x84   : > { %s5448_s2 = scalar_lea.vmem %s6036_s23, 32  ;;  %p5456_p13 = scmp.lt.s32.totalorder %s6036_s23, %s6036_s23 }
  0x85   : > { %p5449_p2 = scmp.ne.s32.totalorder %s6036_s23, %s5448_s2  ;;  %p5457_p0 = scmp.lt.s32.totalorder %s5448_s2, %s5448_s2 }
  0x87   : > { %p5451_p3 = pnand %p5449_p2, %p6042_p7  ;;  %p5458_p1 = por %p5457_p0, %p5456_p13 }
  0x89   : > { %p5452_p12 = pneg %p5451_p3 }
  0x8b   : > { %p5459_p4 = pnand %p5458_p1, %p5452_p12 }
  0x8d   : > { %5462 = shalt.err (!%p5459_p4)
}
  0x8e   : > { %5214 = dma.hbm_to_vmem [thread:$0]  (!%p6030_p5), %s5899_s24, 32, %s6036_s23, [#allocation12], %s6829_s13, %s6829_s13, %s6831_s26  }
  0x8f   : > { %s5819_s18 = smov [#allocation14]   ;;  %s5820_s16 = smov [#allocation17]  }
  0x90   : > { %s936_s0 = sshll.u32 %s5819_s18, 4  ;;  %s962_s22 = sshll.u32 %s5820_s16, 4  ;;  %s937_s0 = int_to_ptr.vmem [resolvable:$true] %s936_s0  ;;  %s6095_s22 = int_to_ptr.vmem [resolvable:$true] %s962_s22 }
  0x91   : > { %s5463_s28 = scalar_lea.hbm %s5914_s12, 32 }
  0x92   : > { %p5464_p6 = scmp.ne.s32.totalorder %s5914_s12, %s5463_s28  ;;  %p5470_p10 = scmp.lt.u32.totalorder %s5463_s28, %s5914_s12 }
  0x94   : > { %p5466_p8 = pnand %p5464_p6, %p6042_p7 }
  0x96   : > { %p5467_p9 = pneg %p5466_p8 }
  0x98   : > { %p5472_p11 = pnand %p5470_p10, %p5467_p9 }
  0x9a   : > { %5475 = shalt.err (!%p5472_p11)
}
  0x9b   : > { %s5476_s2 = scalar_lea.vmem %s937_s0, 32  ;;  %p5484_p13 = scmp.lt.s32.totalorder %s937_s0, %s937_s0 }
  0x9c   : > { %p5477_p2 = scmp.ne.s32.totalorder %s937_s0, %s5476_s2  ;;  %p5485_p0 = scmp.lt.s32.totalorder %s5476_s2, %s5476_s2 }
  0x9e   : > { %p5479_p3 = pnand %p5477_p2, %p6042_p7  ;;  %p5486_p1 = por %p5485_p0, %p5484_p13 }
  0xa0   : > { %p5480_p12 = pneg %p5479_p3 }
  0xa2   : > { %p5487_p4 = pnand %p5486_p1, %p5480_p12 }
  0xa4   : > { %5490 = shalt.err (!%p5487_p4)
}
  0xa5   : > { %5220 = dma.hbm_to_vmem [thread:$0]  (!%p6030_p5), %s5914_s12, 32, %s937_s0, [#allocation15], %s6829_s13, %s6829_s13, %s6831_s26  }
  0xa6   : > { %s5491_s23 = scalar_lea.hbm %s5924_s27, 32 }
  0xa7   : > { %p5492_p6 = scmp.ne.s32.totalorder %s5924_s27, %s5491_s23  ;;  %p5498_p10 = scmp.lt.u32.totalorder %s5491_s23, %s5924_s27 }
  0xa9   : > { %p5494_p8 = pnand %p5492_p6, %p6042_p7 }
  0xab   : > { %p5495_p9 = pneg %p5494_p8 }
  0xad   : > { %p5500_p11 = pnand %p5498_p10, %p5495_p9 }
  0xaf   : > { %5503 = shalt.err (!%p5500_p11)
}
  0xb0   : > { %s5504_s18 = scalar_lea.vmem %s6095_s22, 32  ;;  %p5512_p13 = scmp.lt.s32.totalorder %s6095_s22, %s6095_s22 }
  0xb1   : > { %p5505_p2 = scmp.ne.s32.totalorder %s6095_s22, %s5504_s18  ;;  %p5513_p0 = scmp.lt.s32.totalorder %s5504_s18, %s5504_s18 }
  0xb3   : > { %p5507_p3 = pnand %p5505_p2, %p6042_p7  ;;  %p5514_p1 = por %p5513_p0, %p5512_p13 }
  0xb5   : > { %p5508_p12 = pneg %p5507_p3 }
  0xb7   : > { %p5515_p4 = pnand %p5514_p1, %p5508_p12 }
  0xb9   : > { %5518 = shalt.err (!%p5515_p4)
}
  0xba   : > { %5226 = dma.hbm_to_vmem [thread:$0]  (!%p6030_p5), %s5924_s27, 32, %s6095_s22, [#allocation18], %s6829_s13, %s6829_s13, %s6831_s26  }
  0xbb   : > { %s5821_s0 = smov [#allocation20]   ;;  %s5822_s28 = smov [#allocation3]  }
  0xbc   : > { %s991_s16 = sshll.u32 %s5821_s0, 4  ;;  %s836_s2 = sshll.u32 %s5822_s28, 4  ;;  %s992_s16 = int_to_ptr.vmem [resolvable:$true] %s991_s16  ;;  %s6128_s2 = int_to_ptr.vmem [resolvable:$true] %s836_s2 }
  0xbd   : > { %s5519_s23 = scalar_lea.hbm %s5939_s30, 32 }
  0xbe   : > { %p5520_p6 = scmp.ne.s32.totalorder %s5939_s30, %s5519_s23  ;;  %p5526_p10 = scmp.lt.u32.totalorder %s5519_s23, %s5939_s30 }
  0xc0   : > { %p5522_p8 = pnand %p5520_p6, %p6042_p7 }
  0xc2   : > { %p5523_p9 = pneg %p5522_p8 }
  0xc4   : > { %p5528_p11 = pnand %p5526_p10, %p5523_p9 }
  0xc6   : > { %5531 = shalt.err (!%p5528_p11)
}
  0xc7   : > { %s5532_s18 = scalar_lea.vmem %s992_s16, 32  ;;  %p5540_p13 = scmp.lt.s32.totalorder %s992_s16, %s992_s16 }
  0xc8   : > { %p5533_p2 = scmp.ne.s32.totalorder %s992_s16, %s5532_s18  ;;  %p5541_p0 = scmp.lt.s32.totalorder %s5532_s18, %s5532_s18 }
  0xca   : > { %p5535_p3 = pnand %p5533_p2, %p6042_p7  ;;  %p5542_p1 = por %p5541_p0, %p5540_p13 }
  0xcc   : > { %p5536_p12 = pneg %p5535_p3 }
  0xce   : > { %p5543_p4 = pnand %p5542_p1, %p5536_p12 }
  0xd0   : > { %5546 = shalt.err (!%p5543_p4)
}
  0xd1   : > { %5232 = dma.hbm_to_vmem [thread:$0]  (!%p6030_p5), %s5939_s30, 32, %s992_s16, [#allocation21], %s6829_s13, %s6829_s13, %s6831_s26  }
  0xd2   : > { %s5547_s22 = scalar_lea.hbm %s5859_s17, 16 }
  0xd3   : > { %p5548_p6 = scmp.ne.s32.totalorder %s5859_s17, %s5547_s22  ;;  %p5554_p10 = scmp.lt.u32.totalorder %s5547_s22, %s5859_s17 }
  0xd5   : > { %p5550_p8 = pnand %p5548_p6, %p6042_p7 }
  0xd7   : > { %p5551_p9 = pneg %p5550_p8 }
  0xd9   : > { %p5556_p11 = pnand %p5554_p10, %p5551_p9 }
  0xdb   : > { %5559 = shalt.err (!%p5556_p11)
}
  0xdc   : > { %s5560_s0 = scalar_lea.vmem %s6128_s2, 16  ;;  %s5567_s28 = scalar_lea.vmem %s6128_s2, 32 }
  0xdd   : > { %p5561_p2 = scmp.ne.s32.totalorder %s6128_s2, %s5560_s0  ;;  %p5568_p13 = scmp.lt.s32.totalorder %s6128_s2, %s6128_s2 }
  0xde   : > { %p5569_p0 = scmp.lt.s32.totalorder %s5567_s28, %s5560_s0 }
  0xdf   : > { %p5563_p3 = pnand %p5561_p2, %p6042_p7 }
  0xe0   : > { %p5570_p1 = por %p5569_p0, %p5568_p13 }
  0xe1   : > { %p5564_p12 = pneg %p5563_p3 }
  0xe3   : > { %p5571_p4 = pnand %p5570_p1, %p5564_p12 }
  0xe5   : > { %5574 = shalt.err (!%p5571_p4)
}
  0xe6   : > { %5199 = dma.hbm_to_vmem [thread:$0]  (!%p6030_p5), %s5859_s17, 16, %s6128_s2, [#allocation4]  }
  0xe7   : > { %s5823_s16 = smov [#allocation7]   ;;  %s5824_s18 = smov [#allocation10]  }
  0xe8   : > { %s862_s23 = sshll.u32 %s5823_s16, 4  ;;  %s894_s22 = sshll.u32 %s5824_s18, 4  ;;  %s863_s23 = int_to_ptr.vmem [resolvable:$true] %s862_s23  ;;  %s6159_s22 = int_to_ptr.vmem [resolvable:$true] %s894_s22 }
  0xe9   : > { %s5575_s0 = scalar_lea.hbm %s5874_s29, 32 }
  0xea   : > { %p5576_p6 = scmp.ne.s32.totalorder %s5874_s29, %s5575_s0  ;;  %p5582_p10 = scmp.lt.u32.totalorder %s5575_s0, %s5874_s29 }
  0xec   : > { %p5578_p8 = pnand %p5576_p6, %p6042_p7 }
  0xee   : > { %p5579_p9 = pneg %p5578_p8 }
  0xf0   : > { %p5584_p11 = pnand %p5582_p10, %p5579_p9 }
  0xf2   : > { %5587 = shalt.err (!%p5584_p11)
}
  0xf3   : > { %s5588_s28 = scalar_lea.vmem %s863_s23, 32  ;;  %p5596_p13 = scmp.lt.s32.totalorder %s863_s23, %s863_s23 }
  0xf4   : > { %p5589_p2 = scmp.ne.s32.totalorder %s863_s23, %s5588_s28  ;;  %p5597_p0 = scmp.lt.s32.totalorder %s5588_s28, %s5588_s28 }
  0xf6   : > { %p5591_p3 = pnand %p5589_p2, %p6042_p7  ;;  %p5598_p1 = por %p5597_p0, %p5596_p13 }
  0xf8   : > { %p5592_p12 = pneg %p5591_p3 }
  0xfa   : > { %p5599_p4 = pnand %p5598_p1, %p5592_p12 }
  0xfc   : > { %5602 = shalt.err (!%p5599_p4)
}
  0xfd   : > { %5205 = dma.hbm_to_vmem [thread:$0]  (!%p6030_p5), %s5874_s29, 32, %s863_s23, [#allocation6], %s6829_s13, %s6829_s13, %s6831_s26  }
  0xfe   : > { %s5603_s2 = scalar_lea.hbm %s5894_s19, 256 }
  0xff   : > { %p5604_p6 = scmp.ne.s32.totalorder %s5894_s19, %s5603_s2  ;;  %p5610_p10 = scmp.lt.u32.totalorder %s5603_s2, %s5894_s19 }
 0x101   : > { %p5606_p8 = pnand %p5604_p6, %p6042_p7 }
 0x103   : > { %p5607_p9 = pneg %p5606_p8 }
 0x105   : > { %p5612_p11 = pnand %p5610_p10, %p5607_p9 }
 0x107   : > { %5615 = shalt.err (!%p5612_p11)
}
 0x108   : > { %s5616_s16 = scalar_lea.vmem %s6159_s22, 256  ;;  %p5624_p13 = scmp.lt.s32.totalorder %s6159_s22, %s6159_s22 }
 0x109   : > { %p5617_p2 = scmp.ne.s32.totalorder %s6159_s22, %s5616_s16  ;;  %p5625_p0 = scmp.lt.s32.totalorder %s5616_s16, %s5616_s16 }
 0x10b   : > { %p5619_p3 = pnand %p5617_p2, %p6042_p7  ;;  %p5626_p1 = por %p5625_p0, %p5624_p13 }
 0x10d   : > { %p5620_p12 = pneg %p5619_p3 }
 0x10f   : > { %p5627_p4 = pnand %p5626_p1, %p5620_p12 }
 0x111   : > { %5630 = shalt.err (!%p5627_p4)
}
 0x112   : > { %s5825_s23 = smov 128   ;;  %s5826_s18 = smov 8  }
 0x113   : > { %5211 = dma.hbm_to_vmem [thread:$0]  (!%p6030_p5), %s5894_s19, 256, %s6159_s22, [#allocation9], %s5825_s23, %s5825_s23, %s5826_s18  }
 0x114   : > { %s5827_s0 = smov [#allocation13]   ;;  %s5828_s2 = smov [#allocation16]  }
 0x115   : > { %s923_s28 = sshll.u32 %s5827_s0, 4  ;;  %s949_s16 = sshll.u32 %s5828_s2, 4  ;;  %s924_s28 = int_to_ptr.vmem [resolvable:$true] %s923_s28  ;;  %s6192_s16 = int_to_ptr.vmem [resolvable:$true] %s949_s16 }
 0x116   : > { %s5631_s13 = scalar_lea.hbm %s6854_s6, 32 }
 0x117   : > { %p5632_p6 = scmp.ne.s32.totalorder %s6854_s6, %s5631_s13  ;;  %p5638_p10 = scmp.lt.u32.totalorder %s5631_s13, %s6854_s6 }
 0x119   : > { %p5634_p8 = pnand %p5632_p6, %p6042_p7 }
 0x11b   : > { %p5635_p9 = pneg %p5634_p8 }
 0x11d   : > { %p5640_p11 = pnand %p5638_p10, %p5635_p9 }
 0x11f   : > { %5643 = shalt.err (!%p5640_p11)
}
 0x120   : > { %s5644_s26 = scalar_lea.vmem %s924_s28, 32  ;;  %p5652_p13 = scmp.lt.s32.totalorder %s924_s28, %s924_s28 }
 0x121   : > { %p5645_p2 = scmp.ne.s32.totalorder %s924_s28, %s5644_s26  ;;  %p5653_p0 = scmp.lt.s32.totalorder %s5644_s26, %s5644_s26 }
 0x123   : > { %p5647_p3 = pnand %p5645_p2, %p6042_p7  ;;  %p5654_p1 = por %p5653_p0, %p5652_p13 }
 0x125   : > { %p5648_p12 = pneg %p5647_p3 }
 0x127   : > { %p5655_p4 = pnand %p5654_p1, %p5648_p12 }
 0x129   : > { %5658 = shalt.err (!%p5655_p4)
}
 0x12a   : > { %s6858_s22 = smov 1   ;;  %s6859_s0 = smov 16  }
 0x12b   : > { %5217 = dma.hbm_to_vmem [thread:$0]  (!%p6030_p5), %s6854_s6, 32, %s924_s28, [#allocation12], %s6859_s0, %s6859_s0, %s6858_s22  }
 0x12c   : > { %s5659_s13 = scalar_lea.hbm %s5919_s20, 1024 }
 0x12d   : > { %p5660_p6 = scmp.ne.s32.totalorder %s5919_s20, %s5659_s13  ;;  %p5666_p10 = scmp.lt.u32.totalorder %s5659_s13, %s5919_s20 }
 0x12f   : > { %p5662_p8 = pnand %p5660_p6, %p6042_p7 }
 0x131   : > { %p5663_p9 = pneg %p5662_p8 }
 0x133   : > { %p5668_p11 = pnand %p5666_p10, %p5663_p9 }
 0x135   : > { %5671 = shalt.err (!%p5668_p11)
}
 0x136   : > { %s5672_s26 = scalar_lea.vmem %s6192_s16, 1024  ;;  %p5680_p13 = scmp.lt.s32.totalorder %s6192_s16, %s6192_s16 }
 0x137   : > { %p5673_p2 = scmp.ne.s32.totalorder %s6192_s16, %s5672_s26  ;;  %p5681_p0 = scmp.lt.s32.totalorder %s5672_s26, %s5672_s26 }
 0x139   : > { %p5675_p3 = pnand %p5673_p2, %p6042_p7  ;;  %p5682_p1 = por %p5681_p0, %p5680_p13 }
 0x13b   : > { %p5676_p12 = pneg %p5675_p3 }
 0x13d   : > { %p5683_p4 = pnand %p5682_p1, %p5676_p12 }
 0x13f   : > { %5686 = shalt.err (!%p5683_p4)
}
 0x140   : > { %5223 = dma.hbm_to_vmem [thread:$0]  (!%p6030_p5), %s5919_s20, 1024, %s6192_s16, [#allocation15], %s5825_s23, %s5825_s23, %s5826_s18  }
 0x141   : > { %s5829_s28 = smov [#allocation19]   ;;  %s5830_s13 = smov [#allocation22]  }
 0x142   : > { %s978_s2 = sshll.u32 %s5829_s28, 4  ;;  %s1004_s6 = sshll.u32 %s5830_s13, 4  ;;  %s979_s2 = int_to_ptr.vmem [resolvable:$true] %s978_s2  ;;  %s6225_s6 = int_to_ptr.vmem [resolvable:$true] %s1004_s6 }
 0x143   : > { %s5687_s26 = scalar_lea.hbm %s5934_s9, 32 }
 0x144   : > { %p5688_p6 = scmp.ne.s32.totalorder %s5934_s9, %s5687_s26  ;;  %p5694_p10 = scmp.lt.u32.totalorder %s5687_s26, %s5934_s9 }
 0x146   : > { %p5690_p8 = pnand %p5688_p6, %p6042_p7 }
 0x148   : > { %p5691_p9 = pneg %p5690_p8 }
 0x14a   : > { %p5696_p11 = pnand %p5694_p10, %p5691_p9 }
 0x14c   : > { %5699 = shalt.err (!%p5696_p11)
}
 0x14d   : > { %s5700_s8 = scalar_lea.vmem %s979_s2, 32  ;;  %p5708_p13 = scmp.lt.s32.totalorder %s979_s2, %s979_s2 }
 0x14e   : > { %p5701_p2 = scmp.ne.s32.totalorder %s979_s2, %s5700_s8  ;;  %p5709_p0 = scmp.lt.s32.totalorder %s5700_s8, %s5700_s8 }
 0x150   : > { %p5703_p3 = pnand %p5701_p2, %p6042_p7  ;;  %p5710_p1 = por %p5709_p0, %p5708_p13 }
 0x152   : > { %p5704_p12 = pneg %p5703_p3 }
 0x154   : > { %p5711_p4 = pnand %p5710_p1, %p5704_p12 }
 0x156   : > { %5714 = shalt.err (!%p5711_p4)
}
 0x157   : > { %5229 = dma.hbm_to_vmem [thread:$0]  (!%p6030_p5), %s5934_s9, 32, %s979_s2, [#allocation18], %s6859_s0, %s6859_s0, %s6858_s22  }
 0x158   : > { %s5715_s23 = scalar_lea.hbm %s5944_s14, 32 }
 0x159   : > { %p5716_p6 = scmp.ne.s32.totalorder %s5944_s14, %s5715_s23  ;;  %p5722_p10 = scmp.lt.u32.totalorder %s5715_s23, %s5944_s14 }
 0x15b   : > { %p5718_p8 = pnand %p5716_p6, %p6042_p7 }
 0x15d   : > { %p5719_p9 = pneg %p5718_p8 }
 0x15f   : > { %p5724_p11 = pnand %p5722_p10, %p5719_p9 }
 0x161   : > { %5727 = shalt.err (!%p5724_p11)
}
 0x162   : > { %s5728_s8 = scalar_lea.vmem %s6225_s6, 32  ;;  %p5736_p13 = scmp.lt.s32.totalorder %s6225_s6, %s6225_s6 }
 0x163   : > { %p5729_p2 = scmp.ne.s32.totalorder %s6225_s6, %s5728_s8  ;;  %p5737_p0 = scmp.lt.s32.totalorder %s5728_s8, %s5728_s8 }
 0x165   : > { %p5731_p3 = pnand %p5729_p2, %p6042_p7  ;;  %p5738_p1 = por %p5737_p0, %p5736_p13 }
 0x167   : > { %p5732_p12 = pneg %p5731_p3 }
 0x169   : > { %p5739_p4 = pnand %p5738_p1, %p5732_p12 }
 0x16b   : > { %5742 = shalt.err (!%p5739_p4)
}
 0x16c   : > { %5235 = dma.hbm_to_vmem [thread:$0]  (!%p6030_p5), %s5944_s14, 32, %s6225_s6, [#allocation21], %s6859_s0, %s6859_s0, %s6858_s22  }
 0x16d   : > { %p6860_p6 = scmp.ne.s32.totalorder %s6855_s11, 0 }
 0x16e   : > { %p6861_p7 = scmp.eq.s32.totalorder (!%p6860_p6), %s6015_s10, 0 }
 0x16f   : > { %1071 = sbr.rel (%p6860_p6) target bundleno = 6299 (0x189b), region = 152 }
 0x176   : > { %5748 = dma.done.wait (%p6861_p7), [#allocation4], 16   ;;  %p6862_p8 = pmov %p6861_p7 }
 0x177   : > { %p6863_p9 = pmov %p6861_p7 }
 0x178   : > { %5750 = vsyncadd (%p6862_p8), [#allocation4], 4294967280 }
 0x179   : > { %5752 = dma.done.wait (%p6863_p9), [#allocation6], 160   ;;  %p6864_p10 = pmov %p6861_p7 }
 0x17a   : > { %p6865_p11 = pmov %p6861_p7 }
 0x17b   : > { %5754 = vsyncadd (%p6864_p10), [#allocation6], 4294967136 }
 0x17c   : > { %5756 = dma.done.wait (%p6865_p11), [#allocation9], 288   ;;  %p6866_p5 = pmov %p6861_p7 }
 0x17e   : > { %5758 = vsyncadd (%p6866_p5), [#allocation9], 4294967008  ;;  %p6867_p2 = pmov %p6866_p5 }
 0x180   : > { %5760 = dma.done.wait (%p6867_p2), [#allocation12], 64   ;;  %p6868_p3 = pmov %p6867_p2 }
 0x181   : > { %p6869_p12 = pmov %p6867_p2 }
 0x182   : > { %5762 = vsyncadd (%p6868_p3), [#allocation12], 4294967232 }
 0x183   : > { %5764 = dma.done.wait (%p6869_p12), [#allocation15], 1056   ;;  %p6870_p13 = pmov %p6867_p2 }
 0x184   : > { %p6871_p0 = pmov %p6867_p2 }
 0x185   : > { %5766 = vsyncadd (%p6870_p13), [#allocation15], 4294966240 }
 0x186   : > { %5768 = dma.done.wait (%p6871_p0), [#allocation18], 64   ;;  %p6872_p1 = pmov %p6871_p0 }
 0x187   : > { %p6873_p4 = pmov %p6871_p0 }
 0x188   : > { %5770 = vsyncadd (%p6872_p1), [#allocation18], 4294967232 }
 0x189   : > { %5772 = dma.done.wait (%p6873_p4), [#allocation21], 64   ;;  %p6874_p6 = pmov %p6871_p0 }
 0x18a   : > { %s6875_s6 = sld [smem:[#allocation31_spill]]  ;;  %p1205_p7 = scmp.lt.s32.totalorder %s6015_s10, 1  ;;  %vm1218_vm0 = vcmask 125952   ;;  %v5831_v10 = vmov 0.0|0.0   ;;  %vm5832_vm1 = vmmov 0   ;;  %v5833_v12 = vmov 0.0  }
 0x18b   : > { %5774 = vsyncadd (%p6874_p6), [#allocation21], 4294967232  ;;  %s6876_s1 = sld [smem:[#allocation32_spill]]  ;;  %4819 = vmatprep.subr.bf16.mxu0 %v5831_v10  ;;  %4465 = vmatprep.mubr.msk.f32.mxu0 %vm5832_vm1, %v5833_v12  ;;  %vm1242_vm2 = vcmask 130048   ;;  %s6877_s18 = sld [smem:[#allocation33_spill]]  ;;  %vm1324_vm3 = vcmask 261120  }
 0x18c   : > { %s6892_s10 = smov (!%p1205_p7, %s6015_s10), 1  ;;  %1392 = vmatprep.mubr.f32.mxu1 %v5833_v12  ;;  %s6878_s16 = sld [smem:[#allocation35_spill]]  ;;  %v4121_v30 = vld [vmem:[#allocation3] ss:$0 sm:$0xff]  ;;  %vm1408_vm4 = vcmask 1040384   ;;  %vm1410_vm5 = vcmask 1041408  }
 0x18d   : > { %s4118_s11 = sshll.u32 %s6892_s10, 2  ;;  %vm1412_vm6 = vcmask 1042432   ;;  %vm1414_vm7 = vcmask 523264   ;;  %s6879_s22 = sld [smem:[#allocation36_spill]]  ;;  %vm2005_vm8 = vcmask 257024   ;;  %vm3286_vm9 = vcmask 64512  }
 0x18e   : > { %s1208_s15 = scalar_lea.vmem %s5844_s5, %s4118_s11  ;;  %s6880_s0 = sld [smem:[#allocation38_spill]]  ;;  %vm3336_vm10 = vcmask 195584   ;;  %vm3867_vm11 = vcmask 0  }
 0x18f   : > { %v1217_v1 = vld [vmem:[%s1208_s15] sm:$0xf]  ;;  %s6881_s28 = sld [smem:[#allocation41_spill]]  ;;  %s6882_s2 = sld [smem:[#allocation39_spill]] }
 0x190   : > { %v1219_v2 = vsel %vm1218_vm0, %v1217_v1, 0.0  ;;  %v1233_v8 = vld [vmem:[%s6875_s6] sm:$0xff]  ;;  %v1234_v9 = vld [vmem:[%s6875_s6 + $0x8] sm:$0xff]  ;;  %s6883_s13 = sld [smem:[#allocation40_spill]]  ;;  %s6884_s26 = sld [smem:[#allocation43_spill]] }
 0x191   : > { %1220 = vadd.xlane.f32.xlu0 %v1219_v2  ;;  %v4820_v11 = vpack.c.bf16 %v1234_v9, %v1233_v8  ;;  %v1317_v13 = vld [vmem:[%s6876_s1 + $0x8] sm:$0xff]  ;;  %v1319_v14 = vld [vmem:[%s6876_s1 + $0x18] sm:$0xff]  ;;  %v1316_v15 = vld [vmem:[%s6876_s1] sm:$0xff]  ;;  %s6885_s23 = sld [smem:[#allocation45_spill]]  ;;  %s6886_s8 = sld [smem:[#allocation42_spill]] }
 0x192   : > { %v4822_v16 = vpack.c.bf16 %v1319_v14, %v1317_v13  ;;  %v1318_v17 = vld [vmem:[%s6876_s1 + $0x10] sm:$0xff]  ;;  %v1321_v18 = vld [vmem:[%s6876_s1 + $0x28] sm:$0xff]  ;;  %v1323_v19 = vld [vmem:[%s6876_s1 + $0x38] sm:$0xff]  ;;  %s6887_s11 = sld [smem:[#allocation30_spill]]  ;;  %s5835_s15 = smov 8  }
 0x193   : > { %4821 = vmatpush3.bf16.msra.mxu0 %v4820_v11  ;;  %v4824_v20 = vpack.c.bf16 %v1318_v17, %v1316_v15  ;;  %v4826_v21 = vpack.c.bf16 %v1323_v19, %v1321_v18  ;;  %v1320_v27 = vld [vmem:[%s6876_s1 + $0x20] sm:$0xff]  ;;  %v1322_v28 = vld [vmem:[%s6876_s1 + $0x30] sm:$0xff]  ;;  %v1469_v35 = vld [vmem:[%s6877_s18 + $0x8] sm:$0xff] }
 0x194   : > { %4830 = vmatprep.subr.bf16.mxu0 %v5831_v10  ;;  %4823 = vmatprep.subr.bf16.mxu1 %v4822_v16  ;;  %v4828_v29 = vpack.c.bf16 %v1322_v28, %v1320_v27  ;;  %v1468_v34 = vld [vmem:[%s6877_s18] sm:$0xff]  ;;  %v1571_v38 = vld [vmem:[%s6878_s16 + $0x8] sm:$0xff]  ;;  %v1470_v40 = vld [vmem:[%s6877_s18 + $0x10] sm:$0xff] }
 0x195   : > { %4825 = vmatpush1.bf16.msra.mxu1 %v4824_v20  ;;  %v1570_v36 = vld [vmem:[%s6878_s16] sm:$0xff]  ;;  %v4831_v37 = vpack.c.bf16 %v1469_v35, %v1468_v34  ;;  %v1471_v41 = vld [vmem:[%s6877_s18 + $0x18] sm:$0xff]  ;;  %v1572_v42 = vld [vmem:[%s6878_s16 + $0x10] sm:$0xff]  ;;  %v1421_v20 = vlaneseq }
 0x196   : > { %4827 = vmatprep.subr.bf16.mxu1 %v4826_v21  ;;  %v4855_v39 = vpack.c.bf16 %v1571_v38, %v1570_v36  ;;  %v4834_v43 = vpack.c.bf16 %v1471_v41, %v1470_v40  ;;  %v1573_v44 = vld [vmem:[%s6878_s16 + $0x18] sm:$0xff]  ;;  %v1472_v46 = vld [vmem:[%s6877_s18 + $0x20] sm:$0xff]  ;;  %v1473_v47 = vld [vmem:[%s6877_s18 + $0x28] sm:$0xff] }
 0x197   : > { %v4858_v45 = vpack.c.bf16 %v1573_v44, %v1572_v42  ;;  %v1574_v48 = vld [vmem:[%s6878_s16 + $0x20] sm:$0xff]  ;;  %v4837_v49 = vpack.c.bf16 %v1473_v47, %v1472_v46  ;;  %v1575_v50 = vld [vmem:[%s6878_s16 + $0x28] sm:$0xff]  ;;  %v1474_v52 = vld [vmem:[%s6877_s18 + $0x30] sm:$0xff]  ;;  %v6366_v21 = vshrl.u32 %v1421_v20, 7 }
 0x198   : > { %v4861_v51 = vpack.c.bf16 %v1575_v50, %v1574_v48  ;;  %v1475_v53 = vld [vmem:[%s6877_s18 + $0x38] sm:$0xff]  ;;  %v1576_v54 = vld [vmem:[%s6878_s16 + $0x30] sm:$0xff]  ;;  %v1476_v57 = vld [vmem:[%s6877_s18 + $0x40] sm:$0xff] }
 0x199   : > { %4829 = vmatpush1.bf16.msra.mxu1 %v4828_v29  ;;  %v4840_v55 = vpack.c.bf16 %v1475_v53, %v1474_v52  ;;  %v1577_v56 = vld [vmem:[%s6878_s16 + $0x38] sm:$0xff]  ;;  %v1477_v58 = vld [vmem:[%s6877_s18 + $0x48] sm:$0xff]  ;;  %v1578_v60 = vld [vmem:[%s6878_s16 + $0x40] sm:$0xff]  ;;  %v6371_v27 = vsub.s32 1, %v6366_v21  ;;  %v6374_v28 = vsub.s32 2, %v6366_v21  ;;  %v6379_v34 = vsub.s32 0, %v6366_v21 }
 0x19a   : > { %4854 = vmatprep.subr.bf16.mxu1 %v5831_v10  ;;  %v4864_v59 = vpack.c.bf16 %v1577_v56, %v1576_v54  ;;  %v1579_v61 = vld [vmem:[%s6878_s16 + $0x48] sm:$0xff]  ;;  %v4843_v62 = vpack.c.bf16 %v1477_v58, %v1476_v57  ;;  %v1478_v0 = vld [vmem:[%s6877_s18 + $0x50] sm:$0xff]  ;;  %v1582_v8 = vld [vmem:[%s6878_s16 + $0x60] sm:$0xff]  ;;  %v6382_v35 = vsub.s32 3, %v6366_v21 }
 0x19b   : > { %v4867_v63 = vpack.c.bf16 %v1579_v61, %v1578_v60  ;;  %v1580_v2 = vld [vmem:[%s6878_s16 + $0x50] sm:$0xff]  ;;  %v1583_v9 = vld [vmem:[%s6878_s16 + $0x68] sm:$0xff]  ;;  %v1483_v15 = vld [vmem:[%s6877_s18 + $0x78] sm:$0xff] }
 0x19c   : > { %v4873_v13 = vpack.c.bf16 %v1583_v9, %v1582_v8  ;;  %v1482_v14 = vld [vmem:[%s6877_s18 + $0x70] sm:$0xff]  ;;  %v1585_v17 = vld [vmem:[%s6878_s16 + $0x78] sm:$0xff]  ;;  %v4124_v53 = vld [vmem:[#allocation7] ss:$0 sm:$0xff] }
 0x19d   : > { %v1584_v16 = vld [vmem:[%s6878_s16 + $0x70] sm:$0xff]  ;;  %v4852_v18 = vpack.c.bf16 %v1483_v15, %v1482_v14  ;;  %v1920_v14 = vld [vmem:[%s6879_s22 + $0x20] sm:$0xff]  ;;  %v1921_v15 = vld [vmem:[%s6879_s22 + $0x28] sm:$0xff] }
 0x19e   : > { %v4876_v19 = vpack.c.bf16 %v1585_v17, %v1584_v16  ;;  %v1918_v9 = vld [vmem:[%s6879_s22 + $0x10] sm:$0xff]  ;;  %v4885_v16 = vpack.c.bf16 %v1921_v15, %v1920_v14  ;;  %v1924_v20 = vld [vmem:[%s6879_s22 + $0x40] sm:$0xff] }
 0x19f   : > { %v1922_v17 = vld [vmem:[%s6879_s22 + $0x30] sm:$0xff] }
 0x21e   : > { %v1221_v3 = vpop.xlane.xlu0 %1220 }
 0x21f   : > { %v1223_v4 = vmul.f32 0.0625, %v1221_v3  ;;  %v1581_v3 = vld [vmem:[%s6878_s16 + $0x58] sm:$0xff] }
 0x221   : > { %v1224_v5 = vsub.f32 %v1217_v1, %v1223_v4  ;;  %v1479_v1 = vld [vmem:[%s6877_s18 + $0x58] sm:$0xff] }
 0x222   : > { %v4846_v4 = vpack.c.bf16 %v1479_v1, %v1478_v0 }
 0x223   : > { %v1225_v6 = vmul.f32 %v1224_v5, %v1224_v5 }
 0x225   : > { %v1226_v7 = vsel %vm1218_vm0, %v1225_v6, 0.0  ;;  %v1480_v6 = vld [vmem:[%s6877_s18 + $0x60] sm:$0xff] }
 0x226   : > { %1227 = vadd.xlane.f32.xlu0 %v1226_v7  ;;  %v1481_v7 = vld [vmem:[%s6877_s18 + $0x68] sm:$0xff] }
 0x227   : > { %v4849_v11 = vpack.c.bf16 %v1481_v7, %v1480_v6  ;;  %v1916_v6 = vld [vmem:[%s6879_s22] sm:$0xff]  ;;  %v1917_v7 = vld [vmem:[%s6879_s22 + $0x8] sm:$0xff] }
 0x228   : > { %v4879_v8 = vpack.c.bf16 %v1917_v7, %v1916_v6 }
 0x2b3   : > { %v1228_v22 = vpop.xlane.xlu0 %1227 }
 0x2b4   : > { %v1229_v23 = vmul.f32 0.0625, %v1228_v22 }
 0x2b6   : > { %v1230_v24 = vadd.f32 1e-05, %v1229_v23 }
 0x2b8   : > { %5327 = vrsqrt.f32 %v1230_v24 }
 0x2c2   : > { %v5328_v25 = vpop.eup %5327 }
 0x2c3   : > { %v1232_v26 = vmul.f32 %v5328_v25, %v1224_v5  ;;  %v4870_v5 = vpack.c.bf16 %v1581_v3, %v1580_v2 }
 0x2c5   : > { %4466 = vmatmul.mubr.msk.f32.vlgmr.msra.gmra.mrb[0].mxu0 %vm1242_vm2, %v1232_v26 }
 0x2c6   : > { %4500 = vmatprep.mubr.msk.f32.mxu0 %vm5832_vm1, %v5833_v12  ;;  %4832 = vmatpush3.bf16.msra.mxu0 %v4831_v37 }
 0x2c7   : > { %4833 = vmatprep.subr.bf16.mxu0 %v5831_v10 }
 0x2ca   : > { %4835 = vmatpush3.bf16.msra.mxu0 %v4834_v43 }
 0x2cb   : > { %4836 = vmatprep.subr.bf16.mxu0 %v5831_v10 }
 0x2ce   : > { %4838 = vmatpush3.bf16.msra.mxu0 %v4837_v49 }
 0x2cf   : > { %4839 = vmatprep.subr.bf16.mxu0 %v5831_v10 }
 0x2d2   : > { %4841 = vmatpush3.bf16.msra.mxu0 %v4840_v55 }
 0x2d3   : > { %4842 = vmatprep.subr.bf16.mxu0 %v5831_v10 }
 0x2d6   : > { %4844 = vmatpush3.bf16.msra.mxu0 %v4843_v62 }
 0x2d7   : > { %4845 = vmatprep.subr.bf16.mxu0 %v5831_v10 }
 0x2da   : > { %4847 = vmatpush3.bf16.msra.mxu0 %v4846_v4 }
 0x2db   : > { %4848 = vmatprep.subr.bf16.mxu0 %v5831_v10 }
 0x2de   : > { %4850 = vmatpush3.bf16.msra.mxu0 %v4849_v11  ;;  %v1919_v11 = vld [vmem:[%s6879_s22 + $0x18] sm:$0xff] }
 0x2df   : > { %4851 = vmatprep.subr.bf16.mxu0 %v5831_v10 }
 0x2e2   : > { %4853 = vmatpush3.bf16.msra.mxu0 %v4852_v18  ;;  %v1923_v18 = vld [vmem:[%s6879_s22 + $0x38] sm:$0xff] }
 0x2e3   : > { %4878 = vmatprep.subr.bf16.mxu0 %v5831_v10 }
 0x398   : > { %v1312_v31 = vpop.f32.mrb[0].mxu0 }
 0x399   : > { %v6312_v32 = vadd.f32 %v4121_v30, %v1312_v31  ;;  %v4467_v33 = vpop.f32.mrb[1].mxu0  ;;  %v1416_v31 = vld [vmem:[#allocation5] sm:$0xf] }
 0x39a   : > { %v1430_v38 = vrot.slane %v1416_v31, %v6371_v27  ;;  %v1424_v41 = vrot.slane %v1416_v31, %v6379_v34  ;;  %v1448_v42 = vrot.slane %v1416_v31, %v6382_v35 }
 0x39b   : > { %4123 = vmatmul.mubr.msk.f32.vlgmr.msra.gmra.mrb[0].mxu1 %vm1324_vm3, %v6312_v32 }
 0x39c   : > { %4535 = vmatprep.mubr.msk.f32.mxu1 %vm5832_vm1, %v5833_v12  ;;  %4856 = vmatpush3.bf16.msra.mxu1 %v4855_v39  ;;  %v1439_v39 = vrot.slane %v1416_v31, %v6374_v28 }
 0x39d   : > { %4857 = vmatprep.subr.bf16.mxu1 %v5831_v10 }
 0x3a0   : > { %4859 = vmatpush3.bf16.msra.mxu1 %v4858_v45 }
 0x3a1   : > { %4860 = vmatprep.subr.bf16.mxu1 %v5831_v10 }
 0x3a4   : > { %4862 = vmatpush3.bf16.msra.mxu1 %v4861_v51 }
 0x3a5   : > { %4863 = vmatprep.subr.bf16.mxu1 %v5831_v10 }
 0x3a8   : > { %4865 = vmatpush3.bf16.msra.mxu1 %v4864_v59 }
 0x3a9   : > { %4866 = vmatprep.subr.bf16.mxu1 %v5831_v10 }
 0x3ac   : > { %4868 = vmatpush3.bf16.msra.mxu1 %v4867_v63 }
 0x3ad   : > { %4869 = vmatprep.subr.bf16.mxu1 %v5831_v10 }
 0x3b0   : > { %4871 = vmatpush3.bf16.msra.mxu1 %v4870_v5 }
 0x3b1   : > { %4872 = vmatprep.subr.bf16.mxu1 %v5831_v10 }
 0x3b4   : > { %4874 = vmatpush3.bf16.msra.mxu1 %v4873_v13  ;;  %v4882_v13 = vpack.c.bf16 %v1919_v11, %v1918_v9 }
 0x3b5   : > { %4875 = vmatprep.subr.bf16.mxu1 %v5831_v10 }
 0x3b8   : > { %4877 = vmatpush3.bf16.msra.mxu1 %v4876_v19  ;;  %v4888_v19 = vpack.c.bf16 %v1923_v18, %v1922_v17 }
 0x3b9   : > { %4902 = vmatprep.subr.bf16.mxu1 %v5831_v10 }
 0x46e   : > { %v1394_v22 = vpop.f32.mrb[0].mxu1 }
 0x46f   : > { %v1400_v23 = vrot.slane %v1394_v22, 3  ;;  %v1402_v24 = vrot.slane %v1394_v22, 1  ;;  %v1404_v25 = vrot.slane %v1394_v22, 7  ;;  %v6368_v26 = vpop.f32.mrb[1].mxu1  ;;  %v1406_v29 = vrot.slane %v1394_v22, 5 }
 0x471   : > { %v1409_v30 = vsel %vm1408_vm4, %v1400_v23, %v1402_v24  ;;  %v4125_v24 = vld [vmem:[#allocation8] ss:$0 sm:$0xff] }
 0x472   : > { %v1411_v33 = vsel %vm1410_vm5, %v1409_v30, %v1404_v25  ;;  %v1926_v25 = vld [vmem:[%s6879_s22 + $0x50] sm:$0xff] }
 0x473   : > { %v1413_v36 = vsel %vm1412_vm6, %v1411_v33, %v1406_v29  ;;  %v1927_v29 = vld [vmem:[%s6879_s22 + $0x58] sm:$0xff]  ;;  %v1928_v33 = vld [vmem:[%s6879_s22 + $0x60] sm:$0xff] }
 0x474   : > { %v1415_v37 = vsel %vm1414_vm7, %v1394_v22, %v1413_v36  ;;  %v1925_v22 = vld [vmem:[%s6879_s22 + $0x48] sm:$0xff]  ;;  %v4894_v31 = vpack.c.bf16 %v1927_v29, %v1926_v25 }
 0x475   : > { %v1418_v40 = vrot.slane %v1415_v37, 5  ;;  %v4891_v23 = vpack.c.bf16 %v1925_v22, %v1924_v20  ;;  %v1929_v36 = vld [vmem:[%s6879_s22 + $0x68] sm:$0xff]  ;;  %v1930_v37 = vld [vmem:[%s6879_s22 + $0x70] sm:$0xff] }
 0x477   : > { %v1420_v43 = vsel %vm1412_vm6, 0.0, %v1418_v40  ;;  %v4897_v40 = vpack.c.bf16 %v1929_v36, %v1928_v33 }
 0x478   : > { %v1431_v44 = vmul.f32 %v1430_v38, %v1420_v43  ;;  %v1440_v45 = vmul.f32 %v1439_v39, %v1420_v43  ;;  %v1425_v46 = vmul.f32 %v1424_v41, %v1420_v43  ;;  %v1449_v48 = vmul.f32 %v1448_v42, %v1420_v43  ;;  %v1931_v38 = vld [vmem:[%s6879_s22 + $0x78] sm:$0xff] }
 0x479   : > { %v4900_v41 = vpack.c.bf16 %v1931_v38, %v1930_v37 }
 0x47a   : > { %v1433_v47 = vrot.slane %v1431_v44, 1  ;;  %v1442_v49 = vrot.slane %v1440_v45, 2  ;;  %v1451_v52 = vrot.slane %v1449_v48, 3 }
 0x47c   : > { %v1435_v50 = vadd.f32 %v1433_v47, %v1425_v46  ;;  %v5834_v46 = vmov 1966171168  }
 0x47d   : > { %v1659_v47 = vunpack.c.l.s4 %v5834_v46  ;;  %v1909_v46 = vsub.f32 0.0, %v6368_v26 }
 0x47e   : > { %v1444_v51 = vadd.f32 %v1442_v49, %v1435_v50 }
 0x47f   : > { %v1660_v49 = vunpack.c.0.s8 %v1659_v47 }
 0x480   : > { %v1453_v54 = vadd.f32 %v1451_v52, %v1444_v51 }
 0x481   : > { %v6428_v52 = vsub.s32 %v1660_v49, %v6366_v21 }
 0x482   : > { %v1461_v55 = vadd.f32 %v4124_v53, %v1453_v54 }
 0x484   : > { %v1462_v56 = vsub.f32 0.0, %v1461_v55 }
 0x486   : > { %v1463_v57 = vmul.f32 1.442695, %v1462_v56 }
 0x488   : > { %5329 = vpow2.f32 %v1463_v57 }
 0x492   : > { %v5330_v58 = vpop.eup %5329 }
 0x493   : > { %v1465_v59 = vadd.f32 1.0, %v5330_v58  ;;  %v1656_v58 = vld [vmem:[#allocation10] sm:$0xff] }
 0x495   : > { %5331 = vrcp.f32 %v1465_v59 }
 0x49f   : > { %v5332_v60 = vpop.eup %5331 }
 0x4a0   : > { %v6391_v61 = vmul.f32 %v5332_v60, %v1461_v55 }
 0x4a2   : > { %4501 = vmatmul.mubr.f32.vlgmr.msra.gmra.mrb[2].mxu0 %v6391_v61  ;;  %4536 = vmatmul.mubr.f32.vlgmr.msra.gmra.mrb[2].mxu1 %v6391_v61 }
 0x4a3   : > { %4570 = vmatprep.mubr.msk.f32.mxu0 %vm5832_vm1, %v5833_v12  ;;  %4581 = vmatprep.mubr.msk.f32.mxu1 %vm5832_vm1, %v5833_v12 }
 0x4a4   : > { %4880 = vmatpush3.bf16.msra.mxu0 %v4879_v8 }
 0x4a5   : > { %4881 = vmatprep.subr.bf16.mxu0 %v5831_v10 }
 0x4a8   : > { %4883 = vmatpush3.bf16.msra.mxu0 %v4882_v13 }
 0x4a9   : > { %4884 = vmatprep.subr.bf16.mxu0 %v5831_v10 }
 0x4ac   : > { %4886 = vmatpush3.bf16.msra.mxu0 %v4885_v16 }
 0x4ad   : > { %4887 = vmatprep.subr.bf16.mxu0 %v5831_v10 }
 0x4b0   : > { %4889 = vmatpush3.bf16.msra.mxu0 %v4888_v19 }
 0x4b1   : > { %4890 = vmatprep.subr.bf16.mxu0 %v5831_v10 }
 0x4b4   : > { %4892 = vmatpush3.bf16.msra.mxu0 %v4891_v23 }
 0x4b5   : > { %4893 = vmatprep.subr.bf16.mxu0 %v5831_v10 }
 0x4b8   : > { %4895 = vmatpush3.bf16.msra.mxu0 %v4894_v31 }
 0x4b9   : > { %4896 = vmatprep.subr.bf16.mxu0 %v5831_v10 }
 0x4bc   : > { %4898 = vmatpush3.bf16.msra.mxu0 %v4897_v40 }
 0x4bd   : > { %4899 = vmatprep.subr.bf16.mxu0 %v5831_v10 }
 0x4c0   : > { %4901 = vmatpush3.bf16.msra.mxu0 %v4900_v41 }
 0x4c1   : > { %4928 = vmatprep.subr.bf16.mxu0 %v5831_v10 }
 0x575   : > { %v1557_v62 = vpop.f32.mrb[2].mxu0  ;;  %v1652_v63 = vpop.f32.mrb[2].mxu1 }
 0x576   : > { %v1718_v0 = vrot.slane %v1652_v63, %v6379_v34  ;;  %v1725_v1 = vrot.slane %v1652_v63, %v6371_v27  ;;  %v4502_v2 = vpop.f32.mrb[3].mxu0  ;;  %v4537_v3 = vpop.f32.mrb[3].mxu1  ;;  %v1732_v4 = vrot.slane %v1652_v63, %v6374_v28  ;;  %v1739_v5 = vrot.slane %v1652_v63, %v6382_v35 }
 0x577   : > { %v1558_v30 = vadd.f32 %v4125_v24, %v1557_v62 }
 0x578   : > { %1727 = vbcast.lane.b32.xlu0 %v1725_v1, 256  ;;  %1720 = vbcast.lane.b32.xlu1 %v1718_v0, 256 }
 0x579   : > { %v1562_v39 = vand.u32 2147483647, %v1558_v30  ;;  %v1561_v51 = vmax.f32 %v1558_v30, 0.0 }
 0x57b   : > { %v1563_v42 = vsub.f32 0.0, %v1562_v39 }
 0x57c   : > { %1769 = vbcast.lane.b32.xlu0 %v1725_v1, 264  ;;  %1745 = vbcast.lane.b32.xlu1 %v1718_v0, 272 }
 0x57d   : > { %v1564_v43 = vmul.f32 1.442695, %v1563_v42 }
 0x57f   : > { %5333 = vpow2.f32 %v1564_v43 }
 0x580   : > { %1785 = vbcast.lane.b32.xlu0 %v1725_v1, 280  ;;  %1749 = vbcast.lane.b32.xlu1 %v1725_v1, 272 }
 0x584   : > { %1789 = vbcast.lane.b32.xlu0 %v1732_v4, 280  ;;  %1734 = vbcast.lane.b32.xlu1 %v1732_v4, 256 }
 0x588   : > { %1793 = vbcast.lane.b32.xlu0 %v1739_v5, 280  ;;  %1753 = vbcast.lane.b32.xlu1 %v1732_v4, 272 }
 0x589   : > { %v5334_v44 = vpop.eup %5333 }
 0x58a   : > { %v1566_v45 = vadd.f32 1.0, %v5334_v44 }
 0x58c   : > { %1741 = vbcast.lane.b32.xlu1 %v1739_v5, 256  ;;  %5335 = vlog2.f32 %v1566_v45 }
 0x590   : > { %1757 = vbcast.lane.b32.xlu1 %v1739_v5, 272 }
 0x594   : > { %1765 = vbcast.lane.b32.xlu1 %v1718_v0, 264 }
 0x596   : > { %v5336_v48 = vpop.eup %5335 }
 0x597   : > { %v1568_v50 = vmul.f32 0.6931472, %v5336_v48 }
 0x598   : > { %1781 = vbcast.lane.b32.xlu1 %v1718_v0, 280 }
 0x599   : > { %v1569_v53 = vadd.f32 %v1568_v50, %v1561_v51 }
 0x59b   : > { %v1664_v54 = vrot.slane %v1569_v53, %v6428_v52  ;;  %v1714_v0 = vmul.f32 %v1569_v53, %v6391_v61  ;;  %v1910_v53 = vmul.f32 1.442695, %v1909_v46 }
 0x59c   : > { %1773 = vbcast.lane.b32.xlu1 %v1732_v4, 264 }
 0x59d   : > { %v1672_v55 = vrot.slane %v1664_v54, %v6428_v52  ;;  %v1665_v56 = vcombine.high %v1664_v54, %v1664_v54  ;;  %v1806_v2 = vrot.slane %v1714_v0, %v6428_v52 }
 0x59f   : > { %v1685_v57 = vrot.slane %v1672_v55, %v6379_v34  ;;  %v1679_v59 = vrot.slane %v1665_v56, %v6428_v52  ;;  %v1680_v4 = vcombine.high %v1672_v55, %v1672_v55  ;;  %v1814_v6 = vrot.slane %v1806_v2, %v6428_v52 }
 0x5a0   : > { %1777 = vbcast.lane.b32.xlu1 %v1739_v5, 264  ;;  %v1807_v13 = vcombine.high %v1806_v2, %v1806_v2 }
 0x5a1   : > { %v1702_v60 = vmul.f32 %v1685_v57, %v1656_v58  ;;  %v1689_v62 = vrot.slane %v1679_v59, %v6379_v34  ;;  %v1693_v8 = vrot.slane %v1680_v4, %v6379_v34  ;;  %v1827_v11 = vrot.slane %v1814_v6, %v6379_v34 }
 0x5a2   : > { %v1681_v15 = vcombine.high %v1679_v59, %v1679_v59  ;;  %v1821_v22 = vrot.slane %v1807_v13, %v6428_v52  ;;  %v1822_v44 = vcombine.high %v1814_v6, %v1814_v6 }
 0x5a3   : > { %v1706_v63 = vmul.f32 1.442695, %v1702_v60  ;;  %v1703_v21 = vmul.f32 %v1689_v62, %v1656_v58  ;;  %v1704_v19 = vmul.f32 %v1693_v8, %v1656_v58 }
 0x5a4   : > { %v1697_v23 = vrot.slane %v1681_v15, %v6379_v34  ;;  %v1831_v33 = vrot.slane %v1821_v22, %v6379_v34  ;;  %v1835_v50 = vrot.slane %v1822_v44, %v6379_v34  ;;  %v1823_v55 = vcombine.high %v1821_v22, %v1821_v22  ;;  %v4126_v44 = vld [vmem:[#allocation11] ss:$0 sm:$0xff] }
 0x5a5   : > { %5337 = vpow2.f32 %v1706_v63  ;;  %v1708_v5 = vmul.f32 1.442695, %v1703_v21  ;;  %v1710_v29 = vmul.f32 1.442695, %v1704_v19 }
 0x5a6   : > { %v1705_v37 = vmul.f32 %v1697_v23, %v1656_v58  ;;  %v1839_v0 = vrot.slane %v1823_v55, %v6379_v34 }
 0x5a7   : > { %5339 = vpow2.f32 %v1708_v5 }
 0x5a8   : > { %5341 = vpow2.f32 %v1710_v29  ;;  %v1712_v41 = vmul.f32 1.442695, %v1705_v37 }
 0x5aa   : > { %5343 = vpow2.f32 %v1712_v41 }
 0x5ab   : > { %5345 = vpow2.f32 %v1910_v53 }
 0x5af   : > { %v5338_v14 = vpop.eup %5337 }
 0x5b0   : > { %v1848_v20 = vmul.f32 0.0, %v5338_v14 }
 0x5b1   : > { %v5340_v36 = vpop.eup %5339 }
 0x5b2   : > { %v5342_v56 = vpop.eup %5341 }
 0x5b4   : > { %v5344_v6 = vpop.eup %5343 }
 0x5ea   : > { %v1721_v1 = vpop.permute.xlu1 %1720  ;;  %v1728_v16 = vpop.permute.xlu0 %1727 }
 0x5ee   : > { %v1746_v3 = vpop.permute.xlu1 %1745  ;;  %v1770_v31 = vpop.permute.xlu0 %1769 }
 0x5ef   : > { %v1759_v9 = vsel %vm1414_vm7, %v1721_v1, %v1746_v3 }
 0x5f0   : > { %v1844_v17 = vmul.f32 %v1827_v11, %v1759_v9 }
 0x5f2   : > { %v1750_v7 = vpop.permute.xlu1 %1749  ;;  %v1849_v24 = vadd.f32 %v1848_v20, %v1844_v17  ;;  %v1786_v42 = vpop.permute.xlu0 %1785 }
 0x5f3   : > { %v1760_v30 = vsel %vm1414_vm7, %v1728_v16, %v1750_v7  ;;  %v1796_v47 = vsel %vm1414_vm7, %v1770_v31, %v1786_v42 }
 0x5f4   : > { %v1845_v38 = vmul.f32 %v1831_v33, %v1760_v30  ;;  %v1857_v39 = vmul.f32 %v5340_v36, %v1849_v24 }
 0x5f6   : > { %v1735_v18 = vpop.permute.xlu1 %1734  ;;  %v1858_v43 = vadd.f32 %v1857_v39, %v1845_v38  ;;  %v1790_v63 = vpop.permute.xlu0 %1789 }
 0x5f8   : > { %v1859_v49 = vmul.f32 %v1858_v43, %v1796_v47  ;;  %v1866_v59 = vmul.f32 %v5342_v56, %v1858_v43 }
 0x5fa   : > { %v1754_v25 = vpop.permute.xlu1 %1753  ;;  %v1860_v57 = vrot.slane %v1859_v49, 4  ;;  %v1794_v14 = vpop.permute.xlu0 %1793 }
 0x5fb   : > { %v1761_v48 = vsel %vm1414_vm7, %v1735_v18, %v1754_v25 }
 0x5fc   : > { %v1846_v54 = vmul.f32 %v1835_v50, %v1761_v48  ;;  %v1861_v2 = vadd.f32 %v1860_v57, %v1859_v49  ;;  %v1894_v49 = vmul.f32 %v4126_v44, %v6391_v61 }
 0x5fe   : > { %v1742_v40 = vpop.permute.xlu1 %1741  ;;  %v1867_v21 = vadd.f32 %v1866_v59, %v1846_v54  ;;  %v1862_v13 = vrot.slane %v1861_v2, 2 }
 0x600   : > { %v1875_v11 = vmul.f32 %v5344_v6, %v1867_v21  ;;  %v1863_v25 = vadd.f32 %v1862_v13, %v1861_v2  ;;  %v2036_v13 = vld [vmem:[#allocation16 + $0x10] sm:$0xff] }
 0x602   : > { %v1758_v45 = vpop.permute.xlu1 %1757  ;;  %v1864_v38 = vrot.slane %v1863_v25, 1 }
 0x603   : > { %v1762_v60 = vsel %vm1414_vm7, %v1742_v40, %v1758_v45 }
 0x604   : > { %v1847_v3 = vmul.f32 %v1839_v0, %v1762_v60  ;;  %v1865_v45 = vadd.f32 %v1864_v38, %v1863_v25  ;;  %v2124_v38 = vld [vmem:[%s6880_s0 + $0x28] sm:$0xff] }
 0x606   : > { %v1766_v51 = vpop.permute.xlu1 %1765  ;;  %v1876_v18 = vadd.f32 %v1875_v11, %v1847_v3 }
 0x60a   : > { %v1782_v58 = vpop.permute.xlu1 %1781 }
 0x60b   : > { %v1795_v62 = vsel %vm1414_vm7, %v1766_v51, %v1782_v58 }
 0x60c   : > { %v1850_v1 = vmul.f32 %v1849_v24, %v1795_v62  ;;  %v5346_v24 = vpop.eup %5345 }
 0x60d   : > { %v1912_v31 = vadd.f32 1.0, %v5346_v24  ;;  %v4128_v24 = vld [vmem:[#allocation14] ss:$0 sm:$0xff] }
 0x60e   : > { %v1851_v4 = vrot.slane %v1850_v1, 4  ;;  %v1774_v5 = vpop.permute.xlu1 %1773 }
 0x60f   : > { %v1797_v7 = vsel %vm1414_vm7, %v1774_v5, %v1790_v63  ;;  %5347 = vrcp.f32 %v1912_v31  ;;  %v2121_v31 = vld [vmem:[%s6880_s0 + $0x10] sm:$0xff] }
 0x610   : > { %v1852_v8 = vadd.f32 %v1851_v4, %v1850_v1  ;;  %v1868_v9 = vmul.f32 %v1867_v21, %v1797_v7 }
 0x612   : > { %v1853_v15 = vrot.slane %v1852_v8, 2  ;;  %v1869_v16 = vrot.slane %v1868_v9, 4  ;;  %v1778_v17 = vpop.permute.xlu1 %1777 }
 0x613   : > { %v1798_v19 = vsel %vm1414_vm7, %v1778_v17, %v1794_v14  ;;  %v2037_v14 = vld [vmem:[#allocation16 + $0x18] sm:$0xff] }
 0x614   : > { %v1854_v20 = vadd.f32 %v1853_v15, %v1852_v8  ;;  %v1870_v22 = vadd.f32 %v1869_v16, %v1868_v9  ;;  %v1877_v23 = vmul.f32 %v1876_v18, %v1798_v19  ;;  %v2034_v8 = vld [vmem:[#allocation16] sm:$0xff]  ;;  %v2035_v9 = vld [vmem:[#allocation16 + $0x8] sm:$0xff]  ;;  %v4127_v19 = vld [vmem:[#allocation13] ss:$0 sm:$0xff] }
 0x615   : > { %v4903_v11 = vpack.c.bf16 %v2035_v9, %v2034_v8 }
 0x616   : > { %v1871_v29 = vrot.slane %v1870_v22, 2  ;;  %v1878_v30 = vrot.slane %v1877_v23, 4  ;;  %v1855_v33 = vrot.slane %v1854_v20, 1 }
 0x617   : > { %4904 = vmatpush3.bf16.msra.mxu1 %v4903_v11  ;;  %v4133_v11 = vld [vmem:[#allocation20] ss:$0 sm:$0xff] }
 0x618   : > { %v1872_v36 = vadd.f32 %v1871_v29, %v1870_v22  ;;  %v1879_v37 = vadd.f32 %v1878_v30, %v1877_v23  ;;  %v1856_v41 = vadd.f32 %v1855_v33, %v1854_v20  ;;  %4905 = vmatprep.subr.bf16.mxu1 %v5831_v10  ;;  %v2119_v22 = vld [vmem:[%s6880_s0] sm:$0xff]  ;;  %v2120_v23 = vld [vmem:[%s6880_s0 + $0x8] sm:$0xff]  ;;  %v2122_v33 = vld [vmem:[%s6880_s0 + $0x18] sm:$0xff] }
 0x619   : > { %v5348_v57 = vpop.eup %5347  ;;  %v4909_v29 = vpack.c.bf16 %v2120_v23, %v2119_v22  ;;  %v4147_v23 = vld [vmem:[%s6877_s18 + $0x90] sm:$0xff] }
 0x61a   : > { %v1873_v39 = vrot.slane %v1872_v36, 1  ;;  %v1880_v40 = vrot.slane %v1879_v37, 2  ;;  %v1884_v47 = vsel %vm1408_vm4, %v1856_v41, %v1865_v45  ;;  %v1914_v62 = vmul.f32 %v5348_v57, %v6368_v26  ;;  %v2126_v41 = vld [vmem:[%s6880_s0 + $0x38] sm:$0xff] }
 0x61c   : > { %v1881_v42 = vadd.f32 %v1880_v40, %v1879_v37  ;;  %v1874_v43 = vadd.f32 %v1873_v39, %v1872_v36  ;;  %v4912_v36 = vpack.c.bf16 %v2122_v33, %v2121_v31  ;;  %v2123_v37 = vld [vmem:[%s6880_s0 + $0x20] sm:$0xff]  ;;  %v2125_v40 = vld [vmem:[%s6880_s0 + $0x30] sm:$0xff] }
 0x61d   : > { %v4915_v39 = vpack.c.bf16 %v2124_v38, %v2123_v37  ;;  %v4149_v33 = vld [vmem:[%s6877_s18 + $0xa0] sm:$0xff] }
 0x61e   : > { %v1882_v46 = vrot.slane %v1881_v42, 1  ;;  %v1885_v50 = vsel %vm1410_vm5, %v1884_v47, %v1874_v43  ;;  %v4129_v43 = vld [vmem:[#allocation17] ss:$0 sm:$0xff] }
 0x61f   : > { %v4166_v37 = vld [vmem:[%s6878_s16 + $0xa0] sm:$0xff] }
 0x620   : > { %v1883_v48 = vadd.f32 %v1882_v46, %v1881_v42  ;;  %v4918_v42 = vpack.c.bf16 %v2126_v41, %v2125_v40  ;;  %v4151_v41 = vld [vmem:[%s6877_s18 + $0xb0] sm:$0xff] }
 0x622   : > { %v1886_v51 = vsel %vm1412_vm6, %v1885_v50, %v1883_v48  ;;  %v4131_v48 = vld [vmem:[#allocation19] ss:$0 sm:$0xff] }
 0x623   : > { %v1895_v53 = vadd.f32 %v1894_v49, %v1886_v51 }
 0x625   : > { %v1897_v54 = vrot.slane %v1895_v53, 3  ;;  %v1899_v55 = vrot.slane %v1895_v53, 1  ;;  %v1901_v56 = vrot.slane %v1895_v53, 7  ;;  %v1903_v58 = vrot.slane %v1895_v53, 5 }
 0x627   : > { %v1905_v59 = vsel %vm1408_vm4, %v1897_v54, %v1899_v55 }
 0x628   : > { %v1906_v60 = vsel %vm1410_vm5, %v1905_v59, %v1901_v56 }
 0x629   : > { %v1907_v63 = vsel %vm1412_vm6, %v1906_v60, %v1903_v58  ;;  %v4136_v60 = vld [vmem:[%s6876_s1 + $0x48] sm:$0xff] }
 0x62a   : > { %v1908_v61 = vsel %vm1414_vm7, %v1895_v53, %v1907_v63 }
 0x62b   : > { %v1915_v0 = vmul.f32 %v1914_v62, %v1908_v61  ;;  %v4138_v62 = vld [vmem:[%s6876_s1 + $0x58] sm:$0xff]  ;;  %v4135_v61 = vld [vmem:[%s6876_s1 + $0x40] sm:$0xff] }
 0x62c   : > { %v4920_v63 = vpack.c.bf16 %v4138_v62, %v4136_v60  ;;  %v4157_v60 = vld [vmem:[%s6877_s18 + $0xe0] sm:$0xff]  ;;  %v4158_v62 = vld [vmem:[%s6877_s18 + $0xe8] sm:$0xff] }
 0x62d   : > { %4571 = vmatmul.mubr.f32.vlgmr.msra.gmra.mrb[4].mxu0 %v1915_v0  ;;  %v4137_v0 = vld [vmem:[%s6876_s1 + $0x50] sm:$0xff] }
 0x62e   : > { %4635 = vmatprep.mubr.msk.f32.mxu0 %vm5832_vm1, %v5833_v12 }
 0x700   : > { %v1998_v1 = vpop.f32.mrb[4].mxu0 }
 0x701   : > { %v2002_v21 = vadd.f32 %v1998_v1, %v6312_v32  ;;  %v4572_v2 = vpop.f32.mrb[5].mxu0  ;;  %v4906_v32 = vpack.c.bf16 %v2037_v14, %v2036_v13  ;;  %v4922_v1 = vpack.c.bf16 %v4137_v0, %v4135_v61  ;;  %v4134_v14 = vld [vmem:[#allocation22] ss:$0 sm:$0xff]  ;;  %v4947_v0 = vpack.c.bf16 %v4158_v62, %v4157_v60 }
 0x702   : > { %v4142_v2 = vld [vmem:[%s6876_s1 + $0x78] sm:$0xff]  ;;  %v4175_v61 = vld [vmem:[%s6878_s16 + $0xe8] sm:$0xff] }
 0x703   : > { %v2006_v3 = vsel %vm2005_vm8, %v2002_v21, 0.0  ;;  %4907 = vmatpush3.bf16.msra.mxu1 %v4906_v32 }
 0x704   : > { %2007 = vadd.xlane.f32.xlu1 %v2006_v3  ;;  %4908 = vmatprep.subr.bf16.mxu1 %v5831_v10  ;;  %v4139_v3 = vld [vmem:[%s6876_s1 + $0x60] sm:$0xff] }
 0x791   : > { %v2008_v4 = vpop.xlane.xlu1 %2007 }
 0x792   : > { %v2010_v5 = vmul.f32 0.03125, %v2008_v4 }
 0x794   : > { %v2011_v26 = vsub.f32 %v2002_v21, %v2010_v5  ;;  %v4140_v21 = vld [vmem:[%s6876_s1 + $0x68] sm:$0xff]  ;;  %v4141_v5 = vld [vmem:[%s6876_s1 + $0x70] sm:$0xff] }
 0x795   : > { %v4924_v4 = vpack.c.bf16 %v4142_v2, %v4140_v21  ;;  %v4159_v21 = vld [vmem:[%s6877_s18 + $0xf0] sm:$0xff]  ;;  %v4160_v2 = vld [vmem:[%s6877_s18 + $0xf8] sm:$0xff] }
 0x796   : > { %v2012_v6 = vmul.f32 %v2011_v26, %v2011_v26 }
 0x798   : > { %v2013_v7 = vsel %vm2005_vm8, %v2012_v6, 0.0 }
 0x799   : > { %2014 = vadd.xlane.f32.xlu0 %v2013_v7 }
 0x826   : > { %v2015_v15 = vpop.xlane.xlu0 %2014 }
 0x827   : > { %v2016_v16 = vmul.f32 0.03125, %v2015_v15 }
 0x829   : > { %v2017_v17 = vadd.f32 1e-05, %v2016_v16  ;;  %v4145_v16 = vld [vmem:[%s6877_s18 + $0x80] sm:$0xff] }
 0x82b   : > { %5349 = vrsqrt.f32 %v2017_v17  ;;  %v4146_v17 = vld [vmem:[%s6877_s18 + $0x88] sm:$0xff] }
 0x835   : > { %v5350_v18 = vpop.eup %5349 }
 0x836   : > { %v2019_v20 = vmul.f32 %v5350_v18, %v2011_v26  ;;  %v4926_v26 = vpack.c.bf16 %v4141_v5, %v4139_v3  ;;  %v4162_v18 = vld [vmem:[%s6878_s16 + $0x80] sm:$0xff]  ;;  %v4176_v3 = vld [vmem:[%s6878_s16 + $0xf0] sm:$0xff]  ;;  %v4950_v5 = vpack.c.bf16 %v4160_v2, %v4159_v21  ;;  %v4184_v21 = vld [vmem:[%s6879_s22 + $0xa8] sm:$0xff] }
 0x838   : > { %v2026_v25 = vmul.f32 %v4127_v19, %v2019_v20  ;;  %v4929_v19 = vpack.c.bf16 %v4146_v17, %v4145_v16  ;;  %v4163_v20 = vld [vmem:[%s6878_s16 + $0x88] sm:$0xff] }
 0x839   : > { %v4953_v22 = vpack.c.bf16 %v4163_v20, %v4162_v18 }
 0x83a   : > { %v2033_v30 = vadd.f32 %v4128_v24, %v2026_v25  ;;  %4930 = vmatpush3.bf16.msra.mxu0 %v4929_v19  ;;  %v4148_v24 = vld [vmem:[%s6877_s18 + $0x98] sm:$0xff]  ;;  %v4164_v25 = vld [vmem:[%s6878_s16 + $0x90] sm:$0xff] }
 0x83b   : > { %4931 = vmatprep.subr.bf16.mxu0 %v5831_v10 }
 0x83c   : > { %4582 = vmatmul.mubr.msk.f32.vlgmr.msra.gmra.mrb[4].mxu1 %vm1324_vm3, %v2033_v30 }
 0x83d   : > { %4910 = vmatpush3.bf16.msra.mxu1 %v4909_v29  ;;  %4600 = vmatprep.mubr.msk.f32.mxu1 %vm5832_vm1, %v5833_v12  ;;  %v4932_v29 = vpack.c.bf16 %v4148_v24, %v4147_v23 }
 0x83e   : > { %4911 = vmatprep.subr.bf16.mxu1 %v5831_v10 }
 0x83f   : > { %4933 = vmatpush3.bf16.msra.mxu0 %v4932_v29 }
 0x840   : > { %4934 = vmatprep.subr.bf16.mxu0 %v5831_v10 }
 0x841   : > { %4913 = vmatpush3.bf16.msra.mxu1 %v4912_v36  ;;  %v4150_v36 = vld [vmem:[%s6877_s18 + $0xa8] sm:$0xff] }
 0x842   : > { %4914 = vmatprep.subr.bf16.mxu1 %v5831_v10  ;;  %v4935_v38 = vpack.c.bf16 %v4150_v36, %v4149_v33 }
 0x844   : > { %4936 = vmatpush3.bf16.msra.mxu0 %v4935_v38 }
 0x845   : > { %4916 = vmatpush3.bf16.msra.mxu1 %v4915_v39  ;;  %v4167_v39 = vld [vmem:[%s6878_s16 + $0xa8] sm:$0xff]  ;;  %4937 = vmatprep.subr.bf16.mxu0 %v5831_v10 }
 0x846   : > { %4917 = vmatprep.subr.bf16.mxu1 %v5831_v10  ;;  %v4959_v40 = vpack.c.bf16 %v4167_v39, %v4166_v37 }
 0x849   : > { %4919 = vmatpush3.bf16.msra.mxu1 %v4918_v42  ;;  %v4152_v42 = vld [vmem:[%s6877_s18 + $0xb8] sm:$0xff] }
 0x84a   : > { %4921 = vmatprep.subr.bf16.mxu1 %v4920_v63  ;;  %v4174_v63 = vld [vmem:[%s6878_s16 + $0xe0] sm:$0xff] }
 0x90f   : > { %v2114_v44 = vpop.f32.mrb[4].mxu1 }
 0x910   : > { %v2115_v45 = vadd.f32 %v4129_v43, %v2114_v44  ;;  %v4583_v46 = vpop.f32.mrb[5].mxu1  ;;  %v4168_v43 = vld [vmem:[%s6878_s16 + $0xb0] sm:$0xff]  ;;  %v4938_v44 = vpack.c.bf16 %v4152_v42, %v4151_v41  ;;  %v4144_v41 = vld [vmem:[#allocation7 + $0x1] ss:$0 sm:$0xff] }
 0x911   : > { %v4153_v46 = vld [vmem:[%s6877_s18 + $0xc0] sm:$0xff] }
 0x912   : > { %v2118_v47 = vmax.f32 %v2115_v45, 0.0  ;;  %v4169_v45 = vld [vmem:[%s6878_s16 + $0xb8] sm:$0xff]  ;;  %4939 = vmatpush3.bf16.msra.mxu0 %v4938_v44 }
 0x913   : > { %4940 = vmatprep.subr.bf16.mxu0 %v5831_v10 }
 0x914   : > { %4601 = vmatmul.mubr.msk.f32.vlgmr.msra.gmra.mrb[6].mxu1 %vm1414_vm7, %v2118_v47  ;;  %v4154_v47 = vld [vmem:[%s6877_s18 + $0xc8] sm:$0xff] }
 0x915   : > { %2313 = vmatprep.mubr.f32.mxu1 %v5833_v12  ;;  %4923 = vmatpush1.bf16.msra.mxu1 %v4922_v1  ;;  %v4971_v1 = vpack.c.bf16 %v4175_v61, %v4174_v63  ;;  %v4181_v63 = vld [vmem:[%s6879_s22 + $0x90] sm:$0xff]  ;;  %v4182_v61 = vld [vmem:[%s6879_s22 + $0x98] sm:$0xff] }
 0x916   : > { %4925 = vmatprep.subr.bf16.mxu1 %v4924_v4  ;;  %v4177_v4 = vld [vmem:[%s6878_s16 + $0xf8] sm:$0xff] }
 0x919   : > { %4927 = vmatpush1.bf16.msra.mxu1 %v4926_v26  ;;  %v4974_v26 = vpack.c.bf16 %v4177_v4, %v4176_v3  ;;  %v4185_v3 = vld [vmem:[%s6879_s22 + $0xb0] sm:$0xff]  ;;  %v4186_v4 = vld [vmem:[%s6879_s22 + $0xb8] sm:$0xff] }
 0x91a   : > { %4952 = vmatprep.subr.bf16.mxu1 %v5831_v10 }
 0x9e7   : > { %v2203_v49 = vpop.f32.mrb[6].mxu1 }
 0x9e8   : > { %v2204_v50 = vadd.f32 %v4131_v48, %v2203_v49  ;;  %v4602_v51 = vpop.f32.mrb[7].mxu1  ;;  %v4962_v48 = vpack.c.bf16 %v4169_v45, %v4168_v43  ;;  %v4170_v49 = vld [vmem:[%s6878_s16 + $0xc0] sm:$0xff] }
 0x9e9   : > { %v4941_v51 = vpack.c.bf16 %v4154_v47, %v4153_v46 }
 0x9ea   : > { %v2207_v53 = vadd.f32 %v2204_v50, %v2033_v30  ;;  %v4165_v30 = vld [vmem:[%s6878_s16 + $0x98] sm:$0xff]  ;;  %v4171_v50 = vld [vmem:[%s6878_s16 + $0xc8] sm:$0xff] }
 0x9eb   : > { %v4956_v31 = vpack.c.bf16 %v4165_v30, %v4164_v25  ;;  %4942 = vmatpush3.bf16.msra.mxu0 %v4941_v51 }
 0x9ec   : > { %v2210_v54 = vsel %vm2005_vm8, %v2207_v53, 0.0  ;;  %4943 = vmatprep.subr.bf16.mxu0 %v5831_v10 }
 0x9ed   : > { %2211 = vadd.xlane.f32.xlu0 %v2210_v54  ;;  %v4155_v54 = vld [vmem:[%s6877_s18 + $0xd0] sm:$0xff] }
 0xa7a   : > { %v2212_v55 = vpop.xlane.xlu0 %2211 }
 0xa7b   : > { %v2213_v56 = vmul.f32 0.03125, %v2212_v55  ;;  %v4156_v55 = vld [vmem:[%s6877_s18 + $0xd8] sm:$0xff] }
 0xa7d   : > { %v2214_v57 = vsub.f32 %v2207_v53, %v2213_v56  ;;  %v4965_v53 = vpack.c.bf16 %v4171_v50, %v4170_v49  ;;  %v4172_v56 = vld [vmem:[%s6878_s16 + $0xd0] sm:$0xff] }
 0xa7f   : > { %v2215_v58 = vmul.f32 %v2214_v57, %v2214_v57 }
 0xa81   : > { %v2216_v59 = vsel %vm2005_vm8, %v2215_v58, 0.0  ;;  %v4944_v58 = vpack.c.bf16 %v4156_v55, %v4155_v54 }
 0xa82   : > { %2217 = vadd.xlane.f32.xlu1 %v2216_v59 }
 0xa83   : > { %4945 = vmatpush3.bf16.msra.mxu0 %v4944_v58  ;;  %v4179_v58 = vld [vmem:[%s6879_s22 + $0x80] sm:$0xff] }
 0xa84   : > { %4946 = vmatprep.subr.bf16.mxu0 %v5831_v10 }
 0xa87   : > { %4948 = vmatpush3.bf16.msra.mxu0 %v4947_v0  ;;  %v4980_v0 = vpack.c.bf16 %v4182_v61, %v4181_v63 }
 0xa88   : > { %4949 = vmatprep.subr.bf16.mxu0 %v5831_v10 }
 0xa8b   : > { %4951 = vmatpush3.bf16.msra.mxu0 %v4950_v5  ;;  %v4986_v5 = vpack.c.bf16 %v4186_v4, %v4185_v3 }
 0xa8c   : > { %4976 = vmatprep.subr.bf16.mxu0 %v5831_v10 }
 0xb0f   : > { %v2218_v6 = vpop.xlane.xlu1 %2217 }
 0xb10   : > { %v2219_v7 = vmul.f32 0.03125, %v2218_v6 }
 0xb12   : > { %v2220_v8 = vadd.f32 1e-05, %v2219_v7 }
 0xb14   : > { %5351 = vrsqrt.f32 %v2220_v8 }
 0xb1e   : > { %v5352_v9 = vpop.eup %5351 }
 0xb1f   : > { %v2222_v13 = vmul.f32 %v5352_v9, %v2214_v57  ;;  %v4173_v57 = vld [vmem:[%s6878_s16 + $0xd8] sm:$0xff] }
 0xb20   : > { %v4968_v59 = vpack.c.bf16 %v4173_v57, %v4172_v56 }
 0xb21   : > { %v2229_v32 = vmul.f32 %v4133_v11, %v2222_v13 }
 0xb23   : > { %v6497_v15 = vadd.f32 %v4134_v14, %v2229_v32  ;;  %v2334_v32 = vld [vmem:[#allocation5 + $0x4] sm:$0xf] }
 0xb24   : > { %v2348_v19 = vrot.slane %v2334_v32, %v6371_v27  ;;  %v2357_v20 = vrot.slane %v2334_v32, %v6374_v28  ;;  %v2342_v23 = vrot.slane %v2334_v32, %v6379_v34  ;;  %v2366_v24 = vrot.slane %v2334_v32, %v6382_v35 }
 0xb25   : > { %4143 = vmatmul.mubr.msk.f32.vlgmr.msra.gmra.mrb[8].mxu1 %vm1324_vm3, %v6497_v15 }
 0xb26   : > { %4670 = vmatprep.mubr.msk.f32.mxu1 %vm5832_vm1, %v5833_v12  ;;  %4954 = vmatpush3.bf16.msra.mxu1 %v4953_v22 }
 0xb27   : > { %4955 = vmatprep.subr.bf16.mxu1 %v5831_v10 }
 0xb2a   : > { %4957 = vmatpush3.bf16.msra.mxu1 %v4956_v31 }
 0xb2b   : > { %4958 = vmatprep.subr.bf16.mxu1 %v5831_v10 }
 0xb2e   : > { %4960 = vmatpush3.bf16.msra.mxu1 %v4959_v40 }
 0xb2f   : > { %4961 = vmatprep.subr.bf16.mxu1 %v5831_v10 }
 0xb32   : > { %4963 = vmatpush3.bf16.msra.mxu1 %v4962_v48 }
 0xb33   : > { %4964 = vmatprep.subr.bf16.mxu1 %v5831_v10 }
 0xb36   : > { %4966 = vmatpush3.bf16.msra.mxu1 %v4965_v53 }
 0xb37   : > { %4967 = vmatprep.subr.bf16.mxu1 %v5831_v10 }
 0xb3a   : > { %4969 = vmatpush3.bf16.msra.mxu1 %v4968_v59  ;;  %v4180_v59 = vld [vmem:[%s6879_s22 + $0x88] sm:$0xff] }
 0xb3b   : > { %4970 = vmatprep.subr.bf16.mxu1 %v5831_v10  ;;  %v4977_v60 = vpack.c.bf16 %v4180_v59, %v4179_v58 }
 0xb3e   : > { %4972 = vmatpush3.bf16.msra.mxu1 %v4971_v1  ;;  %v4183_v1 = vld [vmem:[%s6879_s22 + $0xa0] sm:$0xff] }
 0xb3f   : > { %4973 = vmatprep.subr.bf16.mxu1 %v5831_v10  ;;  %v4983_v2 = vpack.c.bf16 %v4184_v21, %v4183_v1 }
 0xb42   : > { %4975 = vmatpush3.bf16.msra.mxu1 %v4974_v26  ;;  %v4187_v26 = vld [vmem:[%s6879_s22 + $0xc0] sm:$0xff] }
 0xb43   : > { %5000 = vmatprep.subr.bf16.mxu1 %v5831_v10 }
 0xbf8   : > { %v2315_v6 = vpop.f32.mrb[8].mxu1 }
 0xbf9   : > { %v2321_v7 = vrot.slane %v2315_v6, 3  ;;  %v2323_v8 = vrot.slane %v2315_v6, 1  ;;  %v2325_v9 = vrot.slane %v2315_v6, 7  ;;  %v6551_v11 = vpop.f32.mrb[9].mxu1  ;;  %v2327_v13 = vrot.slane %v2315_v6, 5 }
 0xbfb   : > { %v2329_v14 = vsel %vm1408_vm4, %v2321_v7, %v2323_v8  ;;  %v4161_v8 = vld [vmem:[#allocation8 + $0x1] ss:$0 sm:$0xff] }
 0xbfc   : > { %v2330_v16 = vsel %vm1410_vm5, %v2329_v14, %v2325_v9  ;;  %v4189_v9 = vld [vmem:[%s6879_s22 + $0xd0] sm:$0xff] }
 0xbfd   : > { %v2331_v17 = vsel %vm1412_vm6, %v2330_v16, %v2327_v13  ;;  %v4190_v13 = vld [vmem:[%s6879_s22 + $0xd8] sm:$0xff]  ;;  %v4191_v16 = vld [vmem:[%s6879_s22 + $0xe0] sm:$0xff] }
 0xbfe   : > { %v2332_v18 = vsel %vm1414_vm7, %v2315_v6, %v2331_v17  ;;  %v4188_v6 = vld [vmem:[%s6879_s22 + $0xc8] sm:$0xff]  ;;  %v4992_v32 = vpack.c.bf16 %v4190_v13, %v4189_v9 }
 0xbff   : > { %v2336_v22 = vrot.slane %v2332_v18, 5  ;;  %v4989_v7 = vpack.c.bf16 %v4188_v6, %v4187_v26  ;;  %v4192_v17 = vld [vmem:[%s6879_s22 + $0xe8] sm:$0xff] }
 0xc00   : > { %v4995_v18 = vpack.c.bf16 %v4192_v17, %v4191_v16 }
 0xc01   : > { %v2338_v25 = vsel %vm1412_vm6, 0.0, %v2336_v22 }
 0xc02   : > { %v2349_v29 = vmul.f32 %v2348_v19, %v2338_v25  ;;  %v2358_v30 = vmul.f32 %v2357_v20, %v2338_v25  ;;  %v2343_v31 = vmul.f32 %v2342_v23, %v2338_v25  ;;  %v2367_v36 = vmul.f32 %v2366_v24, %v2338_v25  ;;  %v4193_v19 = vld [vmem:[%s6879_s22 + $0xf0] sm:$0xff]  ;;  %v4194_v20 = vld [vmem:[%s6879_s22 + $0xf8] sm:$0xff] }
 0xc03   : > { %v4998_v23 = vpack.c.bf16 %v4194_v20, %v4193_v19  ;;  %v2833_v19 = vsub.f32 0.0, %v6551_v11 }
 0xc04   : > { %v2351_v33 = vrot.slane %v2349_v29, 1  ;;  %v2360_v37 = vrot.slane %v2358_v30, 2  ;;  %v2369_v40 = vrot.slane %v2367_v36, 3 }
 0xc06   : > { %v2353_v38 = vadd.f32 %v2351_v33, %v2343_v31 }
 0xc08   : > { %v2362_v39 = vadd.f32 %v2360_v37, %v2353_v38 }
 0xc0a   : > { %v2371_v42 = vadd.f32 %v2369_v40, %v2362_v39 }
 0xc0c   : > { %v2380_v43 = vadd.f32 %v4144_v41, %v2371_v42  ;;  %v2579_v42 = vld [vmem:[#allocation10 + $0x8] sm:$0xff] }
 0xc0e   : > { %v2381_v44 = vsub.f32 0.0, %v2380_v43 }
 0xc10   : > { %v2382_v45 = vmul.f32 1.442695, %v2381_v44 }
 0xc12   : > { %5353 = vpow2.f32 %v2382_v45 }
 0xc1c   : > { %v5354_v46 = vpop.eup %5353 }
 0xc1d   : > { %v2384_v47 = vadd.f32 1.0, %v5354_v46 }
 0xc1f   : > { %5355 = vrcp.f32 %v2384_v47 }
 0xc29   : > { %v5356_v48 = vpop.eup %5355 }
 0xc2a   : > { %v6562_v49 = vmul.f32 %v5356_v48, %v2380_v43 }
 0xc2c   : > { %4636 = vmatmul.mubr.f32.vlgmr.msra.gmra.mrb[6].mxu0 %v6562_v49  ;;  %4671 = vmatmul.mubr.f32.vlgmr.msra.gmra.mrb[10].mxu1 %v6562_v49 }
 0xc2d   : > { %4705 = vmatprep.mubr.msk.f32.mxu0 %vm5832_vm1, %v5833_v12  ;;  %4716 = vmatprep.mubr.msk.f32.mxu1 %vm5832_vm1, %v5833_v12 }
 0xc2e   : > { %4978 = vmatpush3.bf16.msra.mxu0 %v4977_v60 }
 0xc2f   : > { %4979 = vmatprep.subr.bf16.mxu0 %v5831_v10 }
 0xc32   : > { %4981 = vmatpush3.bf16.msra.mxu0 %v4980_v0 }
 0xc33   : > { %4982 = vmatprep.subr.bf16.mxu0 %v5831_v10 }
 0xc36   : > { %4984 = vmatpush3.bf16.msra.mxu0 %v4983_v2 }
 0xc37   : > { %4985 = vmatprep.subr.bf16.mxu0 %v5831_v10 }
 0xc3a   : > { %4987 = vmatpush3.bf16.msra.mxu0 %v4986_v5 }
 0xc3b   : > { %4988 = vmatprep.subr.bf16.mxu0 %v5831_v10 }
 0xc3e   : > { %4990 = vmatpush3.bf16.msra.mxu0 %v4989_v7 }
 0xc3f   : > { %4991 = vmatprep.subr.bf16.mxu0 %v5831_v10 }
 0xc42   : > { %4993 = vmatpush3.bf16.msra.mxu0 %v4992_v32 }
 0xc43   : > { %4994 = vmatprep.subr.bf16.mxu0 %v5831_v10 }
 0xc46   : > { %4996 = vmatpush3.bf16.msra.mxu0 %v4995_v18 }
 0xc47   : > { %4997 = vmatprep.subr.bf16.mxu0 %v5831_v10 }
 0xc4a   : > { %4999 = vmatpush3.bf16.msra.mxu0 %v4998_v23 }
 0xcff   : > { %v2478_v50 = vpop.f32.mrb[6].mxu0  ;;  %v2574_v51 = vpop.f32.mrb[10].mxu1 }
 0xd00   : > { %v2641_v53 = vrot.slane %v2574_v51, %v6379_v34  ;;  %v4637_v54 = vpop.f32.mrb[7].mxu0  ;;  %v4672_v55 = vpop.f32.mrb[11].mxu1  ;;  %v2648_v56 = vrot.slane %v2574_v51, %v6371_v27  ;;  %v2655_v57 = vrot.slane %v2574_v51, %v6374_v28  ;;  %v2662_v62 = vrot.slane %v2574_v51, %v6382_v35 }
 0xd01   : > { %v2479_v14 = vadd.f32 %v4161_v8, %v2478_v50 }
 0xd02   : > { %2668 = vbcast.lane.b32.xlu1 %v2641_v53, 272  ;;  %2643 = vbcast.lane.b32.xlu0 %v2641_v53, 256 }
 0xd03   : > { %v2483_v22 = vand.u32 2147483647, %v2479_v14  ;;  %v2482_v36 = vmax.f32 %v2479_v14, 0.0 }
 0xd05   : > { %v2484_v24 = vsub.f32 0.0, %v2483_v22 }
 0xd06   : > { %2650 = vbcast.lane.b32.xlu1 %v2648_v56, 256  ;;  %2672 = vbcast.lane.b32.xlu0 %v2648_v56, 272 }
 0xd07   : > { %v2485_v25 = vmul.f32 1.442695, %v2484_v24 }
 0xd09   : > { %5357 = vpow2.f32 %v2485_v25 }
 0xd0a   : > { %2657 = vbcast.lane.b32.xlu1 %v2655_v57, 256  ;;  %2676 = vbcast.lane.b32.xlu0 %v2655_v57, 272 }
 0xd0e   : > { %2664 = vbcast.lane.b32.xlu1 %v2662_v62, 256  ;;  %2680 = vbcast.lane.b32.xlu0 %v2662_v62, 272 }
 0xd12   : > { %2688 = vbcast.lane.b32.xlu1 %v2641_v53, 264  ;;  %2692 = vbcast.lane.b32.xlu0 %v2648_v56, 264 }
 0xd13   : > { %v5358_v29 = vpop.eup %5357 }
 0xd14   : > { %v2487_v30 = vadd.f32 1.0, %v5358_v29  ;;  %v2834_v29 = vmul.f32 1.442695, %v2833_v19 }
 0xd16   : > { %2704 = vbcast.lane.b32.xlu1 %v2641_v53, 280  ;;  %2708 = vbcast.lane.b32.xlu0 %v2648_v56, 280  ;;  %5359 = vlog2.f32 %v2487_v30 }
 0xd1a   : > { %2696 = vbcast.lane.b32.xlu1 %v2655_v57, 264  ;;  %2712 = vbcast.lane.b32.xlu0 %v2655_v57, 280 }
 0xd1e   : > { %2700 = vbcast.lane.b32.xlu1 %v2662_v62, 264  ;;  %2716 = vbcast.lane.b32.xlu0 %v2662_v62, 280 }
 0xd20   : > { %v5360_v31 = vpop.eup %5359 }
 0xd21   : > { %v2489_v33 = vmul.f32 0.6931472, %v5360_v31 }
 0xd23   : > { %v2490_v37 = vadd.f32 %v2489_v33, %v2482_v36 }
 0xd25   : > { %v2587_v38 = vrot.slane %v2490_v37, %v6428_v52  ;;  %v2637_v47 = vmul.f32 %v2490_v37, %v6562_v49 }
 0xd27   : > { %v2595_v39 = vrot.slane %v2587_v38, %v6428_v52  ;;  %v2588_v40 = vcombine.high %v2587_v38, %v2587_v38  ;;  %v2729_v51 = vrot.slane %v2637_v47, %v6428_v52 }
 0xd29   : > { %v2608_v41 = vrot.slane %v2595_v39, %v6379_v34  ;;  %v2602_v43 = vrot.slane %v2588_v40, %v6428_v52  ;;  %v2603_v48 = vcombine.high %v2595_v39, %v2595_v39  ;;  %v2737_v55 = vrot.slane %v2729_v51, %v6428_v52 }
 0xd2a   : > { %v2730_v58 = vcombine.high %v2729_v51, %v2729_v51 }
 0xd2b   : > { %v2625_v44 = vmul.f32 %v2608_v41, %v2579_v42  ;;  %v2612_v45 = vrot.slane %v2602_v43, %v6379_v34  ;;  %v2616_v53 = vrot.slane %v2603_v48, %v6379_v34  ;;  %v2604_v56 = vcombine.high %v2602_v43, %v2602_v43 }
 0xd2c   : > { %v2750_v63 = vrot.slane %v2737_v55, %v6379_v34  ;;  %v2744_v2 = vrot.slane %v2730_v58, %v6428_v52  ;;  %v2745_v18 = vcombine.high %v2737_v55, %v2737_v55 }
 0xd2d   : > { %v2629_v46 = vmul.f32 1.442695, %v2625_v44  ;;  %v2626_v50 = vmul.f32 %v2612_v45, %v2579_v42  ;;  %v2627_v57 = vmul.f32 %v2616_v53, %v2579_v42  ;;  %v2620_v61 = vrot.slane %v2604_v56, %v6379_v34 }
 0xd2e   : > { %v2754_v8 = vrot.slane %v2744_v2, %v6379_v34  ;;  %v2758_v24 = vrot.slane %v2745_v18, %v6379_v34  ;;  %v2746_v37 = vcombine.high %v2744_v2, %v2744_v2 }
 0xd2f   : > { %5361 = vpow2.f32 %v2629_v46  ;;  %v2631_v54 = vmul.f32 1.442695, %v2626_v50  ;;  %v2633_v0 = vmul.f32 1.442695, %v2627_v57  ;;  %v2628_v6 = vmul.f32 %v2620_v61, %v2579_v42 }
 0xd30   : > { %v2762_v44 = vrot.slane %v2746_v37, %v6379_v34 }
 0xd31   : > { %5363 = vpow2.f32 %v2631_v54  ;;  %v2635_v17 = vmul.f32 1.442695, %v2628_v6 }
 0xd32   : > { %5365 = vpow2.f32 %v2633_v0 }
 0xd33   : > { %5367 = vpow2.f32 %v2635_v17 }
 0xd34   : > { %5369 = vpow2.f32 %v2834_v29 }
 0xd39   : > { %v5362_v59 = vpop.eup %5361 }
 0xd3a   : > { %v2771_v3 = vmul.f32 0.0, %v5362_v59 }
 0xd3b   : > { %v5364_v9 = vpop.eup %5363 }
 0xd3c   : > { %v5366_v25 = vpop.eup %5365 }
 0xd3d   : > { %v5368_v47 = vpop.eup %5367 }
 0xd3e   : > { %v5370_v2 = vpop.eup %5369 }
 0xd74   : > { %v2669_v60 = vpop.permute.xlu1 %2668  ;;  %v2644_v62 = vpop.permute.xlu0 %2643 }
 0xd75   : > { %v2682_v1 = vsel %vm1414_vm7, %v2644_v62, %v2669_v60 }
 0xd76   : > { %v2767_v21 = vmul.f32 %v2750_v63, %v2682_v1 }
 0xd78   : > { %v2651_v4 = vpop.permute.xlu1 %2650  ;;  %v2673_v5 = vpop.permute.xlu0 %2672  ;;  %v2772_v26 = vadd.f32 %v2771_v3, %v2767_v21 }
 0xd79   : > { %v2683_v7 = vsel %vm1414_vm7, %v2651_v4, %v2673_v5 }
 0xd7a   : > { %v2768_v13 = vmul.f32 %v2754_v8, %v2683_v7  ;;  %v2780_v16 = vmul.f32 %v5364_v9, %v2772_v26  ;;  %v2836_v8 = vadd.f32 1.0, %v5370_v2  ;;  %v4199_v2 = vld [vmem:[%s6880_s0 + $0x40] sm:$0xff] }
 0xd7c   : > { %v2658_v14 = vpop.permute.xlu1 %2657  ;;  %v2677_v32 = vpop.permute.xlu0 %2676  ;;  %v2781_v22 = vadd.f32 %v2780_v16, %v2768_v13  ;;  %5371 = vrcp.f32 %v2836_v8  ;;  %v4202_v8 = vld [vmem:[%s6880_s0 + $0x58] sm:$0xff] }
 0xd7d   : > { %v2684_v23 = vsel %vm1414_vm7, %v2658_v14, %v2677_v32 }
 0xd7e   : > { %v2769_v30 = vmul.f32 %v2758_v24, %v2684_v23  ;;  %v2789_v36 = vmul.f32 %v5366_v25, %v2781_v22 }
 0xd80   : > { %v2665_v52 = vpop.permute.xlu1 %2664  ;;  %v2681_v20 = vpop.permute.xlu0 %2680  ;;  %v2790_v40 = vadd.f32 %v2789_v36, %v2769_v30 }
 0xd81   : > { %v2685_v41 = vsel %vm1414_vm7, %v2665_v52, %v2681_v20 }
 0xd82   : > { %v2770_v48 = vmul.f32 %v2762_v44, %v2685_v41  ;;  %v2798_v55 = vmul.f32 %v5368_v47, %v2790_v40 }
 0xd84   : > { %v2689_v31 = vpop.permute.xlu1 %2688  ;;  %v2693_v33 = vpop.permute.xlu0 %2692  ;;  %v2799_v1 = vadd.f32 %v2798_v55, %v2770_v48 }
 0xd88   : > { %v2705_v38 = vpop.permute.xlu1 %2704  ;;  %v2709_v39 = vpop.permute.xlu0 %2708 }
 0xd89   : > { %v2718_v42 = vsel %vm1414_vm7, %v2689_v31, %v2705_v38  ;;  %v2719_v43 = vsel %vm1414_vm7, %v2693_v33, %v2709_v39  ;;  %v5372_v39 = vpop.eup %5371 }
 0xd8a   : > { %v2773_v45 = vmul.f32 %v2772_v26, %v2718_v42  ;;  %v2782_v46 = vmul.f32 %v2781_v22, %v2719_v43  ;;  %v4178_v22 = vld [vmem:[#allocation11 + $0x1] ss:$0 sm:$0xff]  ;;  %v2838_v43 = vmul.f32 %v5372_v39, %v6551_v11 }
 0xd8b   : > { %v2818_v29 = vmul.f32 %v4178_v22, %v6562_v49 }
 0xd8c   : > { %v2774_v50 = vrot.slane %v2773_v45, 4  ;;  %v2783_v51 = vrot.slane %v2782_v46, 4  ;;  %v2697_v53 = vpop.permute.xlu1 %2696  ;;  %v2713_v54 = vpop.permute.xlu0 %2712 }
 0xd8d   : > { %v2720_v56 = vsel %vm1414_vm7, %v2697_v53, %v2713_v54 }
 0xd8e   : > { %v2775_v57 = vadd.f32 %v2774_v50, %v2773_v45  ;;  %v2784_v58 = vadd.f32 %v2783_v51, %v2782_v46  ;;  %v2791_v59 = vmul.f32 %v2790_v40, %v2720_v56  ;;  %v2960_v56 = vld [vmem:[#allocation16 + $0x20] sm:$0xff] }
 0xd90   : > { %v2776_v60 = vrot.slane %v2775_v57, 2  ;;  %v2785_v62 = vrot.slane %v2784_v58, 2  ;;  %v2792_v63 = vrot.slane %v2791_v59, 4  ;;  %v2701_v61 = vpop.permute.xlu1 %2700  ;;  %v2717_v0 = vpop.permute.xlu0 %2716 }
 0xd91   : > { %v2721_v21 = vsel %vm1414_vm7, %v2701_v61, %v2717_v0 }
 0xd92   : > { %v2777_v3 = vadd.f32 %v2776_v60, %v2775_v57  ;;  %v2786_v4 = vadd.f32 %v2785_v62, %v2784_v58  ;;  %v2793_v5 = vadd.f32 %v2792_v63, %v2791_v59  ;;  %v2800_v26 = vmul.f32 %v2799_v1, %v2721_v21  ;;  %v2961_v57 = vld [vmem:[#allocation16 + $0x28] sm:$0xff]  ;;  %v2962_v59 = vld [vmem:[#allocation16 + $0x30] sm:$0xff]  ;;  %v2963_v60 = vld [vmem:[#allocation16 + $0x38] sm:$0xff] }
 0xd93   : > { %v5001_v58 = vpack.c.bf16 %v2961_v57, %v2960_v56  ;;  %v4195_v1 = vld [vmem:[#allocation13 + $0x1] ss:$0 sm:$0xff]  ;;  %v3207_v57 = vld [vmem:[%s6881_s28 + $0x8] sm:$0xff] }
 0xd94   : > { %v2794_v6 = vrot.slane %v2793_v5, 2  ;;  %v2801_v7 = vrot.slane %v2800_v26, 4  ;;  %v2778_v9 = vrot.slane %v2777_v3, 1  ;;  %v2787_v13 = vrot.slane %v2786_v4, 1  ;;  %v3206_v56 = vld [vmem:[%s6881_s28] sm:$0xff] }
 0xd95   : > { %5002 = vmatpush3.bf16.msra.mxu1 %v5001_v58  ;;  %v3208_v58 = vld [vmem:[%s6881_s28 + $0x10] sm:$0xff] }
 0xd96   : > { %v2795_v14 = vadd.f32 %v2794_v6, %v2793_v5  ;;  %v2802_v32 = vadd.f32 %v2801_v7, %v2800_v26  ;;  %v2779_v18 = vadd.f32 %v2778_v9, %v2777_v3  ;;  %v2788_v19 = vadd.f32 %v2787_v13, %v2786_v4  ;;  %5003 = vmatprep.subr.bf16.mxu1 %v5831_v10  ;;  %v4200_v3 = vld [vmem:[%s6880_s0 + $0x48] sm:$0xff]  ;;  %v4196_v4 = vld [vmem:[#allocation14 + $0x1] ss:$0 sm:$0xff]  ;;  %v4201_v7 = vld [vmem:[%s6880_s0 + $0x50] sm:$0xff] }
 0xd97   : > { %v5007_v26 = vpack.c.bf16 %v4200_v3, %v4199_v2  ;;  %v5010_v9 = vpack.c.bf16 %v4202_v8, %v4201_v7  ;;  %v4203_v13 = vld [vmem:[%s6880_s0 + $0x60] sm:$0xff] }
 0xd98   : > { %v2796_v16 = vrot.slane %v2795_v14, 1  ;;  %v2803_v17 = vrot.slane %v2802_v32, 2  ;;  %v2807_v24 = vsel %vm1408_vm4, %v2779_v18, %v2788_v19  ;;  %v4197_v19 = vld [vmem:[#allocation17 + $0x1] ss:$0 sm:$0xff]  ;;  %v4212_v2 = vld [vmem:[%s6883_s13] ss:$0 sm:$0xff] }
 0xd9a   : > { %v2804_v52 = vadd.f32 %v2803_v17, %v2802_v32  ;;  %v2797_v20 = vadd.f32 %v2796_v16, %v2795_v14  ;;  %v4204_v14 = vld [vmem:[%s6880_s0 + $0x68] sm:$0xff]  ;;  %v4205_v16 = vld [vmem:[%s6880_s0 + $0x70] sm:$0xff]  ;;  %v4206_v17 = vld [vmem:[%s6880_s0 + $0x78] sm:$0xff] }
 0xd9b   : > { %v5013_v32 = vpack.c.bf16 %v4204_v14, %v4203_v13  ;;  %v5016_v18 = vpack.c.bf16 %v4206_v17, %v4205_v16  ;;  %v3307_v16 = vld [vmem:[%s6884_s26 + $0x28] sm:$0xff]  ;;  %v3302_v17 = vld [vmem:[%s6884_s26] sm:$0xff] }
 0xd9c   : > { %v2805_v23 = vrot.slane %v2804_v52, 1  ;;  %v2808_v30 = vsel %vm1410_vm5, %v2807_v24, %v2797_v20  ;;  %v4207_v24 = vld [vmem:[#allocation19 + $0x1] ss:$0 sm:$0xff] }
 0xd9e   : > { %v2806_v25 = vadd.f32 %v2805_v23, %v2804_v52 }
 0xda0   : > { %v2809_v31 = vsel %vm1412_vm6, %v2808_v30, %v2806_v25 }
 0xda1   : > { %v2819_v33 = vadd.f32 %v2818_v29, %v2809_v31 }
 0xda3   : > { %v2821_v36 = vrot.slane %v2819_v33, 3  ;;  %v2823_v37 = vrot.slane %v2819_v33, 1  ;;  %v2825_v38 = vrot.slane %v2819_v33, 7  ;;  %v2827_v40 = vrot.slane %v2819_v33, 5 }
 0xda5   : > { %v2829_v41 = vsel %vm1408_vm4, %v2821_v36, %v2823_v37 }
 0xda6   : > { %v2830_v42 = vsel %vm1410_vm5, %v2829_v41, %v2825_v38 }
 0xda7   : > { %v2831_v44 = vsel %vm1412_vm6, %v2830_v42, %v2827_v40 }
 0xda8   : > { %v2832_v49 = vsel %vm1414_vm7, %v2819_v33, %v2831_v44 }
 0xda9   : > { %v2839_v45 = vmul.f32 %v2838_v43, %v2832_v49  ;;  %v4209_v49 = vld [vmem:[#allocation20 + $0x1] ss:$0 sm:$0xff] }
 0xdab   : > { %4706 = vmatmul.mubr.f32.vlgmr.msra.gmra.mrb[8].mxu0 %v2839_v45 }
 0xdac   : > { %3404 = vmatprep.mubr.f32.mxu0 %v5833_v12 }
 0xe7e   : > { %v2923_v46 = vpop.f32.mrb[8].mxu0 }
 0xe7f   : > { %v2927_v47 = vadd.f32 %v2923_v46, %v6497_v15  ;;  %v4707_v48 = vpop.f32.mrb[9].mxu0  ;;  %v5004_v15 = vpack.c.bf16 %v2963_v60, %v2962_v59  ;;  %v4210_v46 = vld [vmem:[#allocation22 + $0x1] ss:$0 sm:$0xff]  ;;  %v5019_v59 = vpack.c.bf16 %v3207_v57, %v3206_v56  ;;  %v3209_v60 = vld [vmem:[%s6881_s28 + $0x18] sm:$0xff] }
 0xe81   : > { %v2932_v50 = vsel %vm2005_vm8, %v2927_v47, 0.0  ;;  %5005 = vmatpush3.bf16.msra.mxu1 %v5004_v15  ;;  %v5022_v15 = vpack.c.bf16 %v3209_v60, %v3208_v58  ;;  %v3486_v58 = vld [vmem:[%s6885_s23] sm:$0xff] }
 0xe82   : > { %2933 = vadd.xlane.f32.xlu1 %v2932_v50  ;;  %5006 = vmatprep.subr.bf16.mxu1 %v5831_v10  ;;  %v3518_v60 = vld [vmem:[%s6885_s23 + $0x100] sm:$0xff] }
 0xf0f   : > { %v2934_v51 = vpop.xlane.xlu1 %2933 }
 0xf10   : > { %v2935_v53 = vmul.f32 0.03125, %v2934_v51 }
 0xf12   : > { %v2936_v54 = vsub.f32 %v2927_v47, %v2935_v53 }
 0xf14   : > { %v2937_v55 = vmul.f32 %v2936_v54, %v2936_v54 }
 0xf16   : > { %v2938_v11 = vsel %vm2005_vm8, %v2937_v55, 0.0 }
 0xf17   : > { %2939 = vadd.xlane.f32.xlu0 %v2938_v11 }
 0xfa4   : > { %v2940_v62 = vpop.xlane.xlu0 %2939 }
 0xfa5   : > { %v2941_v63 = vmul.f32 0.03125, %v2940_v62 }
 0xfa7   : > { %v2942_v61 = vadd.f32 1e-05, %v2941_v63 }
 0xfa9   : > { %5373 = vrsqrt.f32 %v2942_v61 }
 0xfb3   : > { %v5374_v0 = vpop.eup %5373 }
 0xfb4   : > { %v2944_v21 = vmul.f32 %v5374_v0, %v2936_v54 }
 0xfb6   : > { %v2951_v5 = vmul.f32 %v4195_v1, %v2944_v21  ;;  %v4211_v1 = vld [vmem:[%s6882_s2] ss:$0 sm:$0xff]  ;;  %s4218_s2 = sshll.u32 %s6892_s10, 4 }
 0xfb7   : > { %s1213_s13 = scalar_lea.vmem %s6887_s11, %s4218_s2  ;;  %s6889_s11 = sld [smem:[#allocation47_spill]] }
 0xfb8   : > { %v2958_v6 = vadd.f32 %v4196_v4, %v2951_v5  ;;  %s1216_s2 = scalar_lea.vmem %s6007_s4, %s6892_s10 }
 0xfba   : > { %4717 = vmatmul.mubr.msk.f32.vlgmr.msra.gmra.mrb[12].mxu1 %vm1324_vm3, %v2958_v6 }
 0xfbb   : > { %5008 = vmatpush3.bf16.msra.mxu1 %v5007_v26  ;;  %4735 = vmatprep.mubr.msk.f32.mxu1 %vm5832_vm1, %v5833_v12 }
 0xfbc   : > { %5009 = vmatprep.subr.bf16.mxu1 %v5831_v10 }
 0xfbf   : > { %5011 = vmatpush3.bf16.msra.mxu1 %v5010_v9 }
 0xfc0   : > { %5012 = vmatprep.subr.bf16.mxu1 %v5831_v10 }
 0xfc3   : > { %5014 = vmatpush3.bf16.msra.mxu1 %v5013_v32  ;;  %v3303_v32 = vld [vmem:[%s6884_s26 + $0x8] sm:$0xff] }
 0xfc4   : > { %5015 = vmatprep.subr.bf16.mxu1 %v5831_v10 }
 0xfc7   : > { %5017 = vmatpush3.bf16.msra.mxu1 %v5016_v18  ;;  %v5024_v18 = vpack.c.bf16 %v3307_v16, %v3303_v32  ;;  %v3538_v32 = vld [vmem:[%s6885_s23 + $0x1a0] sm:$0xff]  ;;  %v3539_v16 = vld [vmem:[%s6885_s23 + $0x1a8] sm:$0xff] }
 0xfc8   : > { %5018 = vmatprep.subr.bf16.mxu1 %v5831_v10 }
 0xfc9   : > { %5025 = vmatprep.subr.bf16.mxu0 %v5024_v18 }
0x108d   : > { %v3041_v52 = vpop.f32.mrb[12].mxu1 }
0x108e   : > { %v3042_v20 = vadd.f32 %v4197_v19, %v3041_v52  ;;  %v4718_v22 = vpop.f32.mrb[13].mxu1  ;;  %v3306_v19 = vld [vmem:[%s6884_s26 + $0x20] sm:$0xff]  ;;  %v3305_v52 = vld [vmem:[%s6884_s26 + $0x18] sm:$0xff] }
0x108f   : > { %v5026_v22 = vpack.c.bf16 %v3306_v19, %v3302_v17  ;;  %v3490_v19 = vld [vmem:[%s6885_s23 + $0x20] sm:$0xff] }
0x1090   : > { %v3045_v23 = vmax.f32 %v3042_v20, 0.0  ;;  %v3309_v20 = vld [vmem:[%s6884_s26 + $0x38] sm:$0xff] }
0x1091   : > { %5027 = vmatpush1.bf16.msra.mxu0 %v5026_v22  ;;  %v5072_v22 = vpack.c.bf16 %v3539_v16, %v3538_v32  ;;  %v3531_v32 = vld [vmem:[%s6885_s23 + $0x168] sm:$0xff] }
0x1092   : > { %4736 = vmatmul.mubr.msk.f32.vlgmr.msra.gmra.mrb[14].mxu1 %vm1414_vm7, %v3045_v23  ;;  %v5028_v23 = vpack.c.bf16 %v3309_v20, %v3305_v52  ;;  %v3491_v52 = vld [vmem:[%s6885_s23 + $0x28] sm:$0xff] }
0x1093   : > { %4746 = vmatprep.mubr.msk.f32.mxu1 %vm5832_vm1, %v5833_v12  ;;  %5020 = vmatpush3.bf16.msra.mxu1 %v5019_v59  ;;  %v3487_v59 = vld [vmem:[%s6885_s23 + $0x8] sm:$0xff] }
0x1094   : > { %5021 = vmatprep.subr.bf16.mxu1 %v5831_v10 }
0x1097   : > { %5023 = vmatpush3.bf16.msra.mxu1 %v5022_v15  ;;  %v3519_v15 = vld [vmem:[%s6885_s23 + $0x108] sm:$0xff] }
0x1098   : > { %5029 = vmatprep.subr.bf16.mxu1 %v5028_v23  ;;  %v3522_v23 = vld [vmem:[%s6885_s23 + $0x120] sm:$0xff] }
0x1165   : > { %v3132_v25 = vpop.f32.mrb[14].mxu1 }
0x1166   : > { %v3133_v29 = vadd.f32 %v4207_v24, %v3132_v25  ;;  %v4737_v30 = vpop.f32.mrb[15].mxu1  ;;  %v3304_v24 = vld [vmem:[%s6884_s26 + $0x10] sm:$0xff] }
0x1167   : > { %v3308_v25 = vld [vmem:[%s6884_s26 + $0x30] sm:$0xff] }
0x1168   : > { %v3136_v31 = vadd.f32 %v3133_v29, %v2958_v6  ;;  %v3311_v29 = vld [vmem:[%s6884_s26 + $0x48] sm:$0xff]  ;;  %v5030_v30 = vpack.c.bf16 %v3308_v25, %v3304_v24  ;;  %v3508_v25 = vld [vmem:[%s6885_s23 + $0xb0] sm:$0xff] }
0x1169   : > { %3344 = vmatprep.subr.mxu0 %v3311_v29  ;;  %v3523_v24 = vld [vmem:[%s6885_s23 + $0x128] sm:$0xff]  ;;  %v3509_v29 = vld [vmem:[%s6885_s23 + $0xb8] sm:$0xff] }
0x116a   : > { %v3141_v33 = vsel %vm2005_vm8, %v3136_v31, 0.0 }
0x116b   : > { %3142 = vadd.xlane.f32.xlu0 %v3141_v33  ;;  %v3310_v33 = vld [vmem:[%s6884_s26 + $0x40] sm:$0xff] }
0x116c   : > { %3345 = vmatpush1.msra.mxu0 %v3310_v33  ;;  %v5042_v33 = vpack.c.bf16 %v3491_v52, %v3490_v19  ;;  %v3548_v19 = vld [vmem:[%s6885_s23 + $0x1f0] sm:$0xff] }
0x11f8   : > { %v3143_v36 = vpop.xlane.xlu0 %3142 }
0x11f9   : > { %v3144_v37 = vmul.f32 0.03125, %v3143_v36  ;;  %v3312_v36 = vld [vmem:[%s6884_s26 + $0x50] sm:$0xff] }
0x11fb   : > { %v3145_v38 = vsub.f32 %v3136_v31, %v3144_v37  ;;  %v3313_v31 = vld [vmem:[%s6884_s26 + $0x58] sm:$0xff]  ;;  %v3502_v37 = vld [vmem:[%s6885_s23 + $0x80] sm:$0xff] }
0x11fd   : > { %v3146_v39 = vmul.f32 %v3145_v38, %v3145_v38 }
0x11ff   : > { %v3147_v40 = vsel %vm2005_vm8, %v3146_v39, 0.0  ;;  %v3534_v39 = vld [vmem:[%s6885_s23 + $0x180] sm:$0xff] }
0x1200   : > { %3148 = vadd.xlane.f32.xlu1 %v3147_v40 }
0x128d   : > { %v3149_v41 = vpop.xlane.xlu1 %3148 }
0x128e   : > { %v3150_v42 = vmul.f32 0.03125, %v3149_v41  ;;  %v3535_v41 = vld [vmem:[%s6885_s23 + $0x188] sm:$0xff] }
0x1290   : > { %v3151_v43 = vadd.f32 1e-05, %v3150_v42  ;;  %v5064_v42 = vpack.c.bf16 %v3535_v41, %v3534_v39  ;;  %v5044_v39 = vpack.c.bf16 %v3509_v29, %v3508_v25  ;;  %v3524_v41 = vld [vmem:[%s6885_s23 + $0x130] sm:$0xff] }
0x1291   : > { %v3532_v29 = vld [vmem:[%s6885_s23 + $0x170] sm:$0xff] }
0x1292   : > { %5375 = vrsqrt.f32 %v3151_v43  ;;  %v3210_v43 = vld [vmem:[%s6886_s8] sm:$0x1]  ;;  %s6888_s8 = sld [smem:[#allocation44_spill]] }
0x129c   : > { %v5376_v44 = vpop.eup %5375 }
0x129d   : > { %v3153_v45 = vmul.f32 %v5376_v44, %v3145_v38  ;;  %v3503_v38 = vld [vmem:[%s6885_s23 + $0x88] sm:$0xff] }
0x129e   : > { %v5032_v40 = vpack.c.bf16 %v3503_v38, %v3502_v37  ;;  %v3492_v37 = vld [vmem:[%s6885_s23 + $0x30] sm:$0xff]  ;;  %v3493_v38 = vld [vmem:[%s6885_s23 + $0x38] sm:$0xff] }
0x129f   : > { %v3160_v47 = vmul.f32 %v4209_v49, %v3153_v45 }
0x12a0   : > { %5033 = vmatprep.subr.bf16.mxu0 %v5032_v40 }
0x12a1   : > { %v3167_v48 = vadd.f32 %v4210_v46, %v3160_v47  ;;  %v3284_v46 = vld [vmem:[%s1213_s13] sm:$0xff]  ;;  %v3285_v47 = vld [vmem:[%s1213_s13 + $0x8] sm:$0xff] }
0x12a3   : > { %v3170_v50 = vsel %vm2005_vm8, %v3167_v48, 0.0 }
0x12a4   : > { %3171 = vadd.xlane.f32.xlu0 %v3170_v50  ;;  %v3288_v50 = vsel %vm3286_vm9, %v3285_v47, 0.0 }
0x1331   : > { %v3172_v51 = vpop.xlane.xlu0 %3171 }
0x1332   : > { %v3173_v53 = vmul.f32 0.03125, %v3172_v51 }
0x1334   : > { %v3174_v54 = vsub.f32 %v3167_v48, %v3173_v53  ;;  %v3287_v48 = vsel %vm3286_vm9, %v3284_v46, 0.0  ;;  %v5046_v46 = vpack.c.bf16 %v3493_v38, %v3492_v37 }
0x1335   : > { %v3289_v51 = vadd.f32 %v3288_v50, %v3287_v48  ;;  %v3494_v48 = vld [vmem:[%s6885_s23 + $0x40] sm:$0xff]  ;;  %v3495_v50 = vld [vmem:[%s6885_s23 + $0x48] sm:$0xff] }
0x1336   : > { %v3175_v55 = vmul.f32 %v3174_v54, %v3174_v54 }
0x1337   : > { %v3290_v53 = vrot.slane %v3289_v51, 4 }
0x1338   : > { %v3176_v11 = vsel %vm2005_vm8, %v3175_v55, 0.0 }
0x1339   : > { %3177 = vadd.xlane.f32.xlu1 %v3176_v11 }
0x13c6   : > { %v3178_v62 = vpop.xlane.xlu1 %3177 }
0x13c7   : > { %v3179_v63 = vmul.f32 0.03125, %v3178_v62  ;;  %v3504_v62 = vld [vmem:[%s6885_s23 + $0x90] sm:$0xff] }
0x13c9   : > { %v3180_v61 = vadd.f32 1e-05, %v3179_v63 }
0x13cb   : > { %5377 = vrsqrt.f32 %v3180_v61  ;;  %v3505_v61 = vld [vmem:[%s6885_s23 + $0x98] sm:$0xff] }
0x13d5   : > { %v5378_v0 = vpop.eup %5377 }
0x13d6   : > { %v3182_v21 = vmul.f32 %v5378_v0, %v3174_v54  ;;  %v3291_v54 = vadd.f32 %v3290_v53, %v3289_v51  ;;  %v3536_v0 = vld [vmem:[%s6885_s23 + $0x190] sm:$0xff] }
0x13d8   : > { %v3189_v3 = vmul.f32 %v4211_v1, %v3182_v21  ;;  %v3292_v55 = vrot.slane %v3291_v54, 2  ;;  %v3537_v1 = vld [vmem:[%s6885_s23 + $0x198] sm:$0xff]  ;;  %v5034_v21 = vpack.c.bf16 %v3487_v59, %v3486_v58  ;;  %v5050_v59 = vpack.c.bf16 %v3495_v50, %v3494_v48 }
0x13d9   : > { %v3545_v58 = vld [vmem:[%s6885_s23 + $0x1d8] sm:$0xff] }
0x13da   : > { %v3196_v4 = vadd.f32 %v4212_v2, %v3189_v3  ;;  %v3293_v11 = vadd.f32 %v3292_v55, %v3291_v54  ;;  %v5066_v2 = vpack.c.bf16 %v3519_v15, %v3518_v60  ;;  %v3488_v3 = vld [vmem:[%s6885_s23 + $0x10] sm:$0xff]  ;;  %v3526_v54 = vld [vmem:[%s6885_s23 + $0x140] sm:$0xff]  ;;  %v3527_v55 = vld [vmem:[%s6885_s23 + $0x148] sm:$0xff] }
0x13db   : > { %v5082_v60 = vpack.c.bf16 %v3527_v55, %v3526_v54  ;;  %v3496_v15 = vld [vmem:[%s6885_s23 + $0x50] sm:$0xff]  ;;  %v3696_v55 = vld [vmem:[%s6889_s11 + $0x20] sm:$0xff] }
0x13dc   : > { %v3197_v5 = vsel %vm2005_vm8, %v3196_v4, 0.0  ;;  %v3294_v56 = vrot.slane %v3293_v11, 1  ;;  %v3489_v4 = vld [vmem:[%s6885_s23 + $0x18] sm:$0xff] }
0x13dd   : > { %v3198_v26 = vrot.slane %v3197_v5, 4  ;;  %v5038_v17 = vpack.c.bf16 %v3489_v4, %v3488_v3  ;;  %v3546_v3 = vld [vmem:[%s6885_s23 + $0x1e0] sm:$0xff]  ;;  %v3547_v4 = vld [vmem:[%s6885_s23 + $0x1e8] sm:$0xff] }
0x13de   : > { %v3295_v57 = vadd.f32 %v3294_v56, %v3293_v11  ;;  %v3512_v11 = vld [vmem:[%s6885_s23 + $0xd0] sm:$0xff]  ;;  %v3513_v56 = vld [vmem:[%s6885_s23 + $0xd8] sm:$0xff] }
0x13df   : > { %v3199_v6 = vadd.f32 %v3198_v26, %v3197_v5  ;;  %v5036_v26 = vpack.c.bf16 %v3505_v61, %v3504_v62  ;;  %v3497_v62 = vld [vmem:[%s6885_s23 + $0x58] sm:$0xff] }
0x13e0   : > { %v3296_v63 = vmul.f32 0.0625, %v3295_v57  ;;  %v3544_v57 = vld [vmem:[%s6885_s23 + $0x1d0] sm:$0xff] }
0x13e1   : > { %v3200_v7 = vrot.slane %v3199_v6, 2  ;;  %v5084_v61 = vpack.c.bf16 %v3545_v58, %v3544_v57  ;;  %v3698_v57 = vld [vmem:[%s6889_s11 + $0x30] sm:$0xff]  ;;  %v3699_v58 = vld [vmem:[%s6889_s11 + $0x38] sm:$0xff] }
0x13e3   : > { %v3201_v8 = vadd.f32 %v3200_v7, %v3199_v6  ;;  %v5068_v6 = vpack.c.bf16 %v3537_v1, %v3536_v0  ;;  %v3520_v7 = vld [vmem:[%s6885_s23 + $0x110] sm:$0xff]  ;;  %v3529_v1 = vld [vmem:[%s6885_s23 + $0x158] sm:$0xff] }
0x13e4   : > { %v3528_v0 = vld [vmem:[%s6885_s23 + $0x150] sm:$0xff] }
0x13e5   : > { %v3202_v9 = vrot.slane %v3201_v8, 1 }
0x13e7   : > { %v3203_v13 = vadd.f32 %v3202_v9, %v3201_v8  ;;  %v3521_v8 = vld [vmem:[%s6885_s23 + $0x118] sm:$0xff]  ;;  %v3506_v9 = vld [vmem:[%s6885_s23 + $0xa0] sm:$0xff] }
0x13e8   : > { %v5070_v18 = vpack.c.bf16 %v3521_v8, %v3520_v7  ;;  %v5088_v7 = vpack.c.bf16 %v3547_v4, %v3546_v3  ;;  %v3498_v8 = vld [vmem:[%s6885_s23 + $0x60] sm:$0xff]  ;;  %v3707_v3 = vld [vmem:[%s6889_s11 + $0x78] sm:$0xff] }
0x13e9   : > { %v3205_v14 = vmul.f32 0.25, %v3203_v13 }
0x13eb   : > { %4747 = vmatmul.mubr.msk.f32.vlgmr.msra.gmra.mrb[16].mxu1 %vm1324_vm3, %v3205_v14  ;;  %v3507_v14 = vld [vmem:[%s6885_s23 + $0xa8] sm:$0xff] }
0x13ec   : > { %3475 = vmatprep.mubr.f32.mxu1 %v5833_v12  ;;  %5031 = vmatpush1.bf16.msra.mxu1 %v5030_v30  ;;  %v5040_v20 = vpack.c.bf16 %v3507_v14, %v3506_v9  ;;  %v3540_v30 = vld [vmem:[%s6885_s23 + $0x1b0] sm:$0xff]  ;;  %v3499_v9 = vld [vmem:[%s6885_s23 + $0x68] sm:$0xff] }
0x13ed   : > { %3415 = vmatprep.subr.mxu1 %v3313_v31  ;;  %v3541_v31 = vld [vmem:[%s6885_s23 + $0x1b8] sm:$0xff]  ;;  %v5058_v14 = vpack.c.bf16 %v3499_v9, %v3498_v8 }
0x13ee   : > { %v5076_v40 = vpack.c.bf16 %v3541_v31, %v3540_v30  ;;  %v3533_v30 = vld [vmem:[%s6885_s23 + $0x178] sm:$0xff] }
0x13ef   : > { %v5094_v31 = vpack.c.bf16 %v3533_v30, %v3532_v29  ;;  %v3783_v8 = vld [vmem:[%s5999_s21 + $0x18] sm:$0xff]  ;;  %v3793_v29 = vld [vmem:[%s5999_s21 + $0x68] sm:$0xff] }
0x13f0   : > { %3416 = vmatpush1.msra.mxu1 %v3312_v36  ;;  %v5074_v36 = vpack.c.bf16 %v3523_v24, %v3522_v23  ;;  %v3501_v23 = vld [vmem:[%s6885_s23 + $0x78] sm:$0xff] }
0x13f1   : > { %5065 = vmatprep.subr.bf16.mxu1 %v5064_v42  ;;  %v3525_v42 = vld [vmem:[%s6885_s23 + $0x138] sm:$0xff] }
0x13f2   : > { %v5078_v47 = vpack.c.bf16 %v3525_v42, %v3524_v41 }
0x14be   : > { %v3280_v44 = vpop.f32.mrb[16].mxu1 }
0x14bf   : > { %v3281_v49 = vadd.f32 %v3280_v44, %v3210_v43  ;;  %v4748_v45 = vpop.f32.mrb[17].mxu1  ;;  %v3510_v43 = vld [vmem:[%s6885_s23 + $0xc0] sm:$0xff]  ;;  %v3511_v44 = vld [vmem:[%s6885_s23 + $0xc8] sm:$0xff] }
0x14c0   : > { %v3543_v45 = vld [vmem:[%s6885_s23 + $0x1c8] sm:$0xff]  ;;  %v5048_v51 = vpack.c.bf16 %v3511_v44, %v3510_v43 }
0x14c1   : > { %3298 = vrot.lane.b32.xlu0 %v3281_v49, %s5835_s15  ;;  %v3542_v49 = vld [vmem:[%s6885_s23 + $0x1c0] sm:$0xff]  ;;  %s6890_s15 = sld [smem:[#allocation46_spill]] }
0x14c2   : > { %v5080_v53 = vpack.c.bf16 %v3543_v45, %v3542_v49  ;;  %v3692_v45 = vld [vmem:[%s6889_s11] sm:$0xff] }
0x1533   : > { %v3299_v5 = vpop.permute.xlu0 %3298 }
0x1534   : > { %v3301_v13 = vsel %vm3286_vm9, %v3296_v63, %v3299_v5  ;;  %v5052_v63 = vpack.c.bf16 %v3513_v56, %v3512_v11  ;;  %v5054_v5 = vpack.c.bf16 %v3497_v62, %v3496_v15  ;;  %v3697_v11 = vld [vmem:[%s6889_s11 + $0x28] sm:$0xff] }
0x1535   : > { %4214 = vmatmul.mubr.msk.f32.vlgmr.msra.gmra.mrb[10].mxu0 %vm3336_vm10, %v3301_v13  ;;  %4215 = vmatmul.mubr.msk.f32.vlgmr.msra.gmra.mrb[18].mxu1 %vm3336_vm10, %v3301_v13  ;;  %v3530_v13 = vld [vmem:[%s6885_s23 + $0x160] sm:$0xff]  ;;  %v5103_v56 = vpack.c.bf16 %v3697_v11, %v3696_v55  ;;  %v3701_v15 = vld [vmem:[%s6889_s11 + $0x48] sm:$0xff] }
0x1536   : > { %5035 = vmatpush3.bf16.msra.mxu0 %v5034_v21  ;;  %5067 = vmatpush3.bf16.msra.mxu1 %v5066_v2  ;;  %v3514_v21 = vld [vmem:[%s6885_s23 + $0xe0] sm:$0xff]  ;;  %v3515_v2 = vld [vmem:[%s6885_s23 + $0xe8] sm:$0xff]  ;;  %v5090_v16 = vpack.c.bf16 %v3531_v32, %v3530_v13 }
0x1537   : > { %5037 = vmatprep.subr.bf16.mxu0 %v5036_v26  ;;  %5069 = vmatprep.subr.bf16.mxu1 %v5068_v6  ;;  %v5086_v26 = vpack.c.bf16 %v3529_v1, %v3528_v0  ;;  %v5056_v6 = vpack.c.bf16 %v3515_v2, %v3514_v21  ;;  %v3704_v0 = vld [vmem:[%s6889_s11 + $0x60] sm:$0xff]  ;;  %v3705_v1 = vld [vmem:[%s6889_s11 + $0x68] sm:$0xff]  ;;  %v3706_v2 = vld [vmem:[%s6889_s11 + $0x70] sm:$0xff] }
0x1538   : > { %v5115_v21 = vpack.c.bf16 %v3705_v1, %v3704_v0  ;;  %v5118_v4 = vpack.c.bf16 %v3707_v3, %v3706_v2  ;;  %v3784_v13 = vld [vmem:[%s5999_s21 + $0x20] sm:$0xff] }
0x153a   : > { %5039 = vmatpush3.bf16.msra.mxu0 %v5038_v17  ;;  %5071 = vmatpush3.bf16.msra.mxu1 %v5070_v18  ;;  %v3516_v17 = vld [vmem:[%s6885_s23 + $0xf0] sm:$0xff]  ;;  %v3517_v18 = vld [vmem:[%s6885_s23 + $0xf8] sm:$0xff] }
0x153b   : > { %5041 = vmatprep.subr.bf16.mxu0 %v5040_v20  ;;  %5073 = vmatprep.subr.bf16.mxu1 %v5072_v22  ;;  %v5060_v52 = vpack.c.bf16 %v3517_v18, %v3516_v17  ;;  %v3549_v20 = vld [vmem:[%s6885_s23 + $0x1f8] sm:$0xff]  ;;  %v3500_v22 = vld [vmem:[%s6885_s23 + $0x70] sm:$0xff] }
0x153c   : > { %v5092_v24 = vpack.c.bf16 %v3549_v20, %v3548_v19  ;;  %v5062_v25 = vpack.c.bf16 %v3501_v23, %v3500_v22  ;;  %v3787_v17 = vld [vmem:[%s5999_s21 + $0x38] sm:$0xff]  ;;  %v3788_v19 = vld [vmem:[%s5999_s21 + $0x40] sm:$0xff]  ;;  %v3790_v22 = vld [vmem:[%s5999_s21 + $0x50] sm:$0xff] }
0x153d   : > { %v3791_v23 = vld [vmem:[%s5999_s21 + $0x58] sm:$0xff] }
0x153e   : > { %5043 = vmatpush3.bf16.msra.mxu0 %v5042_v33  ;;  %5075 = vmatpush3.bf16.msra.mxu1 %v5074_v36  ;;  %v3314_v33 = vld [vmem:[%s6888_s8] sm:$0xf] }
0x153f   : > { %5045 = vmatprep.subr.bf16.mxu0 %v5044_v39  ;;  %5077 = vmatprep.subr.bf16.mxu1 %v5076_v40  ;;  %v3319_v36 = vrot.slane %v3314_v33, %v6379_v34  ;;  %v3327_v37 = vrot.slane %v3314_v33, %v6374_v28  ;;  %v3323_v38 = vrot.slane %v3314_v33, %v6371_v27 }
0x1540   : > { %v3331_v39 = vrot.slane %v3314_v33, %v6382_v35  ;;  %v3694_v35 = vld [vmem:[%s6889_s11 + $0x10] sm:$0xff] }
0x1542   : > { %5047 = vmatpush3.bf16.msra.mxu0 %v5046_v46  ;;  %5079 = vmatpush3.bf16.msra.mxu1 %v5078_v47  ;;  %v3693_v46 = vld [vmem:[%s6889_s11 + $0x8] sm:$0xff] }
0x1543   : > { %5049 = vmatprep.subr.bf16.mxu0 %v5048_v51  ;;  %5081 = vmatprep.subr.bf16.mxu1 %v5080_v53  ;;  %v5097_v50 = vpack.c.bf16 %v3693_v46, %v3692_v45  ;;  %v3695_v53 = vld [vmem:[%s6889_s11 + $0x18] sm:$0xff]  ;;  %v3708_v46 = vld [vmem:[%s5994_s3] sm:$0x1] }
0x1544   : > { %v5100_v54 = vpack.c.bf16 %v3695_v53, %v3694_v35 }
0x1546   : > { %5051 = vmatpush3.bf16.msra.mxu0 %v5050_v59  ;;  %5083 = vmatpush3.bf16.msra.mxu1 %v5082_v60  ;;  %v5106_v59 = vpack.c.bf16 %v3699_v58, %v3698_v57  ;;  %v3700_v60 = vld [vmem:[%s6889_s11 + $0x40] sm:$0xff] }
0x1547   : > { %5053 = vmatprep.subr.bf16.mxu0 %v5052_v63  ;;  %5085 = vmatprep.subr.bf16.mxu1 %v5084_v61  ;;  %v5109_v62 = vpack.c.bf16 %v3701_v15, %v3700_v60  ;;  %v3703_v63 = vld [vmem:[%s6889_s11 + $0x58] sm:$0xff] }
0x154a   : > { %5055 = vmatpush3.bf16.msra.mxu0 %v5054_v5  ;;  %5087 = vmatpush3.bf16.msra.mxu1 %v5086_v26  ;;  %v3780_v5 = vld [vmem:[%s5999_s21] sm:$0xff]  ;;  %v3781_v26 = vld [vmem:[%s5999_s21 + $0x8] sm:$0xff] }
0x154b   : > { %5057 = vmatprep.subr.bf16.mxu0 %v5056_v6  ;;  %5089 = vmatprep.subr.bf16.mxu1 %v5088_v7  ;;  %v3782_v6 = vld [vmem:[%s5999_s21 + $0x10] sm:$0xff]  ;;  %v5121_v7 = vpack.c.bf16 %v3781_v26, %v3780_v5 }
0x154c   : > { %v5124_v9 = vpack.c.bf16 %v3783_v8, %v3782_v6 }
0x154e   : > { %5059 = vmatpush3.bf16.msra.mxu0 %v5058_v14  ;;  %5091 = vmatpush3.bf16.msra.mxu1 %v5090_v16  ;;  %v3785_v14 = vld [vmem:[%s5999_s21 + $0x28] sm:$0xff]  ;;  %v3786_v16 = vld [vmem:[%s5999_s21 + $0x30] sm:$0xff] }
0x154f   : > { %5061 = vmatprep.subr.bf16.mxu0 %v5060_v52  ;;  %5093 = vmatprep.subr.bf16.mxu1 %v5092_v24  ;;  %v5127_v32 = vpack.c.bf16 %v3785_v14, %v3784_v13  ;;  %v5130_v18 = vpack.c.bf16 %v3787_v17, %v3786_v16  ;;  %v3789_v52 = vld [vmem:[%s5999_s21 + $0x48] sm:$0xff]  ;;  %v5136_v24 = vpack.c.bf16 %v3791_v23, %v3790_v22 }
0x1550   : > { %v5133_v20 = vpack.c.bf16 %v3789_v52, %v3788_v19 }
0x1552   : > { %5063 = vmatpush3.bf16.msra.mxu0 %v5062_v25  ;;  %5095 = vmatpush3.bf16.msra.mxu1 %v5094_v31  ;;  %v3792_v25 = vld [vmem:[%s5999_s21 + $0x60] sm:$0xff] }
0x1553   : > { %5096 = vmatprep.subr.bf16.mxu0 %v5831_v10  ;;  %5120 = vmatprep.subr.bf16.mxu1 %v5831_v10  ;;  %v5139_v30 = vpack.c.bf16 %v3793_v29, %v3792_v25 }
0x1608   : > { %v3406_v40 = vpop.f32.mrb[10].mxu0  ;;  %v3477_v41 = vpop.f32.mrb[18].mxu1 }
0x1609   : > { %v3407_v42 = vadd.f32 %v3406_v40, %v3319_v36  ;;  %v3478_v43 = vadd.f32 %v3477_v41, %v3327_v37  ;;  %v3408_v44 = vpop.f32.mrb[11].mxu0  ;;  %v3479_v49 = vpop.f32.mrb[19].mxu1  ;;  %v3550_v36 = vld [vmem:[%s6890_s15] sm:$0x1] }
0x160a   : > { %v3409_v47 = vadd.f32 %v3408_v44, %v3323_v38  ;;  %v3480_v48 = vadd.f32 %v3479_v49, %v3331_v39  ;;  %v3794_v44 = vld [vmem:[%s5999_s21 + $0x70] sm:$0xff]  ;;  %v3795_v49 = vld [vmem:[%s5999_s21 + $0x78] sm:$0xff] }
0x160b   : > { %v3482_v27 = vmax.f32 %v3407_v42, 0.0  ;;  %v3484_v51 = vmax.f32 %v3478_v43, 0.0  ;;  %v5142_v45 = vpack.c.bf16 %v3795_v49, %v3794_v44 }
0x160c   : > { %v3483_v34 = vmax.f32 %v3409_v47, 0.0  ;;  %v3485_v28 = vmax.f32 %v3480_v48, 0.0 }
0x160e   : > { %3615 = vmatprep.mubr.f32.mxu0 %v3483_v34  ;;  %3685 = vmatprep.mubr.f32.mxu1 %v3485_v28  ;;  %v3796_v28 = vld [vmem:[#allocation2] sm:$0x1] }
0x160f   : > { %3616 = vmatmul.mubr.f32.vlgmr.msra.gmra.mrb[12].mxu0 %v3482_v27  ;;  %3686 = vmatmul.mubr.f32.vlgmr.msra.gmra.mrb[20].mxu1 %v3484_v51 }
0x1610   : > { %5098 = vmatpush3.bf16.msra.mxu0 %v5097_v50  ;;  %4781 = vmatprep.mubr.msk.f32.mxu0 %vm5832_vm1, %v5833_v12 }
0x1611   : > { %5099 = vmatprep.subr.bf16.mxu0 %v5831_v10  ;;  %4816 = vmatprep.mubr.msk.f32.mxu1 %vm5832_vm1, %v5833_v12  ;;  %v3702_v12 = vld [vmem:[%s6889_s11 + $0x50] sm:$0xff] }
0x1612   : > { %v5112_v61 = vpack.c.bf16 %v3703_v63, %v3702_v12  ;;  %5122 = vmatpush3.bf16.msra.mxu1 %v5121_v7 }
0x1613   : > { %5123 = vmatprep.subr.bf16.mxu1 %v5831_v10 }
0x1614   : > { %5101 = vmatpush3.bf16.msra.mxu0 %v5100_v54 }
0x1615   : > { %5102 = vmatprep.subr.bf16.mxu0 %v5831_v10 }
0x1616   : > { %5125 = vmatpush3.bf16.msra.mxu1 %v5124_v9 }
0x1617   : > { %5126 = vmatprep.subr.bf16.mxu1 %v5831_v10 }
0x1618   : > { %5104 = vmatpush3.bf16.msra.mxu0 %v5103_v56 }
0x1619   : > { %5105 = vmatprep.subr.bf16.mxu0 %v5831_v10 }
0x161a   : > { %5128 = vmatpush3.bf16.msra.mxu1 %v5127_v32 }
0x161b   : > { %5129 = vmatprep.subr.bf16.mxu1 %v5831_v10 }
0x161c   : > { %5107 = vmatpush3.bf16.msra.mxu0 %v5106_v59 }
0x161d   : > { %5108 = vmatprep.subr.bf16.mxu0 %v5831_v10 }
0x161e   : > { %5131 = vmatpush3.bf16.msra.mxu1 %v5130_v18 }
0x161f   : > { %5132 = vmatprep.subr.bf16.mxu1 %v5831_v10 }
0x1620   : > { %5110 = vmatpush3.bf16.msra.mxu0 %v5109_v62 }
0x1621   : > { %5111 = vmatprep.subr.bf16.mxu0 %v5831_v10 }
0x1622   : > { %5134 = vmatpush3.bf16.msra.mxu1 %v5133_v20 }
0x1623   : > { %5135 = vmatprep.subr.bf16.mxu1 %v5831_v10 }
0x1624   : > { %5113 = vmatpush3.bf16.msra.mxu0 %v5112_v61 }
0x1625   : > { %5114 = vmatprep.subr.bf16.mxu0 %v5831_v10 }
0x1626   : > { %5137 = vmatpush3.bf16.msra.mxu1 %v5136_v24 }
0x1627   : > { %5138 = vmatprep.subr.bf16.mxu1 %v5831_v10 }
0x1628   : > { %5116 = vmatpush3.bf16.msra.mxu0 %v5115_v21 }
0x1629   : > { %5117 = vmatprep.subr.bf16.mxu0 %v5831_v10 }
0x162a   : > { %5140 = vmatpush3.bf16.msra.mxu1 %v5139_v30 }
0x162b   : > { %5141 = vmatprep.subr.bf16.mxu1 %v5831_v10 }
0x162c   : > { %5119 = vmatpush3.bf16.msra.mxu0 %v5118_v4 }
0x162e   : > { %5143 = vmatpush3.bf16.msra.mxu1 %v5142_v45 }
0x16e2   : > { %v4389_v31 = vpop.f32.mrb[12].mxu0  ;;  %v4424_v33 = vpop.f32.mrb[20].mxu1 }
0x16e3   : > { %v4390_v37 = vpop.f32.mrb[13].mxu0  ;;  %v4425_v38 = vpop.f32.mrb[21].mxu1 }
0x16e4   : > { %v4391_v39 = vadd.f32 %v4390_v37, %v4389_v31  ;;  %v4426_v40 = vadd.f32 %v4425_v38, %v4424_v33 }
0x16e6   : > { %v3618_v41 = vadd.f32 %v4391_v39, %v3550_v36 }
0x16e8   : > { %v3688_v42 = vadd.f32 %v4426_v40, %v3618_v41 }
0x16ea   : > { %v3691_v43 = vmax.f32 %v3688_v42, 0.0 }
0x16ec   : > { %4782 = vmatmul.mubr.f32.vlgmr.msra.gmra.mrb[14].mxu0 %v3691_v43 }
0x17bf   : > { %v3775_v10 = vpop.f32.mrb[14].mxu0 }
0x17c0   : > { %v3776_v47 = vadd.f32 %v3775_v10, %v3708_v46  ;;  %v4783_v48 = vpop.f32.mrb[15].mxu0 }
0x17c2   : > { %v3779_v34 = vmax.f32 %v3776_v47, 0.0 }
0x17c4   : > { %4817 = vmatmul.mubr.f32.vlgmr.msra.gmra.mrb[22].mxu1 %v3779_v34 }
0x1897   : > { %v3863_v50 = vpop.f32.mrb[22].mxu1 }
0x1898   : > { %v3864_v27 = vadd.f32 %v3863_v50, %v3796_v28  ;;  %v4818_v51 = vpop.f32.mrb[23].mxu1 }
0x189a   : > { %3868 = vst.msk [vmem:[%s1216_s2] sm:$0x1] %vm3867_vm11, %v3864_v27 }
0x189b PF: > { %s86_s7 = sadd.s32 1, %s5777_s7  }
0x189c   : > { %p83_p8 = scmp.ge.s32.totalorder %s86_s7, 4  }
0x189e   :  { %85 = sbr.rel (!%p83_p8) target bundleno = 67 (0x43), region = 288 }
0x18a5   :  { %3886 = vsyncpa [#allocation4], 1 }
0x18a6   :  { %3888 = vsyncpa [#allocation4 + $0x1], 1 }
0x18a7   :  { %3889 = vsyncpa [#allocation6], 1 }
0x18a8   :  { %3890 = vsyncpa [#allocation9], 1 }
0x18a9   :  { %3891 = vsyncpa [#allocation12], 1 }
0x18aa   :  { %3892 = vsyncpa [#allocation15], 1 }
0x18ab   :  { %3893 = vsyncpa [#allocation18], 1 }
0x18ac   :  { %3894 = vsyncpa [#allocation21], 1 }

</bundles_post_ra>
